<compile_context>
chip_gen: v6e
topology: v6e:2x2x1
jax: 0.10.0
libtpu: 0.0.40
codegen_flags: <defaults>
</compile_context>

<pallas_src>
import functools

import jax
import jax.numpy as jnp
from jax.experimental import pallas as pl
from jax.experimental.pallas import tpu as pltpu

_LEAKY_SLOPE = 0.1
_BN_EPS = 1e-5
_ACT_DTYPE = jnp.bfloat16          # storage dtype for weights / inter-kernel activations


def _round_up(a, m):
    return (a + m - 1) // m * m


def _vmem_capacity_bytes():
    try:
        return int(pltpu.get_tpu_info().vmem_capacity_bytes)
    except Exception:
        return 64 * 1024 * 1024    # v7x per-TensorCore floor: safe everywhere


_VMEM_CAP = _vmem_capacity_bytes()
_VMEM_LIMIT = min(int(_VMEM_CAP * 0.7), 96 * 1024 * 1024)
_TILE_BUDGET = max(_VMEM_LIMIT // 6, 2 * 1024 * 1024)     # per-step working-set target


def _row_tile(M, bytes_per_row):
    """Row-tile size: big (256-multiple) tiles from the VMEM budget, preferring
    an exact divisor of M so no padded garbage rows are computed."""
    m8 = _round_up(M, 8)
    tm = _TILE_BUDGET // max(bytes_per_row, 1)
    tm = min(tm, 4096, m8)
    if m8 >= 512:                       # keep >=2 grid steps so v7x can 2-TC shard
        tm = min(tm, max(256, m8 // 2))
    if tm >= 256:
        tm -= tm % 256
    else:
        tm = max(8, tm - tm % 8)
    tm = min(tm, m8)
    if M % 8 == 0 and M % tm != 0:
        for cand in range(tm, 7, -8):
            if M % cand == 0 and cand * 2 >= tm:
                return cand
    return tm


# ----------------------------------------------------------------------------
# In-kernel activation helpers (f32 math)
# ----------------------------------------------------------------------------
def _silu(y):
    # EUP exp + EUP reciprocal (divide stays off the VALU slots)
    return y * pl.reciprocal(1.0 + jnp.exp(-y), approx=True)


def _leaky(y):
    return jnp.where(y > 0, y, _LEAKY_SLOPE * y)


# ----------------------------------------------------------------------------
# Kernel 1: fused 1x1 conv (+ folded BN bias) + SiLU        out = silu(x @ w + b)
# ----------------------------------------------------------------------------
def _gemm_silu_kernel(x_ref, w_ref, b_ref, o_ref):
    y = jnp.dot(x_ref[...], w_ref[...], preferred_element_type=jnp.float32)
    o_ref[...] = _silu(y + b_ref[...]).astype(o_ref.dtype)


def conv1x1_bn_silu(x2d, w, b, out_dtype):
    M, K = x2d.shape
    N = w.shape[1]
    bpr = x2d.dtype.itemsize * K + jnp.dtype(out_dtype).itemsize * N
    tm = _row_tile(M, bpr)
    m_pad = _round_up(M, tm)
    xp = x2d if m_pad == M else jnp.pad(x2d, ((0, m_pad - M), (0, 0)))

    out = pl.pallas_call(
        _gemm_silu_kernel,
        out_shape=jax.ShapeDtypeStruct((m_pad, N), out_dtype),
        grid_spec=pltpu.PrefetchScalarGridSpec(
            num_scalar_prefetch=0,
            grid=(m_pad // tm,),
            in_specs=[pl.BlockSpec((tm, K), lambda i: (i, 0)),
                      pl.BlockSpec((K, N), lambda i: (0, 0)),
                      pl.BlockSpec((1, N), lambda i: (0, 0))],
            out_specs=pl.BlockSpec((tm, N), lambda i: (i, 0)),
        ),
        compiler_params=pltpu.CompilerParams(
            dimension_semantics=("parallel",),
            vmem_limit_bytes=_VMEM_LIMIT),
        cost_estimate=pl.CostEstimate(
            flops=2 * m_pad * K * N,
            transcendentals=m_pad * N,
            bytes_accessed=(x2d.dtype.itemsize * m_pad * K
                            + w.dtype.itemsize * K * N
                            + jnp.dtype(out_dtype).itemsize * m_pad * N)),
    )(xp, w, b)
    return out[:M] if m_pad != M else out


# ----------------------------------------------------------------------------
# Kernel 2: whole Bottleneck fused, per batch image.
#   hid = silu(z @ w1 + b1)      (stays in VMEM)
#   y   = silu(conv3x3(hid) + b2)    via 9 shifted GEMMs from a zero-padded plane
#   out = y + z                  (if shortcut)
# ----------------------------------------------------------------------------
def _make_bottleneck_kernel(H, W, C, shortcut):
    def kernel(z_ref, w1_ref, b1_ref, w2_ref, b2_ref, o_ref, pad_ref):
        zb = z_ref[0]                              # (H, W, C) bf16
        z2 = zb.reshape(H * W, C)

        # 1x1 conv + BN + SiLU, entirely in VMEM / registers
        hid = jnp.dot(z2, w1_ref[...], preferred_element_type=jnp.float32)
        hid = _silu(hid + b1_ref[...])             # (H*W, C) f32

        # in-kernel "im2col": hid into a zero-padded VMEM scratch plane
        pad_ref[...] = jnp.zeros_like(pad_ref)
        pad_ref[1:H + 1, 1:W + 1, :] = hid.reshape(H, W, C)
        padv = pad_ref[...]                        # (H+2, W+2, C) f32

        # 3x3 "SAME" conv = 9 shifted GEMMs against per-tap weight slices
        acc = jnp.broadcast_to(b2_ref[...], (H * W, C)).astype(jnp.float32)
        for t in range(9):
            ky, kx = t // 3, t % 3
            tap = padv[ky:ky + H, kx:kx + W, :].astype(_ACT_DTYPE).reshape(H * W, C)
            acc = acc + jnp.dot(tap, w2_ref[t * C:(t + 1) * C, :],
                                preferred_element_type=jnp.float32)
        y = _silu(acc)
        if shortcut:
            y = y + z2.astype(jnp.float32)
        o_ref[0] = y.reshape(H, W, C).astype(o_ref.dtype)
    return kernel


def bottleneck_fused(z_nhwc, w1, b1, w2, b2, shortcut):
    # TODO(synk): for very large H*W planes the full-plane block exceeds VMEM;
    # halo-tile the H axis (manual DMA of (tile_h+2, W, C) blocks) in that case.
    N, H, W, C = z_nhwc.shape
    return pl.pallas_call(
        _make_bottleneck_kernel(H, W, C, shortcut),
        out_shape=jax.ShapeDtypeStruct((N, H, W, C), z_nhwc.dtype),
        grid_spec=pltpu.PrefetchScalarGridSpec(
            num_scalar_prefetch=0,
            grid=(N,),
            in_specs=[pl.BlockSpec((1, H, W, C), lambda b: (b, 0, 0, 0)),
                      pl.BlockSpec((C, C), lambda b: (0, 0)),
                      pl.BlockSpec((1, C), lambda b: (0, 0)),
                      pl.BlockSpec((9 * C, C), lambda b: (0, 0)),
                      pl.BlockSpec((1, C), lambda b: (0, 0))],
            out_specs=pl.BlockSpec((1, H, W, C), lambda b: (b, 0, 0, 0)),
            scratch_shapes=[pltpu.VMEM((H + 2, W + 2, C), jnp.float32)],
        ),
        compiler_params=pltpu.CompilerParams(
            dimension_semantics=("parallel",),
            vmem_limit_bytes=_VMEM_LIMIT),
        cost_estimate=pl.CostEstimate(
            flops=20 * N * H * W * C * C,
            transcendentals=2 * N * H * W * C,
            bytes_accessed=2 * z_nhwc.dtype.itemsize * N * H * W * C
                           + w2.dtype.itemsize * 10 * C * C),
    )(z_nhwc, w1, b1, w2, b2)


# ----------------------------------------------------------------------------
# Kernel 3: fused CSP tail.
#   y1 = leaky(z @ w3 + b3);  y2 = leaky(x @ w2 + b2)      (concat-BN folded in)
#   out = silu(y1 @ w4a + y2 @ w4b + b4)                    (concat -> row-split of w4)
# ----------------------------------------------------------------------------
def _tail_kernel(x_ref, z_ref, w3_ref, b3_ref, w2_ref, b2_ref,
                 w4a_ref, w4b_ref, b4_ref, o_ref):
    y1 = _leaky(jnp.dot(z_ref[...], w3_ref[...],
                        preferred_element_type=jnp.float32) + b3_ref[...])
    y2 = _leaky(jnp.dot(x_ref[...], w2_ref[...],
                        preferred_element_type=jnp.float32) + b2_ref[...])
    y = (jnp.dot(y1.astype(w4a_ref.dtype), w4a_ref[...],
                 preferred_element_type=jnp.float32)
         + jnp.dot(y2.astype(w4b_ref.dtype), w4b_ref[...],
                   preferred_element_type=jnp.float32)
         + b4_ref[...])
    o_ref[...] = _silu(y).astype(o_ref.dtype)


def csp_tail(x2d, z2d, w3, b3, w2, b2, w4a, w4b, b4, out_dtype):
    M, c1 = x2d.shape
    c_ = z2d.shape[1]
    c2 = w4a.shape[1]
    bpr = (x2d.dtype.itemsize * c1 + z2d.dtype.itemsize * c_
           + jnp.dtype(out_dtype).itemsize * c2)
    tm = _row_tile(M, bpr)
    m_pad = _round_up(M, tm)
    if m_pad != M:
        x2d = jnp.pad(x2d, ((0, m_pad - M), (0, 0)))
        z2d = jnp.pad(z2d, ((0, m_pad - M), (0, 0)))

    out = pl.pallas_call(
        _tail_kernel,
        out_shape=jax.ShapeDtypeStruct((m_pad, c2), out_dtype),
        grid_spec=pltpu.PrefetchScalarGridSpec(
            num_scalar_prefetch=0,
            grid=(m_pad // tm,),
            in_specs=[pl.BlockSpec((tm, c1), lambda i: (i, 0)),
                      pl.BlockSpec((tm, c_), lambda i: (i, 0)),
                      pl.BlockSpec((c_, c_), lambda i: (0, 0)),
                      pl.BlockSpec((1, c_), lambda i: (0, 0)),
                      pl.BlockSpec((c1, c_), lambda i: (0, 0)),
                      pl.BlockSpec((1, c_), lambda i: (0, 0)),
                      pl.BlockSpec((c_, c2), lambda i: (0, 0)),
                      pl.BlockSpec((c_, c2), lambda i: (0, 0)),
                      pl.BlockSpec((1, c2), lambda i: (0, 0))],
            out_specs=pl.BlockSpec((tm, c2), lambda i: (i, 0)),
        ),
        compiler_params=pltpu.CompilerParams(
            dimension_semantics=("parallel",),
            vmem_limit_bytes=_VMEM_LIMIT),
        cost_estimate=pl.CostEstimate(
            flops=2 * m_pad * (c1 * c_ + c_ * c_ + 2 * c_ * c2),
            transcendentals=m_pad * c2,
            bytes_accessed=(x2d.dtype.itemsize * m_pad * c1
                            + z2d.dtype.itemsize * m_pad * c_
                            + jnp.dtype(out_dtype).itemsize * m_pad * c2)),
    )(x2d, z2d, w3, b3, w2, b2, w4a, w4b, b4)
    return out[:M] if m_pad != M else out


# ----------------------------------------------------------------------------
# Parameter folding (BN scale into weights, done ONCE) and forward pass
# ----------------------------------------------------------------------------
def _bn_scale_bias(bn):
    gamma, beta, mean, var = bn
    s = gamma / jnp.sqrt(var + _BN_EPS)
    return s, beta - mean * s


def fold_params(p):
    c_ = p["cv1_w"].shape[1]
    fp = {}

    s, b = _bn_scale_bias(p["cv1_bn"])
    fp["cv1_w"] = (p["cv1_w"] * s[None, :]).astype(_ACT_DTYPE)
    fp["cv1_b"] = b.reshape(1, -1).astype(jnp.float32)

    # concat-BN split across the channel halves and folded into cv3 / cv2
    sbn, bbn = _bn_scale_bias(p["bn"])
    fp["cv3_w"] = (p["cv3_w"] * sbn[None, :c_]).astype(_ACT_DTYPE)
    fp["cv3_b"] = bbn[:c_].reshape(1, -1).astype(jnp.float32)
    fp["cv2_w"] = (p["cv2_w"] * sbn[None, c_:]).astype(_ACT_DTYPE)
    fp["cv2_b"] = bbn[c_:].reshape(1, -1).astype(jnp.float32)

    s4, b4 = _bn_scale_bias(p["cv4_bn"])
    w4 = p["cv4_w"] * s4[None, :]
    fp["cv4a_w"] = w4[:c_, :].astype(_ACT_DTYPE)     # rows fed by y1
    fp["cv4b_w"] = w4[c_:, :].astype(_ACT_DTYPE)     # rows fed by y2
    fp["cv4_b"] = b4.reshape(1, -1).astype(jnp.float32)

    fp["m"] = []
    for bp in p["m"]:
        s1, b1 = _bn_scale_bias(bp["cv1_bn"])
        s2, b2 = _bn_scale_bias(bp["cv2_bn"])
        w2 = (bp["cv2_w"] * s2[None, None, None, :]).reshape(9 * c_, c_)  # tap-major
        fp["m"].append({
            "cv1_w": (bp["cv1_w"] * s1[None, :]).astype(_ACT_DTYPE),
            "cv1_b": b1.reshape(1, -1).astype(jnp.float32),
            "cv2_w": w2.astype(_ACT_DTYPE),
            "cv2_b": b2.reshape(1, -1).astype(jnp.float32),
        })
    return fp


def bottleneck_csp_forward(x_nchw, fp, shortcut=True):
    n, c1, h, w = x_nchw.shape
    c_ = fp["cv1_w"].shape[1]
    c2 = fp["cv4a_w"].shape[1]
    m = n * h * w

    # TODO(synk): NCHW<->NHWC boundary transposes remain plain-XLA passes
    # (module spec is NCHW in / NCHW out).
    x_nhwc = jnp.transpose(x_nchw, (0, 2, 3, 1))
    x2d = x_nhwc.reshape(m, c1).astype(_ACT_DTYPE)

    # cv1: 1x1 conv + BN + SiLU
    z2d = conv1x1_bn_silu(x2d, fp["cv1_w"], fp["cv1_b"], _ACT_DTYPE)

    # m: n x Bottleneck, each fully fused (1x1 + 3x3 + shortcut in one kernel)
    z = z2d.reshape(n, h, w, c_)
    for bw in fp["m"]:
        z = bottleneck_fused(z, bw["cv1_w"], bw["cv1_b"],
                             bw["cv2_w"], bw["cv2_b"], shortcut)
    z2d = z.reshape(m, c_)

    # cv3 / cv2 / concat-BN / LeakyReLU / cv4+BN+SiLU fused into one kernel
    out2d = csp_tail(x2d, z2d,
                     fp["cv3_w"], fp["cv3_b"], fp["cv2_w"], fp["cv2_b"],
                     fp["cv4a_w"], fp["cv4b_w"], fp["cv4_b"], jnp.float32)
    return jnp.transpose(out2d.reshape(n, h, w, c2), (0, 3, 1, 2))


# ----------------------------------------------------------------------------
# Parameters + module wrapper
# ----------------------------------------------------------------------------
def _init_w(key, shape, fan_in):
    return (jax.random.normal(key, shape) / (float(fan_in) ** 0.5)).astype(jnp.float32)


def _init_bn(key, c):
    k1, k2, k3, k4 = jax.random.split(key, 4)
    gamma = jax.random.uniform(k1, (c,), minval=0.5, maxval=1.5, dtype=jnp.float32)
    beta = 0.1 * jax.random.normal(k2, (c,), dtype=jnp.float32)
    mean = 0.1 * jax.random.normal(k3, (c,), dtype=jnp.float32)
    var = jax.random.uniform(k4, (c,), minval=0.5, maxval=1.5, dtype=jnp.float32)
    return (gamma, beta, mean, var)


def init_bottleneck_csp_params(key, c1, c2, n=1, e=0.5):
    c_ = int(c2 * e)
    keys = iter(jax.random.split(key, 7 + 4 * n))
    p = {}
    p["cv1_w"] = _init_w(next(keys), (c1, c_), c1)      # Conv.conv (bias=False)
    p["cv1_bn"] = _init_bn(next(keys), c_)
    p["cv2_w"] = _init_w(next(keys), (c1, c_), c1)      # plain Conv2d, bias=False
    p["cv3_w"] = _init_w(next(keys), (c_, c_), c_)      # plain Conv2d, bias=False
    p["cv4_w"] = _init_w(next(keys), (2 * c_, c2), 2 * c_)
    p["cv4_bn"] = _init_bn(next(keys), c2)
    p["bn"] = _init_bn(next(keys), 2 * c_)              # BN over cat(y1, y2)
    p["m"] = []
    for _ in range(n):
        bp = {}
        bp["cv1_w"] = _init_w(next(keys), (c_, c_), c_)
        bp["cv1_bn"] = _init_bn(next(keys), c_)
        bp["cv2_w"] = _init_w(next(keys), (3, 3, c_, c_), 9 * c_)   # HWIO
        bp["cv2_bn"] = _init_bn(next(keys), c_)
        p["m"].append(bp)
    return p


class BottleneckCSP:
    """Mirror of the PyTorch BottleneckCSP (inference-mode BatchNorm)."""

    def __init__(self, c1, c2, n=1, shortcut=True, g=1, e=0.5, *, key):
        # TODO(synk): grouped 3x3 conv (g > 1) is not implemented (module default g=1).
        assert g == 1, "grouped convolutions not supported"
        self.shortcut = shortcut
        self.params = init_bottleneck_csp_params(key, c1, c2, n=n, e=e)
        self.folded = fold_params(self.params)          # BN fold + bf16 cast, once
        self._forward = jax.jit(
            functools.partial(bottleneck_csp_forward, shortcut=shortcut))

    def __call__(self, x_nchw):
        return self._forward(x_nchw, self.folded)


# ----------------------------------------------------------------------------
# Pure-JAX reference (same eval-mode BN semantics as the PyTorch module)
# ----------------------------------------------------------------------------
def bottleneck_csp_reference(x_nchw, p, shortcut=True):
    hp = jax.lax.Precision.HIGHEST
    x = jnp.transpose(x_nchw, (0, 2, 3, 1))

    def conv1x1(v, wm):
        return jnp.einsum("nhwc,cd->nhwd", v, wm, precision=hp)

    def bn(v, prm):
        g, b, mu, var = prm
        return (v - mu) * (g / jnp.sqrt(var + _BN_EPS)) + b

    def silu(v):
        return v * (1.0 / (1.0 + jnp.exp(-v)))

    def leaky(v):
        return jnp.where(v > 0, v, _LEAKY_SLOPE * v)

    t = silu(bn(conv1x1(x, p["cv1_w"]), p["cv1_bn"]))
    z = t
    for bp in p["m"]:
        h = silu(bn(conv1x1(z, bp["cv1_w"]), bp["cv1_bn"]))
        c = jax.lax.conv_general_dilated(
            h, bp["cv2_w"], (1, 1), "SAME",
            dimension_numbers=("NHWC", "HWIO", "NHWC"), precision=hp)
        c = silu(bn(c, bp["cv2_bn"]))
        z = z + c if shortcut else c
    y1 = conv1x1(z, p["cv3_w"])
    y2 = conv1x1(x, p["cv2_w"])
    h = leaky(bn(jnp.concatenate([y1, y2], axis=-1), p["bn"]))
    out = silu(bn(conv1x1(h, p["cv4_w"]), p["cv4_bn"]))
    return jnp.transpose(out, (0, 3, 1, 2))


if __name__ == "__main__":
    key = jax.random.PRNGKey(0)
    kp, kx = jax.random.split(key)

    # Small NCHW input: batch=2, channels=16 (CSP hidden width c_ = 8), 16x16 spatial.
    N, C, H, W = 2, 16, 16, 16
    model = BottleneckCSP(C, C, n=1, shortcut=True, g=1, e=0.5, key=kp)
    x = jax.random.normal(kx, (N, C, H, W), dtype=jnp.float32)

    out = jax.block_until_ready(model(x))
    ref = jax.block_until_ready(bottleneck_csp_reference(x, model.params, shortcut=True))

    assert out.shape == (N, C, H, W)
    max_err = float(jnp.max(jnp.abs(out - ref)))
    # bf16 activations/weights vs f32-HIGHEST reference: allow a few 1e-2 of slack.
    assert max_err < 5e-2, f"max abs err = {max_err}"
    print("KERNEL_OK")
</pallas_src>

<mosaic_0001>
module attributes {stable_mosaic.version = 11 : i64} {
  func.func @_gemm_silu_kernel(%arg0: i32, %arg1: memref<256x16xbf16, #tpu.memory_space<vmem>>, %arg2: memref<16x8xbf16, #tpu.memory_space<vmem>>, %arg3: memref<1x8xf32, #tpu.memory_space<vmem>>, %arg4: memref<256x8xbf16, #tpu.memory_space<vmem>>) attributes {dimension_semantics = [#tpu.dimension_semantics<parallel>], iteration_bounds = array<i64: 2>, scalar_prefetch = 0 : i64, scratch_operands = 0 : i64, tpu.core_type = #tpu.core_type<tc>, window_params = [{transform_indices = @transform_0, window_bounds = array<i64: 256, 16>}, {pipeline_mode = #tpu.pipeline_mode<synchronous>, transform_indices = @transform_1, window_bounds = array<i64: 16, 8>}, {pipeline_mode = #tpu.pipeline_mode<synchronous>, transform_indices = @transform_2, window_bounds = array<i64: 1, 8>}, {transform_indices = @transform_3, window_bounds = array<i64: 256, 8>}]} {
    %c0 = arith.constant 0 : index
    %c0_0 = arith.constant 0 : index
    %0 = vector.load %arg1[%c0, %c0_0] : memref<256x16xbf16, #tpu.memory_space<vmem>>, vector<256x16xbf16>
    %c0_1 = arith.constant 0 : index
    %c0_2 = arith.constant 0 : index
    %1 = vector.load %arg2[%c0_1, %c0_2] : memref<16x8xbf16, #tpu.memory_space<vmem>>, vector<16x8xbf16>
    %cst = arith.constant dense<0.000000e+00> : vector<256x8xf32>
    %2 = tpu.matmul %0, %1, %cst {dimension_numbers = #tpu.dot_dimension_numbers<[1], [0], [0], [1], [0, 0, 1, 1], [], []>} : vector<256x16xbf16>, vector<16x8xbf16>, vector<256x8xf32> -> vector<256x8xf32>
    %c0_3 = arith.constant 0 : index
    %c0_4 = arith.constant 0 : index
    %3 = vector.load %arg3[%c0_3, %c0_4] : memref<1x8xf32, #tpu.memory_space<vmem>>, vector<1x8xf32>
    %4 = vector.broadcast %3 : vector<1x8xf32> to vector<256x8xf32>
    %5 = arith.addf %2, %4 : vector<256x8xf32>
    %cst_5 = arith.constant 0.000000e+00 : f32
    %6 = vector.broadcast %cst_5 : f32 to vector<256x8xf32>
    %7 = arith.subf %6, %5 : vector<256x8xf32>
    %8 = math.exp %7 : vector<256x8xf32>
    %cst_6 = arith.constant 1.000000e+00 : f32
    %9 = vector.broadcast %cst_6 : f32 to vector<256x8xf32>
    %10 = arith.addf %9, %8 : vector<256x8xf32>
    %11 = tpu.reciprocal %10 {approx = true} : vector<256x8xf32> -> vector<256x8xf32>
    %12 = arith.mulf %5, %11 : vector<256x8xf32>
    %13 = arith.truncf %12 : vector<256x8xf32> to vector<256x8xbf16>
    %c0_7 = arith.constant 0 : index
    %c0_8 = arith.constant 0 : index
    %14 = vector.load %arg4[%c0_7, %c0_8] : memref<256x8xbf16, #tpu.memory_space<vmem>>, vector<256x8xbf16>
    tpu.vector_store %arg4[%c0_7, %c0_8], %13 {strides = array<i32>} : memref<256x8xbf16, #tpu.memory_space<vmem>>, vector<256x8xbf16>,
    return
  }
  func.func @transform_0(%arg0: i32) -> (i32, i32) {
    %c0_i32 = arith.constant 0 : i32
    %c0_i32_0 = arith.constant 0 : i32
    return %arg0, %c0_i32 : i32, i32
  }
  func.func @transform_1(%arg0: i32) -> (i32, i32) {
    %c0_i32 = arith.constant 0 : i32
    %c0_i32_0 = arith.constant 0 : i32
    %c0_i32_1 = arith.constant 0 : i32
    return %c0_i32, %c0_i32_0 : i32, i32
  }
  func.func @transform_2(%arg0: i32) -> (i32, i32) {
    %c0_i32 = arith.constant 0 : i32
    %c0_i32_0 = arith.constant 0 : i32
    %c0_i32_1 = arith.constant 0 : i32
    return %c0_i32, %c0_i32_0 : i32, i32
  }
  func.func @transform_3(%arg0: i32) -> (i32, i32) {
    %c0_i32 = arith.constant 0 : i32
    %c0_i32_0 = arith.constant 0 : i32
    return %arg0, %c0_i32 : i32, i32
  }
}

module attributes {stable_mosaic.version = 11 : i64} {
  func.func @_tail_kernel(%arg0: i32, %arg1: memref<256x16xbf16, #tpu.memory_space<vmem>>, %arg2: memref<256x8xbf16, #tpu.memory_space<vmem>>, %arg3: memref<8x8xbf16, #tpu.memory_space<vmem>>, %arg4: memref<1x8xf32, #tpu.memory_space<vmem>>, %arg5: memref<16x8xbf16, #tpu.memory_space<vmem>>, %arg6: memref<1x8xf32, #tpu.memory_space<vmem>>, %arg7: memref<8x16xbf16, #tpu.memory_space<vmem>>, %arg8: memref<8x16xbf16, #tpu.memory_space<vmem>>, %arg9: memref<1x16xf32, #tpu.memory_space<vmem>>, %arg10: memref<256x16xf32, #tpu.memory_space<vmem>>) attributes {dimension_semantics = [#tpu.dimension_semantics<parallel>], iteration_bounds = array<i64: 2>, scalar_prefetch = 0 : i64, scratch_operands = 0 : i64, tpu.core_type = #tpu.core_type<tc>, window_params = [{transform_indices = @transform_0, window_bounds = array<i64: 256, 16>}, {transform_indices = @transform_1, window_bounds = array<i64: 256, 8>}, {pipeline_mode = #tpu.pipeline_mode<synchronous>, transform_indices = @transform_2, window_bounds = array<i64: 8, 8>}, {pipeline_mode = #tpu.pipeline_mode<synchronous>, transform_indices = @transform_3, window_bounds = array<i64: 1, 8>}, {pipeline_mode = #tpu.pipeline_mode<synchronous>, transform_indices = @transform_4, window_bounds = array<i64: 16, 8>}, {pipeline_mode = #tpu.pipeline_mode<synchronous>, transform_indices = @transform_5, window_bounds = array<i64: 1, 8>}, {pipeline_mode = #tpu.pipeline_mode<synchronous>, transform_indices = @transform_6, window_bounds = array<i64: 8, 16>}, {pipeline_mode = #tpu.pipeline_mode<synchronous>, transform_indices = @transform_7, window_bounds = array<i64: 8, 16>}, {pipeline_mode = #tpu.pipeline_mode<synchronous>, transform_indices = @transform_8, window_bounds = array<i64: 1, 16>}, {transform_indices = @transform_9, window_bounds = array<i64: 256, 16>}]} {
    %c0 = arith.constant 0 : index
    %c0_0 = arith.constant 0 : index
    %0 = vector.load %arg2[%c0, %c0_0] : memref<256x8xbf16, #tpu.memory_space<vmem>>, vector<256x8xbf16>
    %c0_1 = arith.constant 0 : index
    %c0_2 = arith.constant 0 : index
    %1 = vector.load %arg3[%c0_1, %c0_2] : memref<8x8xbf16, #tpu.memory_space<vmem>>, vector<8x8xbf16>
    %cst = arith.constant dense<0.000000e+00> : vector<256x8xf32>
    %2 = tpu.matmul %0, %1, %cst {dimension_numbers = #tpu.dot_dimension_numbers<[1], [0], [0], [1], [0, 0, 1, 1], [], []>} : vector<256x8xbf16>, vector<8x8xbf16>, vector<256x8xf32> -> vector<256x8xf32>
    %c0_3 = arith.constant 0 : index
    %c0_4 = arith.constant 0 : index
    %3 = vector.load %arg4[%c0_3, %c0_4] : memref<1x8xf32, #tpu.memory_space<vmem>>, vector<1x8xf32>
    %4 = vector.broadcast %3 : vector<1x8xf32> to vector<256x8xf32>
    %5 = arith.addf %2, %4 : vector<256x8xf32>
    %cst_5 = arith.constant 0.000000e+00 : f32
    %6 = vector.broadcast %cst_5 : f32 to vector<256x8xf32>
    %7 = arith.cmpf ogt, %5, %6 : vector<256x8xf32>
    %cst_6 = arith.constant 1.000000e-01 : f32
    %8 = vector.broadcast %cst_6 : f32 to vector<256x8xf32>
    %9 = arith.mulf %8, %5 : vector<256x8xf32>
    %10 = arith.select %7, %5, %9 : vector<256x8xi1>, vector<256x8xf32>
    %c0_7 = arith.constant 0 : index
    %c0_8 = arith.constant 0 : index
    %11 = vector.load %arg1[%c0_7, %c0_8] : memref<256x16xbf16, #tpu.memory_space<vmem>>, vector<256x16xbf16>
    %c0_9 = arith.constant 0 : index
    %c0_10 = arith.constant 0 : index
    %12 = vector.load %arg5[%c0_9, %c0_10] : memref<16x8xbf16, #tpu.memory_space<vmem>>, vector<16x8xbf16>
    %cst_11 = arith.constant dense<0.000000e+00> : vector<256x8xf32>
    %13 = tpu.matmul %11, %12, %cst_11 {dimension_numbers = #tpu.dot_dimension_numbers<[1], [0], [0], [1], [0, 0, 1, 1], [], []>} : vector<256x16xbf16>, vector<16x8xbf16>, vector<256x8xf32> -> vector<256x8xf32>
    %c0_12 = arith.constant 0 : index
    %c0_13 = arith.constant 0 : index
    %14 = vector.load %arg6[%c0_12, %c0_13] : memref<1x8xf32, #tpu.memory_space<vmem>>, vector<1x8xf32>
    %15 = vector.broadcast %14 : vector<1x8xf32> to vector<256x8xf32>
    %16 = arith.addf %13, %15 : vector<256x8xf32>
    %cst_14 = arith.constant 0.000000e+00 : f32
    %17 = vector.broadcast %cst_14 : f32 to vector<256x8xf32>
    %18 = arith.cmpf ogt, %16, %17 : vector<256x8xf32>
    %cst_15 = arith.constant 1.000000e-01 : f32
    %19 = vector.broadcast %cst_15 : f32 to vector<256x8xf32>
    %20 = arith.mulf %19, %16 : vector<256x8xf32>
    %21 = arith.select %18, %16, %20 : vector<256x8xi1>, vector<256x8xf32>
    %22 = arith.truncf %10 : vector<256x8xf32> to vector<256x8xbf16>
    %c0_16 = arith.constant 0 : index
    %c0_17 = arith.constant 0 : index
    %23 = vector.load %arg7[%c0_16, %c0_17] : memref<8x16xbf16, #tpu.memory_space<vmem>>, vector<8x16xbf16>
    %cst_18 = arith.constant dense<0.000000e+00> : vector<256x16xf32>
    %24 = tpu.matmul %22, %23, %cst_18 {dimension_numbers = #tpu.dot_dimension_numbers<[1], [0], [0], [1], [0, 0, 1, 1], [], []>} : vector<256x8xbf16>, vector<8x16xbf16>, vector<256x16xf32> -> vector<256x16xf32>
    %25 = arith.truncf %21 : vector<256x8xf32> to vector<256x8xbf16>
    %c0_19 = arith.constant 0 : index
    %c0_20 = arith.constant 0 : index
    %26 = vector.load %arg8[%c0_19, %c0_20] : memref<8x16xbf16, #tpu.memory_space<vmem>>, vector<8x16xbf16>
    %cst_21 = arith.constant dense<0.000000e+00> : vector<256x16xf32>
    %27 = tpu.matmul %25, %26, %cst_21 {dimension_numbers = #tpu.dot_dimension_numbers<[1], [0], [0], [1], [0, 0, 1, 1], [], []>} : vector<256x8xbf16>, vector<8x16xbf16>, vector<256x16xf32> -> vector<256x16xf32>
    %28 = arith.addf %24, %27 : vector<256x16xf32>
    %c0_22 = arith.constant 0 : index
    %c0_23 = arith.constant 0 : index
    %29 = vector.load %arg9[%c0_22, %c0_23] : memref<1x16xf32, #tpu.memory_space<vmem>>, vector<1x16xf32>
    %30 = vector.broadcast %29 : vector<1x16xf32> to vector<256x16xf32>
    %31 = arith.addf %28, %30 : vector<256x16xf32>
    %cst_24 = arith.constant 0.000000e+00 : f32
    %32 = vector.broadcast %cst_24 : f32 to vector<256x16xf32>
    %33 = arith.subf %32, %31 : vector<256x16xf32>
    %34 = math.exp %33 : vector<256x16xf32>
    %cst_25 = arith.constant 1.000000e+00 : f32
    %35 = vector.broadcast %cst_25 : f32 to vector<256x16xf32>
    %36 = arith.addf %35, %34 : vector<256x16xf32>
    %37 = tpu.reciprocal %36 {approx = true} : vector<256x16xf32> -> vector<256x16xf32>
    %38 = arith.mulf %31, %37 : vector<256x16xf32>
    %c0_26 = arith.constant 0 : index
    %c0_27 = arith.constant 0 : index
    %39 = vector.load %arg10[%c0_26, %c0_27] : memref<256x16xf32, #tpu.memory_space<vmem>>, vector<256x16xf32>
    tpu.vector_store %arg10[%c0_26, %c0_27], %38 {strides = array<i32>} : memref<256x16xf32, #tpu.memory_space<vmem>>, vector<256x16xf32>,
    return
  }
  func.func @transform_0(%arg0: i32) -> (i32, i32) {
    %c0_i32 = arith.constant 0 : i32
    %c0_i32_0 = arith.constant 0 : i32
    return %arg0, %c0_i32 : i32, i32
  }
  func.func @transform_1(%arg0: i32) -> (i32, i32) {
    %c0_i32 = arith.constant 0 : i32
    %c0_i32_0 = arith.constant 0 : i32
    return %arg0, %c0_i32 : i32, i32
  }
  func.func @transform_2(%arg0: i32) -> (i32, i32) {
    %c0_i32 = arith.constant 0 : i32
    %c0_i32_0 = arith.constant 0 : i32
    %c0_i32_1 = arith.constant 0 : i32
    return %c0_i32, %c0_i32_0 : i32, i32
  }
  func.func @transform_3(%arg0: i32) -> (i32, i32) {
    %c0_i32 = arith.constant 0 : i32
    %c0_i32_0 = arith.constant 0 : i32
    %c0_i32_1 = arith.constant 0 : i32
    return %c0_i32, %c0_i32_0 : i32, i32
  }
  func.func @transform_4(%arg0: i32) -> (i32, i32) {
    %c0_i32 = arith.constant 0 : i32
    %c0_i32_0 = arith.constant 0 : i32
    %c0_i32_1 = arith.constant 0 : i32
    return %c0_i32, %c0_i32_0 : i32, i32
  }
  func.func @transform_5(%arg0: i32) -> (i32, i32) {
    %c0_i32 = arith.constant 0 : i32
    %c0_i32_0 = arith.constant 0 : i32
    %c0_i32_1 = arith.constant 0 : i32
    return %c0_i32, %c0_i32_0 : i32, i32
  }
  func.func @transform_6(%arg0: i32) -> (i32, i32) {
    %c0_i32 = arith.constant 0 : i32
    %c0_i32_0 = arith.constant 0 : i32
    %c0_i32_1 = arith.constant 0 : i32
    return %c0_i32, %c0_i32_0 : i32, i32
  }
  func.func @transform_7(%arg0: i32) -> (i32, i32) {
    %c0_i32 = arith.constant 0 : i32
    %c0_i32_0 = arith.constant 0 : i32
    %c0_i32_1 = arith.constant 0 : i32
    return %c0_i32, %c0_i32_0 : i32, i32
  }
  func.func @transform_8(%arg0: i32) -> (i32, i32) {
    %c0_i32 = arith.constant 0 : i32
    %c0_i32_0 = arith.constant 0 : i32
    %c0_i32_1 = arith.constant 0 : i32
    return %c0_i32, %c0_i32_0 : i32, i32
  }
  func.func @transform_9(%arg0: i32) -> (i32, i32) {
    %c0_i32 = arith.constant 0 : i32
    %c0_i32_0 = arith.constant 0 : i32
    return %arg0, %c0_i32 : i32, i32
  }
}

module attributes {stable_mosaic.version = 11 : i64} {
  func.func @kernel(%arg0: i32, %arg1: memref<1x16x16x8xbf16, #tpu.memory_space<vmem>>, %arg2: memref<8x8xbf16, #tpu.memory_space<vmem>>, %arg3: memref<1x8xf32, #tpu.memory_space<vmem>>, %arg4: memref<72x8xbf16, #tpu.memory_space<vmem>>, %arg5: memref<1x8xf32, #tpu.memory_space<vmem>>, %arg6: memref<1x16x16x8xbf16, #tpu.memory_space<vmem>>, %arg7: memref<18x18x8xf32, #tpu.memory_space<vmem>>) attributes {dimension_semantics = [#tpu.dimension_semantics<parallel>], iteration_bounds = array<i64: 2>, scalar_prefetch = 0 : i64, scratch_operands = 1 : i64, tpu.core_type = #tpu.core_type<tc>, window_params = [{transform_indices = @transform_0, window_bounds = array<i64: 1, 16, 16, 8>}, {pipeline_mode = #tpu.pipeline_mode<synchronous>, transform_indices = @transform_1, window_bounds = array<i64: 8, 8>}, {pipeline_mode = #tpu.pipeline_mode<synchronous>, transform_indices = @transform_2, window_bounds = array<i64: 1, 8>}, {pipeline_mode = #tpu.pipeline_mode<synchronous>, transform_indices = @transform_3, window_bounds = array<i64: 72, 8>}, {pipeline_mode = #tpu.pipeline_mode<synchronous>, transform_indices = @transform_4, window_bounds = array<i64: 1, 8>}, {transform_indices = @transform_5, window_bounds = array<i64: 1, 16, 16, 8>}]} {
    %c0 = arith.constant 0 : index
    %c0_0 = arith.constant 0 : index
    %c0_1 = arith.constant 0 : index
    %c0_2 = arith.constant 0 : index
    %0 = vector.load %arg1[%c0, %c0_0, %c0_1, %c0_2] : memref<1x16x16x8xbf16, #tpu.memory_space<vmem>>, vector<1x16x16x8xbf16>
    %1 = vector.shape_cast %0 : vector<1x16x16x8xbf16> to vector<16x16x8xbf16>
    %2 = vector.shape_cast %1 : vector<16x16x8xbf16> to vector<256x8xbf16>
    %c0_3 = arith.constant 0 : index
    %c0_4 = arith.constant 0 : index
    %3 = vector.load %arg2[%c0_3, %c0_4] : memref<8x8xbf16, #tpu.memory_space<vmem>>, vector<8x8xbf16>
    %cst = arith.constant dense<0.000000e+00> : vector<256x8xf32>
    %4 = tpu.matmul %2, %3, %cst {dimension_numbers = #tpu.dot_dimension_numbers<[1], [0], [0], [1], [0, 0, 1, 1], [], []>} : vector<256x8xbf16>, vector<8x8xbf16>, vector<256x8xf32> -> vector<256x8xf32>
    %c0_5 = arith.constant 0 : index
    %c0_6 = arith.constant 0 : index
    %5 = vector.load %arg3[%c0_5, %c0_6] : memref<1x8xf32, #tpu.memory_space<vmem>>, vector<1x8xf32>
    %6 = vector.broadcast %5 : vector<1x8xf32> to vector<256x8xf32>
    %7 = arith.addf %4, %6 : vector<256x8xf32>
    %cst_7 = arith.constant 0.000000e+00 : f32
    %8 = vector.broadcast %cst_7 : f32 to vector<256x8xf32>
    %9 = arith.subf %8, %7 : vector<256x8xf32>
    %10 = math.exp %9 : vector<256x8xf32>
    %cst_8 = arith.constant 1.000000e+00 : f32
    %11 = vector.broadcast %cst_8 : f32 to vector<256x8xf32>
    %12 = arith.addf %11, %10 : vector<256x8xf32>
    %13 = tpu.reciprocal %12 {approx = true} : vector<256x8xf32> -> vector<256x8xf32>
    %14 = arith.mulf %7, %13 : vector<256x8xf32>
    %cst_9 = arith.constant 0.000000e+00 : f32
    %15 = vector.broadcast %cst_9 : f32 to vector<18x18x8xf32>
    %c0_10 = arith.constant 0 : index
    %c0_11 = arith.constant 0 : index
    %c0_12 = arith.constant 0 : index
    %16 = vector.load %arg7[%c0_10, %c0_11, %c0_12] : memref<18x18x8xf32, #tpu.memory_space<vmem>>, vector<18x18x8xf32>
    tpu.vector_store %arg7[%c0_10, %c0_11, %c0_12], %15 {strides = array<i32>} : memref<18x18x8xf32, #tpu.memory_space<vmem>>, vector<18x18x8xf32>,
    %17 = vector.shape_cast %14 : vector<256x8xf32> to vector<16x16x8xf32>
    %c1 = arith.constant 1 : index
    %c1_13 = arith.constant 1 : index
    %c0_14 = arith.constant 0 : index
    %18 = vector.load %arg7[%c1, %c1_13, %c0_14] : memref<18x18x8xf32, #tpu.memory_space<vmem>>, vector<16x16x8xf32>
    tpu.vector_store %arg7[%c1, %c1_13, %c0_14], %17 {strides = array<i32>} : memref<18x18x8xf32, #tpu.memory_space<vmem>>, vector<16x16x8xf32>,
    %c0_15 = arith.constant 0 : index
    %c0_16 = arith.constant 0 : index
    %c0_17 = arith.constant 0 : index
    %19 = vector.load %arg7[%c0_15, %c0_16, %c0_17] : memref<18x18x8xf32, #tpu.memory_space<vmem>>, vector<18x18x8xf32>
    %c0_18 = arith.constant 0 : index
    %c0_19 = arith.constant 0 : index
    %20 = vector.load %arg5[%c0_18, %c0_19] : memref<1x8xf32, #tpu.memory_space<vmem>>, vector<1x8xf32>
    %21 = vector.shape_cast %20 : vector<1x8xf32> to vector<1x8xf32>
    %22 = vector.broadcast %21 : vector<1x8xf32> to vector<256x8xf32>
    %23 = vector.extract_strided_slice %19 {offsets = [0, 0, 0], sizes = [16, 16, 8], strides = [1, 1, 1]} : vector<18x18x8xf32> to vector<16x16x8xf32>
    %24 = arith.truncf %23 : vector<16x16x8xf32> to vector<16x16x8xbf16>
    %25 = vector.shape_cast %24 : vector<16x16x8xbf16> to vector<256x8xbf16>
    %c0_20 = arith.constant 0 : index
    %c0_21 = arith.constant 0 : index
    %26 = vector.load %arg4[%c0_20, %c0_21] : memref<72x8xbf16, #tpu.memory_space<vmem>>, vector<8x8xbf16>
    %cst_22 = arith.constant dense<0.000000e+00> : vector<256x8xf32>
    %27 = tpu.matmul %25, %26, %cst_22 {dimension_numbers = #tpu.dot_dimension_numbers<[1], [0], [0], [1], [0, 0, 1, 1], [], []>} : vector<256x8xbf16>, vector<8x8xbf16>, vector<256x8xf32> -> vector<256x8xf32>
    %28 = arith.addf %22, %27 : vector<256x8xf32>
    %29 = vector.extract_strided_slice %19 {offsets = [0, 1, 0], sizes = [16, 16, 8], strides = [1, 1, 1]} : vector<18x18x8xf32> to vector<16x16x8xf32>
    %30 = arith.truncf %29 : vector<16x16x8xf32> to vector<16x16x8xbf16>
    %31 = vector.shape_cast %30 : vector<16x16x8xbf16> to vector<256x8xbf16>
    %c8 = arith.constant 8 : index
    %c0_23 = arith.constant 0 : index
    %32 = vector.load %arg4[%c8, %c0_23] : memref<72x8xbf16, #tpu.memory_space<vmem>>, vector<8x8xbf16>
    %cst_24 = arith.constant dense<0.000000e+00> : vector<256x8xf32>
    %33 = tpu.matmul %31, %32, %cst_24 {dimension_numbers = #tpu.dot_dimension_numbers<[1], [0], [0], [1], [0, 0, 1, 1], [], []>} : vector<256x8xbf16>, vector<8x8xbf16>, vector<256x8xf32> -> vector<256x8xf32>
    %34 = arith.addf %28, %33 : vector<256x8xf32>
    %35 = vector.extract_strided_slice %19 {offsets = [0, 2, 0], sizes = [16, 16, 8], strides = [1, 1, 1]} : vector<18x18x8xf32> to vector<16x16x8xf32>
    %36 = arith.truncf %35 : vector<16x16x8xf32> to vector<16x16x8xbf16>
    %37 = vector.shape_cast %36 : vector<16x16x8xbf16> to vector<256x8xbf16>
    %c16 = arith.constant 16 : index
    %c0_25 = arith.constant 0 : index
    %38 = vector.load %arg4[%c16, %c0_25] : memref<72x8xbf16, #tpu.memory_space<vmem>>, vector<8x8xbf16>
    %cst_26 = arith.constant dense<0.000000e+00> : vector<256x8xf32>
    %39 = tpu.matmul %37, %38, %cst_26 {dimension_numbers = #tpu.dot_dimension_numbers<[1], [0], [0], [1], [0, 0, 1, 1], [], []>} : vector<256x8xbf16>, vector<8x8xbf16>, vector<256x8xf32> -> vector<256x8xf32>
    %40 = arith.addf %34, %39 : vector<256x8xf32>
    %41 = vector.extract_strided_slice %19 {offsets = [1, 0, 0], sizes = [16, 16, 8], strides = [1, 1, 1]} : vector<18x18x8xf32> to vector<16x16x8xf32>
    %42 = arith.truncf %41 : vector<16x16x8xf32> to vector<16x16x8xbf16>
    %43 = vector.shape_cast %42 : vector<16x16x8xbf16> to vector<256x8xbf16>
    %c24 = arith.constant 24 : index
    %c0_27 = arith.constant 0 : index
    %44 = vector.load %arg4[%c24, %c0_27] : memref<72x8xbf16, #tpu.memory_space<vmem>>, vector<8x8xbf16>
    %cst_28 = arith.constant dense<0.000000e+00> : vector<256x8xf32>
    %45 = tpu.matmul %43, %44, %cst_28 {dimension_numbers = #tpu.dot_dimension_numbers<[1], [0], [0], [1], [0, 0, 1, 1], [], []>} : vector<256x8xbf16>, vector<8x8xbf16>, vector<256x8xf32> -> vector<256x8xf32>
    %46 = arith.addf %40, %45 : vector<256x8xf32>
    %47 = vector.extract_strided_slice %19 {offsets = [1, 1, 0], sizes = [16, 16, 8], strides = [1, 1, 1]} : vector<18x18x8xf32> to vector<16x16x8xf32>
    %48 = arith.truncf %47 : vector<16x16x8xf32> to vector<16x16x8xbf16>
    %49 = vector.shape_cast %48 : vector<16x16x8xbf16> to vector<256x8xbf16>
    %c32 = arith.constant 32 : index
    %c0_29 = arith.constant 0 : index
    %50 = vector.load %arg4[%c32, %c0_29] : memref<72x8xbf16, #tpu.memory_space<vmem>>, vector<8x8xbf16>
    %cst_30 = arith.constant dense<0.000000e+00> : vector<256x8xf32>
    %51 = tpu.matmul %49, %50, %cst_30 {dimension_numbers = #tpu.dot_dimension_numbers<[1], [0], [0], [1], [0, 0, 1, 1], [], []>} : vector<256x8xbf16>, vector<8x8xbf16>, vector<256x8xf32> -> vector<256x8xf32>
    %52 = arith.addf %46, %51 : vector<256x8xf32>
    %53 = vector.extract_strided_slice %19 {offsets = [1, 2, 0], sizes = [16, 16, 8], strides = [1, 1, 1]} : vector<18x18x8xf32> to vector<16x16x8xf32>
    %54 = arith.truncf %53 : vector<16x16x8xf32> to vector<16x16x8xbf16>
    %55 = vector.shape_cast %54 : vector<16x16x8xbf16> to vector<256x8xbf16>
    %c40 = arith.constant 40 : index
    %c0_31 = arith.constant 0 : index
    %56 = vector.load %arg4[%c40, %c0_31] : memref<72x8xbf16, #tpu.memory_space<vmem>>, vector<8x8xbf16>
    %cst_32 = arith.constant dense<0.000000e+00> : vector<256x8xf32>
    %57 = tpu.matmul %55, %56, %cst_32 {dimension_numbers = #tpu.dot_dimension_numbers<[1], [0], [0], [1], [0, 0, 1, 1], [], []>} : vector<256x8xbf16>, vector<8x8xbf16>, vector<256x8xf32> -> vector<256x8xf32>
    %58 = arith.addf %52, %57 : vector<256x8xf32>
    %59 = vector.extract_strided_slice %19 {offsets = [2, 0, 0], sizes = [16, 16, 8], strides = [1, 1, 1]} : vector<18x18x8xf32> to vector<16x16x8xf32>
    %60 = arith.truncf %59 : vector<16x16x8xf32> to vector<16x16x8xbf16>
    %61 = vector.shape_cast %60 : vector<16x16x8xbf16> to vector<256x8xbf16>
    %c48 = arith.constant 48 : index
    %c0_33 = arith.constant 0 : index
    %62 = vector.load %arg4[%c48, %c0_33] : memref<72x8xbf16, #tpu.memory_space<vmem>>, vector<8x8xbf16>
    %cst_34 = arith.constant dense<0.000000e+00> : vector<256x8xf32>
    %63 = tpu.matmul %61, %62, %cst_34 {dimension_numbers = #tpu.dot_dimension_numbers<[1], [0], [0], [1], [0, 0, 1, 1], [], []>} : vector<256x8xbf16>, vector<8x8xbf16>, vector<256x8xf32> -> vector<256x8xf32>
    %64 = arith.addf %58, %63 : vector<256x8xf32>
    %65 = vector.extract_strided_slice %19 {offsets = [2, 1, 0], sizes = [16, 16, 8], strides = [1, 1, 1]} : vector<18x18x8xf32> to vector<16x16x8xf32>
    %66 = arith.truncf %65 : vector<16x16x8xf32> to vector<16x16x8xbf16>
    %67 = vector.shape_cast %66 : vector<16x16x8xbf16> to vector<256x8xbf16>
    %c56 = arith.constant 56 : index
    %c0_35 = arith.constant 0 : index
    %68 = vector.load %arg4[%c56, %c0_35] : memref<72x8xbf16, #tpu.memory_space<vmem>>, vector<8x8xbf16>
    %cst_36 = arith.constant dense<0.000000e+00> : vector<256x8xf32>
    %69 = tpu.matmul %67, %68, %cst_36 {dimension_numbers = #tpu.dot_dimension_numbers<[1], [0], [0], [1], [0, 0, 1, 1], [], []>} : vector<256x8xbf16>, vector<8x8xbf16>, vector<256x8xf32> -> vector<256x8xf32>
    %70 = arith.addf %64, %69 : vector<256x8xf32>
    %71 = vector.extract_strided_slice %19 {offsets = [2, 2, 0], sizes = [16, 16, 8], strides = [1, 1, 1]} : vector<18x18x8xf32> to vector<16x16x8xf32>
    %72 = arith.truncf %71 : vector<16x16x8xf32> to vector<16x16x8xbf16>
    %73 = vector.shape_cast %72 : vector<16x16x8xbf16> to vector<256x8xbf16>
    %c64 = arith.constant 64 : index
    %c0_37 = arith.constant 0 : index
    %74 = vector.load %arg4[%c64, %c0_37] : memref<72x8xbf16, #tpu.memory_space<vmem>>, vector<8x8xbf16>
    %cst_38 = arith.constant dense<0.000000e+00> : vector<256x8xf32>
    %75 = tpu.matmul %73, %74, %cst_38 {dimension_numbers = #tpu.dot_dimension_numbers<[1], [0], [0], [1], [0, 0, 1, 1], [], []>} : vector<256x8xbf16>, vector<8x8xbf16>, vector<256x8xf32> -> vector<256x8xf32>
    %76 = arith.addf %70, %75 : vector<256x8xf32>
    %cst_39 = arith.constant 0.000000e+00 : f32
    %77 = vector.broadcast %cst_39 : f32 to vector<256x8xf32>
    %78 = arith.subf %77, %76 : vector<256x8xf32>
    %79 = math.exp %78 : vector<256x8xf32>
    %cst_40 = arith.constant 1.000000e+00 : f32
    %80 = vector.broadcast %cst_40 : f32 to vector<256x8xf32>
    %81 = arith.addf %80, %79 : vector<256x8xf32>
    %82 = tpu.reciprocal %81 {approx = true} : vector<256x8xf32> -> vector<256x8xf32>
    %83 = arith.mulf %76, %82 : vector<256x8xf32>
    %84 = arith.extf %2 : vector<256x8xbf16> to vector<256x8xf32>
    %85 = arith.addf %83, %84 : vector<256x8xf32>
    %86 = vector.shape_cast %85 : vector<256x8xf32> to vector<16x16x8xf32>
    %87 = arith.truncf %86 : vector<16x16x8xf32> to vector<16x16x8xbf16>
    %c0_41 = arith.constant 0 : index
    %c0_42 = arith.constant 0 : index
    %c0_43 = arith.constant 0 : index
    %c0_44 = arith.constant 0 : index
    %88 = vector.load %arg6[%c0_41, %c0_42, %c0_43, %c0_44] : memref<1x16x16x8xbf16, #tpu.memory_space<vmem>>, vector<1x16x16x8xbf16>
    %89 = vector.shape_cast %88 : vector<1x16x16x8xbf16> to vector<16x16x8xbf16>
    %90 = vector.shape_cast %87 : vector<16x16x8xbf16> to vector<1x16x16x8xbf16>
    tpu.vector_store %arg6[%c0_41, %c0_42, %c0_43, %c0_44], %90 {strides = array<i32>} : memref<1x16x16x8xbf16, #tpu.memory_space<vmem>>, vector<1x16x16x8xbf16>,
    return
  }
  func.func @transform_0(%arg0: i32) -> (i32, i32, i32, i32) {
    %c0_i32 = arith.constant 0 : i32
    %c0_i32_0 = arith.constant 0 : i32
    %c0_i32_1 = arith.constant 0 : i32
    %c0_i32_2 = arith.constant 0 : i32
    return %arg0, %c0_i32, %c0_i32_0, %c0_i32_1 : i32, i32, i32, i32
  }
  func.func @transform_1(%arg0: i32) -> (i32, i32) {
    %c0_i32 = arith.constant 0 : i32
    %c0_i32_0 = arith.constant 0 : i32
    %c0_i32_1 = arith.constant 0 : i32
    return %c0_i32, %c0_i32_0 : i32, i32
  }
  func.func @transform_2(%arg0: i32) -> (i32, i32) {
    %c0_i32 = arith.constant 0 : i32
    %c0_i32_0 = arith.constant 0 : i32
    %c0_i32_1 = arith.constant 0 : i32
    return %c0_i32, %c0_i32_0 : i32, i32
  }
  func.func @transform_3(%arg0: i32) -> (i32, i32) {
    %c0_i32 = arith.constant 0 : i32
    %c0_i32_0 = arith.constant 0 : i32
    %c0_i32_1 = arith.constant 0 : i32
    return %c0_i32, %c0_i32_0 : i32, i32
  }
  func.func @transform_4(%arg0: i32) -> (i32, i32) {
    %c0_i32 = arith.constant 0 : i32
    %c0_i32_0 = arith.constant 0 : i32
    %c0_i32_1 = arith.constant 0 : i32
    return %c0_i32, %c0_i32_0 : i32, i32
  }
  func.func @transform_5(%arg0: i32) -> (i32, i32, i32, i32) {
    %c0_i32 = arith.constant 0 : i32
    %c0_i32_0 = arith.constant 0 : i32
    %c0_i32_1 = arith.constant 0 : i32
    %c0_i32_2 = arith.constant 0 : i32
    return %arg0, %c0_i32, %c0_i32_0, %c0_i32_1 : i32, i32, i32, i32
  }
}

</mosaic_0001>

<bundles_post_ra>
// kernel: bottleneck_csp_forward.3
= control target key start
LH: loop header
LB: loop body
LE: loop exit
PB: predicated region body
PF: predicated region fallthrough
CT: control target
= control target key end

     0   :  { %s1264_s12 = smov 0   ;;  %s1577_s0 = inlined_call_operand.vmem [shape: bf16[512,16], index: 0, kind: input, shape index: {}]   ;;  %s1578_s1 = inlined_call_operand.vmem [shape: bf16[16,8], index: 1, kind: input, shape index: {}]   ;;  %s1579_s2 = inlined_call_operand.vmem [shape: f32[1,8], index: 2, kind: input, shape index: {}]   ;;  %s1580_s3 = inlined_call_operand.vmem [shape: bf16[512,8], index: 3, kind: output, shape index: {}]  }
   0x1 LB: > { %s921_s13 = sadd.s32 4294967295, %s1242_s12   ;;  %p925_p0 = scmp.ge.s32.totalorder %s1242_s12, 1  ;;  %s1242_s12 = sphi %s1264_s12, %s13_s12  }
   0x2   : > { %p138_p1 = scmp.lt.s32.totalorder %s1242_s12, 3 }
   0x4   : > { %p139_p2 = pnand %p925_p0, %p138_p1 }
   0x5   : > { %s926_s16 = sshll.u32 (!%p139_p2), %s921_s13, 5 }
   0x6   : > { %142 = sbr.rel (%p139_p2) target bundleno = 297 (0x129), region = 32  ;;  %p163_p3 = scmp.lt.s32.totalorder (!%p139_p2), %s926_s16, 63 }
   0xb   : > { %v1091_v0 = vld [vmem:[%s1578_s1] sm:$0xff]   ;;  %s1582_s16 = smov (!%p163_p3, %s926_s16), 63  ;;  %vm302_vm0 = vcmask 130048   ;;  %vm832_vm1 = vcmask 60416  }
   0xc   : > { %1047 = vmatprep.subr.bf16.mxu0 %v1091_v0  ;;  %1081 = vmatprep.subr.bf16.mxu1 %v1091_v0  ;;  %s927_s17 = sshll.u32 %s1582_s16, 2  ;;  %v1320_v17 = vld [vmem:[%s1579_s2] ss:$0 sm:$0xff] }
   0xd   : > { %1048 = vmatpush3.bf16.msra.mxu0 %v1091_v0  ;;  %1082 = vmatpush3.bf16.msra.mxu1 %v1091_v0  ;;  %s1283_s20 = scalar_lea.vmem %s1577_s0, %s927_s17  ;;  %s1450_s25 = scalar_lea.vmem %s1580_s3, %s927_s17 }
   0xe   : > { %v1092_v1 = vld [vmem:[%s1283_s20] sm:$0xff]   ;;  %v1094_v3 = vld [vmem:[%s1283_s20 + $0x8] sm:$0xff]   ;;  %v1096_v5 = vld [vmem:[%s1283_s20 + $0x10] sm:$0xff]  }
   0xf   : > { %v1093_v2 = vld [vmem:[%s1283_s20 + $0x40] sm:$0xff]   ;;  %1049 = vmatprep.mubr.msk.bf16.mxu0 %vm302_vm0, %v1092_v1  ;;  %v1095_v4 = vld [vmem:[%s1283_s20 + $0x48] sm:$0xff]   ;;  %v1097_v6 = vld [vmem:[%s1283_s20 + $0x50] sm:$0xff]  }
  0x10   : > { %1065 = vmatprep.mubr.msk.bf16.mxu1 %vm302_vm0, %v1093_v2  ;;  %1050 = vmatmul.mubr.msk.bf16.vlgmr.msra.gmra.mxu0 %vm302_vm0, %v1094_v3  ;;  %v1098_v7 = vld [vmem:[%s1283_s20 + $0x18] sm:$0xff]   ;;  %v1100_v9 = vld [vmem:[%s1283_s20 + $0x20] sm:$0xff]   ;;  %v1102_v11 = vld [vmem:[%s1283_s20 + $0x28] sm:$0xff]  }
  0x11   : > { %1066 = vmatmul.mubr.msk.bf16.vlgmr.msra.gmra.mxu1 %vm302_vm0, %v1095_v4  ;;  %1053 = vmatprep.mubr.msk.bf16.mxu0 %vm302_vm0, %v1096_v5  ;;  %v1099_v8 = vld [vmem:[%s1283_s20 + $0x58] sm:$0xff]   ;;  %v1101_v10 = vld [vmem:[%s1283_s20 + $0x60] sm:$0xff]   ;;  %v1103_v12 = vld [vmem:[%s1283_s20 + $0x68] sm:$0xff]  }
  0x12   : > { %1069 = vmatprep.mubr.msk.bf16.mxu1 %vm302_vm0, %v1097_v6  ;;  %v1104_v13 = vld [vmem:[%s1283_s20 + $0x30] sm:$0xff]   ;;  %v1106_v15 = vld [vmem:[%s1283_s20 + $0x38] sm:$0xff]  }
  0x13   : > { %v1105_v14 = vld [vmem:[%s1283_s20 + $0x70] sm:$0xff]   ;;  %v1107_v16 = vld [vmem:[%s1283_s20 + $0x78] sm:$0xff]  }
  0x18   : > { %1054 = vmatmul.mubr.msk.bf16.gmra.mxu0 %vm302_vm0, %v1098_v7 }
  0x19   : > { %1070 = vmatmul.mubr.msk.bf16.gmra.mxu1 %vm302_vm0, %v1099_v8  ;;  %1057 = vmatprep.mubr.msk.bf16.mxu0 %vm302_vm0, %v1100_v9 }
  0x1a   : > { %1073 = vmatprep.mubr.msk.bf16.mxu1 %vm302_vm0, %v1101_v10 }
  0x20   : > { %1058 = vmatmul.mubr.msk.bf16.gmra.mxu0 %vm302_vm0, %v1102_v11 }
  0x21   : > { %1074 = vmatmul.mubr.msk.bf16.gmra.mxu1 %vm302_vm0, %v1103_v12  ;;  %1061 = vmatprep.mubr.msk.bf16.mxu0 %vm302_vm0, %v1104_v13 }
  0x22   : > { %1077 = vmatprep.mubr.msk.bf16.mxu1 %vm302_vm0, %v1105_v14 }
  0x28   : > { %1062 = vmatmul.mubr.msk.bf16.gmra.mxu0 %vm302_vm0, %v1106_v15 }
  0x29   : > { %1078 = vmatmul.mubr.msk.bf16.gmra.mxu1 %vm302_vm0, %v1107_v16 }
  0xd0   : > { %v1051_v18 = vpop.f32.mrf.mxu0 }
  0xd1   : > { %v1323_v19 = vadd.f32 %v1051_v18, %v1320_v17  ;;  %v1067_v20 = vpop.f32.mrf.mxu1 }
  0xd2   : > { %v1326_v21 = vadd.f32 %v1067_v20, %v1320_v17  ;;  %v385_v22 = vpop.f32.mrf.mxu0 }
  0xd3   : > { %v514_v23 = vsub.f32 0.0, %v1323_v19  ;;  %v1330_v24 = vadd.f32 %v1320_v17, %v385_v22  ;;  %v449_v25 = vpop.f32.mrf.mxu1 }
  0xd4   : > { %v530_v26 = vsub.f32 0.0, %v1326_v21  ;;  %v1334_v27 = vadd.f32 %v1320_v17, %v449_v25  ;;  %v1052_v28 = vpop.f32.mrf.mxu0 }
  0xd5   : > { %v548_v29 = vmul.f32 1.442695, %v514_v23  ;;  %v512_v30 = vsub.f32 0.0, %v1330_v24  ;;  %v1338_v31 = vadd.f32 %v1052_v28, %v1320_v17  ;;  %v1068_v32 = vpop.f32.mrf.mxu1 }
  0xd6   : > { %v580_v33 = vmul.f32 1.442695, %v530_v26  ;;  %v528_v34 = vsub.f32 0.0, %v1334_v27  ;;  %v1342_v35 = vadd.f32 %v1068_v32, %v1320_v17  ;;  %v388_v36 = vpop.f32.mrf.mxu0 }
  0xd7   : > { %1108 = vpow2.f32 %v548_v29  ;;  %v544_v37 = vmul.f32 1.442695, %v512_v30  ;;  %v515_v38 = vsub.f32 0.0, %v1338_v31  ;;  %v1346_v39 = vadd.f32 %v1320_v17, %v388_v36  ;;  %v452_v40 = vpop.f32.mrf.mxu1 }
  0xd8   : > { %1110 = vpow2.f32 %v580_v33  ;;  %v576_v41 = vmul.f32 1.442695, %v528_v34  ;;  %v531_v42 = vsub.f32 0.0, %v1342_v35  ;;  %v1350_v43 = vadd.f32 %v1320_v17, %v452_v40  ;;  %v1055_v44 = vpop.f32.mrf.mxu0 }
  0xd9   : > { %1112 = vpow2.f32 %v544_v37  ;;  %v550_v45 = vmul.f32 1.442695, %v515_v38  ;;  %v513_v46 = vsub.f32 0.0, %v1346_v39  ;;  %v1354_v47 = vadd.f32 %v1055_v44, %v1320_v17  ;;  %v1071_v48 = vpop.f32.mrf.mxu1 }
  0xda   : > { %1114 = vpow2.f32 %v576_v41  ;;  %v582_v49 = vmul.f32 1.442695, %v531_v42  ;;  %v529_v50 = vsub.f32 0.0, %v1350_v43  ;;  %v1358_v51 = vadd.f32 %v1071_v48, %v1320_v17  ;;  %v401_v52 = vpop.f32.mrf.mxu0 }
  0xdb   : > { %1116 = vpow2.f32 %v550_v45  ;;  %v546_v53 = vmul.f32 1.442695, %v513_v46  ;;  %v518_v54 = vsub.f32 0.0, %v1354_v47  ;;  %v1362_v55 = vadd.f32 %v1320_v17, %v401_v52  ;;  %v465_v56 = vpop.f32.mrf.mxu1 }
  0xdc   : > { %1118 = vpow2.f32 %v582_v49  ;;  %v578_v57 = vmul.f32 1.442695, %v529_v50  ;;  %v534_v58 = vsub.f32 0.0, %v1358_v51  ;;  %v1366_v59 = vadd.f32 %v1320_v17, %v465_v56  ;;  %v1056_v60 = vpop.f32.mrf.mxu0 }
  0xdd   : > { %1120 = vpow2.f32 %v546_v53  ;;  %v556_v61 = vmul.f32 1.442695, %v518_v54  ;;  %v516_v62 = vsub.f32 0.0, %v1362_v55  ;;  %v1370_v63 = vadd.f32 %v1056_v60, %v1320_v17  ;;  %v1072_v0 = vpop.f32.mrf.mxu1 }
  0xde   : > { %1122 = vpow2.f32 %v578_v57  ;;  %v588_v1 = vmul.f32 1.442695, %v534_v58  ;;  %v532_v2 = vsub.f32 0.0, %v1366_v59  ;;  %v1374_v3 = vadd.f32 %v1072_v0, %v1320_v17  ;;  %v404_v4 = vpop.f32.mrf.mxu0 }
  0xdf   : > { %1124 = vpow2.f32 %v556_v61  ;;  %v552_v5 = vmul.f32 1.442695, %v516_v62  ;;  %v519_v6 = vsub.f32 0.0, %v1370_v63  ;;  %v1378_v7 = vadd.f32 %v1320_v17, %v404_v4  ;;  %v468_v8 = vpop.f32.mrf.mxu1 }
  0xe0   : > { %1126 = vpow2.f32 %v588_v1  ;;  %v584_v9 = vmul.f32 1.442695, %v532_v2  ;;  %v535_v10 = vsub.f32 0.0, %v1374_v3  ;;  %v1382_v11 = vadd.f32 %v1320_v17, %v468_v8  ;;  %v1059_v12 = vpop.f32.mrf.mxu0 }
  0xe1   : > { %1128 = vpow2.f32 %v552_v5  ;;  %v558_v13 = vmul.f32 1.442695, %v519_v6  ;;  %v517_v14 = vsub.f32 0.0, %v1378_v7  ;;  %v1386_v15 = vadd.f32 %v1059_v12, %v1320_v17  ;;  %v1075_v16 = vpop.f32.mrf.mxu1 }
  0xe2   : > { %1130 = vpow2.f32 %v584_v9  ;;  %v590_v18 = vmul.f32 1.442695, %v535_v10  ;;  %v533_v20 = vsub.f32 0.0, %v1382_v11  ;;  %v1390_v22 = vadd.f32 %v1075_v16, %v1320_v17  ;;  %v417_v23 = vpop.f32.mrf.mxu0 }
  0xe3   : > { %1132 = vpow2.f32 %v558_v13  ;;  %v554_v25 = vmul.f32 1.442695, %v517_v14  ;;  %v1393_v26 = vadd.f32 %v1320_v17, %v417_v23  ;;  %v481_v28 = vpop.f32.mrf.mxu1  ;;  %v522_v37 = vsub.f32 0.0, %v1386_v15 }
  0xe4   : > { %v1109_v29 = vpop.eup %1108  ;;  %1134 = vpow2.f32 %v590_v18  ;;  %v586_v30 = vmul.f32 1.442695, %v533_v20  ;;  %v1396_v32 = vadd.f32 %v1320_v17, %v481_v28  ;;  %v1060_v33 = vpop.f32.mrf.mxu0  ;;  %v538_v42 = vsub.f32 0.0, %v1390_v22 }
  0xe5   : > { %v1111_v34 = vpop.eup %1110  ;;  %v610_v36 = vadd.f32 1.0, %v1109_v29  ;;  %1136 = vpow2.f32 %v554_v25  ;;  %v1076_v38 = vpop.f32.mrf.mxu1  ;;  %v520_v48 = vsub.f32 0.0, %v1393_v26  ;;  %v1402_v58 = vmul.f32 1.442695, %v522_v37 }
  0xe6   : > { %v1113_v40 = vpop.eup %1112  ;;  %v626_v41 = vadd.f32 1.0, %v1111_v34  ;;  %1138 = vpow2.f32 %v586_v30  ;;  %v420_v44 = vpop.f32.mrf.mxu0  ;;  %v536_v53 = vsub.f32 0.0, %v1396_v32  ;;  %v1405_v60 = vadd.f32 %v1060_v33, %v1320_v17 }
  0xe7   : > { %v1115_v45 = vpop.eup %1114  ;;  %1140 = vrcp.f32 %v610_v36  ;;  %v608_v46 = vadd.f32 1.0, %v1113_v40  ;;  %v484_v49 = vpop.f32.mrf.mxu1  ;;  %v1407_v1 = vmul.f32 1.442695, %v538_v42  ;;  %v1410_v2 = vadd.f32 %v1076_v38, %v1320_v17 }
  0xe8   : > { %v1117_v50 = vpop.eup %1116  ;;  %1142 = vrcp.f32 %v626_v41  ;;  %v624_v52 = vadd.f32 1.0, %v1115_v45  ;;  %v1063_v54 = vpop.f32.mrf.mxu0  ;;  %v1412_v6 = vmul.f32 1.442695, %v520_v48  ;;  %v1415_v8 = vadd.f32 %v1320_v17, %v420_v44 }
  0xe9   : > { %v1119_v56 = vpop.eup %1118  ;;  %1144 = vrcp.f32 %v608_v46  ;;  %v611_v57 = vadd.f32 1.0, %v1117_v50  ;;  %v1079_v61 = vpop.f32.mrf.mxu1  ;;  %v1417_v12 = vmul.f32 1.442695, %v536_v53  ;;  %v1420_v13 = vadd.f32 %v1320_v17, %v484_v49 }
  0xea   : > { %v1121_v62 = vpop.eup %1120  ;;  %1146 = vrcp.f32 %v624_v52  ;;  %v627_v0 = vadd.f32 1.0, %v1119_v56  ;;  %v433_v14 = vpop.f32.mrf.mxu0  ;;  %v523_v20 = vsub.f32 0.0, %v1405_v60  ;;  %v1424_v23 = vadd.f32 %v1063_v54, %v1320_v17 }
  0xeb   : > { %v1123_v4 = vpop.eup %1122  ;;  %1148 = vrcp.f32 %v611_v57  ;;  %v609_v5 = vadd.f32 1.0, %v1121_v62  ;;  %v497_v25 = vpop.f32.mrf.mxu1  ;;  %v539_v30 = vsub.f32 0.0, %v1410_v2  ;;  %v1428_v33 = vadd.f32 %v1079_v61, %v1320_v17 }
  0xec   : > { %v1125_v9 = vpop.eup %1124  ;;  %1150 = vrcp.f32 %v627_v0  ;;  %v625_v10 = vadd.f32 1.0, %v1123_v4  ;;  %v521_v37 = vsub.f32 0.0, %v1415_v8  ;;  %v1432_v38 = vadd.f32 %v1320_v17, %v433_v14  ;;  %v1064_v56 = vpop.f32.mrf.mxu0 }
  0xed   : > { %v1127_v16 = vpop.eup %1126  ;;  %1152 = vrcp.f32 %v609_v5  ;;  %v614_v18 = vadd.f32 1.0, %v1125_v9  ;;  %v537_v42 = vsub.f32 0.0, %v1420_v13  ;;  %v1436_v44 = vadd.f32 %v1320_v17, %v497_v25  ;;  %v1080_v4 = vpop.f32.mrf.mxu1 }
  0xee   : > { %v1129_v28 = vpop.eup %1128  ;;  %1154 = vrcp.f32 %v625_v10  ;;  %v630_v29 = vadd.f32 1.0, %v1127_v16  ;;  %v526_v48 = vsub.f32 0.0, %v1424_v23  ;;  %v542_v49 = vsub.f32 0.0, %v1428_v33 }
  0xef   : > { %v1131_v34 = vpop.eup %1130  ;;  %1156 = vrcp.f32 %v614_v18  ;;  %v612_v36 = vadd.f32 1.0, %v1129_v28  ;;  %v566_v53 = vmul.f32 1.442695, %v523_v20  ;;  %v524_v54 = vsub.f32 0.0, %v1432_v38 }
  0xf0   : > { %v1133_v40 = vpop.eup %1132  ;;  %1158 = vrcp.f32 %v630_v29  ;;  %v628_v41 = vadd.f32 1.0, %v1131_v34  ;;  %v598_v62 = vmul.f32 1.442695, %v539_v30  ;;  %v540_v0 = vsub.f32 0.0, %v1436_v44 }
  0xf1   : > { %v1135_v45 = vpop.eup %1134  ;;  %1160 = vrcp.f32 %v612_v36  ;;  %v615_v46 = vadd.f32 1.0, %v1133_v40  ;;  %v562_v10 = vmul.f32 1.442695, %v521_v37  ;;  %v594_v14 = vmul.f32 1.442695, %v537_v42  ;;  %v500_v42 = vpop.f32.mrf.mxu1 }
  0xf2   : > { %v1137_v50 = vpop.eup %1136  ;;  %1162 = vrcp.f32 %v628_v41  ;;  %v631_v52 = vadd.f32 1.0, %v1135_v45  ;;  %v572_v20 = vmul.f32 1.442695, %v526_v48  ;;  %v1443_v25 = vmul.f32 1.442695, %v542_v49 }
  0xf3   : > { %v1139_v57 = vpop.eup %1138  ;;  %1164 = vrcp.f32 %v615_v46  ;;  %v613_v61 = vadd.f32 1.0, %v1137_v50  ;;  %v1453_v30 = vmul.f32 1.442695, %v524_v54  ;;  %v1456_v34 = vadd.f32 %v1064_v56, %v1320_v17 }
  0xf4   : > { %v1141_v5 = vpop.eup %1140  ;;  %1166 = vrcp.f32 %v631_v52  ;;  %v629_v9 = vadd.f32 1.0, %v1139_v57  ;;  %v1460_v41 = vmul.f32 1.442695, %v540_v0  ;;  %v1465_v48 = vadd.f32 %v1080_v4, %v1320_v17 }
  0xf5   : > { %v1143_v16 = vpop.eup %1142  ;;  %v674_v18 = vmul.f32 %v1141_v5, %v1323_v19  ;;  %1168 = vrcp.f32 %v613_v61  ;;  %v436_v19 = vpop.f32.mrf.mxu0  ;;  %v1479_v54 = vadd.f32 %v1320_v17, %v500_v42  ;;  %v527_v57 = vsub.f32 0.0, %v1456_v34 }
  0xf6   : > { %v1145_v28 = vpop.eup %1144  ;;  %v690_v29 = vmul.f32 %v1143_v16, %v1326_v21  ;;  %1170 = vrcp.f32 %v629_v9 }
  0xf7   : > { %v1147_v36 = vpop.eup %1146  ;;  %v1000_v37 = vpack.c.bf16 %v674_v18, %v674_v18  ;;  %v672_v40 = vmul.f32 %v1145_v28, %v1330_v24  ;;  %1172 = vpow2.f32 %v1402_v58  ;;  %v1472_v58 = vadd.f32 %v1320_v17, %v436_v19 }
  0xf8   : > { %v1149_v45 = vpop.eup %1148  ;;  %v1016_v21 = vpack.c.bf16 %v690_v29, %v690_v29  ;;  %v688_v46 = vmul.f32 %v1147_v36, %v1334_v27  ;;  %1174 = vpow2.f32 %v1407_v1  ;;  %v543_v17 = vsub.f32 0.0, %v1465_v48 }
  0xf9   : > { %v1151_v49 = vpop.eup %1150  ;;  %835 = vst.msk [vmem:[%s1450_s25 + $0x8] sm:$0xf] %vm832_vm1, %v1000_v37  ;;  %v998_v24 = vpack.c.bf16 %v672_v40, %v672_v40  ;;  %v675_v50 = vmul.f32 %v1149_v45, %v1338_v31  ;;  %1176 = vpow2.f32 %v1412_v6 }
  0xfa   : > { %v1153_v52 = vpop.eup %1152  ;;  %851 = vst.msk [vmem:[%s1450_s25 + $0x48] sm:$0xf] %vm832_vm1, %v1016_v21  ;;  %v1014_v27 = vpack.c.bf16 %v688_v46, %v688_v46  ;;  %v691_v1 = vmul.f32 %v1151_v49, %v1342_v35  ;;  %1178 = vpow2.f32 %v1417_v12 }
  0xfb   : > { %v1155_v56 = vpop.eup %1154  ;;  %833 = vst.msk [vmem:[%s1450_s25] sm:$0xf] %vm832_vm1, %v998_v24  ;;  %v1001_v31 = vpack.c.bf16 %v675_v50, %v675_v50  ;;  %v673_v6 = vmul.f32 %v1153_v52, %v1346_v39  ;;  %1180 = vpow2.f32 %v566_v53  ;;  %v525_v53 = vsub.f32 0.0, %v1472_v58 }
  0xfc   : > { %v1157_v61 = vpop.eup %1156  ;;  %849 = vst.msk [vmem:[%s1450_s25 + $0x40] sm:$0xf] %vm832_vm1, %v1014_v27  ;;  %v1017_v35 = vpack.c.bf16 %v691_v1, %v691_v1  ;;  %v689_v0 = vmul.f32 %v1155_v56, %v1350_v43  ;;  %1182 = vpow2.f32 %v598_v62  ;;  %v541_v62 = vsub.f32 0.0, %v1479_v54 }
  0xfd   : > { %v1159_v12 = vpop.eup %1158  ;;  %836 = vst.msk [vmem:[%s1450_s25 + $0xc] sm:$0xf] %vm832_vm1, %v1001_v31  ;;  %v999_v4 = vpack.c.bf16 %v673_v6, %v673_v6  ;;  %v678_v39 = vmul.f32 %v1157_v61, %v1354_v47  ;;  %1184 = vpow2.f32 %v562_v10  ;;  %v574_v10 = vmul.f32 1.442695, %v527_v57 }
  0xfe   : > { %v1161_v5 = vpop.eup %1160  ;;  %852 = vst.msk [vmem:[%s1450_s25 + $0x4c] sm:$0xf] %vm832_vm1, %v1017_v35  ;;  %v1015_v9 = vpack.c.bf16 %v689_v0, %v689_v0  ;;  %v694_v43 = vmul.f32 %v1159_v12, %v1358_v51  ;;  %1186 = vpow2.f32 %v594_v14  ;;  %v606_v51 = vmul.f32 1.442695, %v543_v17 }
  0xff   : > { %v1163_v16 = vpop.eup %1162  ;;  %834 = vst.msk [vmem:[%s1450_s25 + $0x4] sm:$0xf] %vm832_vm1, %v999_v4  ;;  %v1004_v18 = vpack.c.bf16 %v678_v39, %v678_v39  ;;  %v676_v47 = vmul.f32 %v1161_v5, %v1362_v55  ;;  %1188 = vpow2.f32 %v572_v20  ;;  %v570_v20 = vmul.f32 1.442695, %v525_v53 }
 0x100   : > { %v1165_v28 = vpop.eup %1164  ;;  %850 = vst.msk [vmem:[%s1450_s25 + $0x44] sm:$0xf] %vm832_vm1, %v1015_v9  ;;  %v1020_v29 = vpack.c.bf16 %v694_v43, %v694_v43  ;;  %v692_v19 = vmul.f32 %v1163_v16, %v1366_v59  ;;  %1190 = vpow2.f32 %v1443_v25  ;;  %v602_v25 = vmul.f32 1.442695, %v541_v62 }
 0x101   : > { %v1167_v14 = vpop.eup %1166  ;;  %839 = vst.msk [vmem:[%s1450_s25 + $0x18] sm:$0xf] %vm832_vm1, %v1004_v18  ;;  %v1002_v36 = vpack.c.bf16 %v676_v47, %v676_v47  ;;  %v679_v55 = vmul.f32 %v1165_v28, %v1370_v63  ;;  %1192 = vpow2.f32 %v1453_v30 }
 0x102   : > { %v1169_v37 = vpop.eup %1168  ;;  %855 = vst.msk [vmem:[%s1450_s25 + $0x58] sm:$0xf] %vm832_vm1, %v1020_v29  ;;  %v1018_v40 = vpack.c.bf16 %v692_v19, %v692_v19  ;;  %v695_v59 = vmul.f32 %v1167_v14, %v1374_v3  ;;  %1194 = vpow2.f32 %v1460_v41 }
 0x103   : > { %v1171_v42 = vpop.eup %1170  ;;  %837 = vst.msk [vmem:[%s1450_s25 + $0x10] sm:$0xf] %vm832_vm1, %v1002_v36  ;;  %v1005_v45 = vpack.c.bf16 %v679_v55, %v679_v55  ;;  %v677_v63 = vmul.f32 %v1169_v37, %v1378_v7  ;;  %1196 = vpow2.f32 %v574_v10 }
 0x104   : > { %v1173_v30 = vpop.eup %1172  ;;  %853 = vst.msk [vmem:[%s1450_s25 + $0x50] sm:$0xf] %vm832_vm1, %v1018_v40  ;;  %v1021_v21 = vpack.c.bf16 %v695_v59, %v695_v59  ;;  %v693_v46 = vmul.f32 %v1171_v42, %v1382_v11  ;;  %1198 = vpow2.f32 %v606_v51 }
 0x105   : > { %v1175_v3 = vpop.eup %1174  ;;  %840 = vst.msk [vmem:[%s1450_s25 + $0x1c] sm:$0xf] %vm832_vm1, %v1005_v45  ;;  %v1003_v41 = vpack.c.bf16 %v677_v63, %v677_v63  ;;  %v618_v49 = vadd.f32 1.0, %v1173_v30  ;;  %1200 = vpow2.f32 %v570_v20 }
 0x106   : > { %v1177_v24 = vpop.eup %1176  ;;  %856 = vst.msk [vmem:[%s1450_s25 + $0x5c] sm:$0xf] %vm832_vm1, %v1021_v21  ;;  %v1019_v7 = vpack.c.bf16 %v693_v46, %v693_v46  ;;  %v634_v50 = vadd.f32 1.0, %v1175_v3  ;;  %1202 = vpow2.f32 %v602_v25 }
 0x107   : > { %v1179_v52 = vpop.eup %1178  ;;  %838 = vst.msk [vmem:[%s1450_s25 + $0x14] sm:$0xf] %vm832_vm1, %v1003_v41  ;;  %1204 = vrcp.f32 %v618_v49  ;;  %v616_v27 = vadd.f32 1.0, %v1177_v24 }
 0x108   : > { %v1181_v11 = vpop.eup %1180  ;;  %854 = vst.msk [vmem:[%s1450_s25 + $0x54] sm:$0xf] %vm832_vm1, %v1019_v7  ;;  %1206 = vrcp.f32 %v634_v50  ;;  %v632_v1 = vadd.f32 1.0, %v1179_v52 }
 0x109   : > { %v1183_v56 = vpop.eup %1182  ;;  %1208 = vrcp.f32 %v616_v27  ;;  %v619_v31 = vadd.f32 1.0, %v1181_v11 }
 0x10a   : > { %v1185_v6 = vpop.eup %1184  ;;  %1210 = vrcp.f32 %v632_v1  ;;  %v635_v57 = vadd.f32 1.0, %v1183_v56 }
 0x10b   : > { %v1187_v61 = vpop.eup %1186  ;;  %1212 = vrcp.f32 %v619_v31  ;;  %v617_v35 = vadd.f32 1.0, %v1185_v6 }
 0x10c   : > { %v1189_v0 = vpop.eup %1188  ;;  %1214 = vrcp.f32 %v635_v57  ;;  %v633_v17 = vadd.f32 1.0, %v1187_v61 }
 0x10d   : > { %v1191_v12 = vpop.eup %1190  ;;  %1216 = vrcp.f32 %v617_v35  ;;  %v622_v4 = vadd.f32 1.0, %v1189_v0 }
 0x10e   : > { %v1193_v39 = vpop.eup %1192  ;;  %1218 = vrcp.f32 %v633_v17  ;;  %v638_v53 = vadd.f32 1.0, %v1191_v12 }
 0x10f   : > { %v1195_v5 = vpop.eup %1194  ;;  %1220 = vrcp.f32 %v622_v4  ;;  %v620_v9 = vadd.f32 1.0, %v1193_v39 }
 0x110   : > { %v1197_v43 = vpop.eup %1196  ;;  %1222 = vrcp.f32 %v638_v53  ;;  %v636_v62 = vadd.f32 1.0, %v1195_v5 }
 0x111   : > { %v1199_v16 = vpop.eup %1198  ;;  %1224 = vrcp.f32 %v620_v9  ;;  %v623_v18 = vadd.f32 1.0, %v1197_v43 }
 0x112   : > { %v1201_v47 = vpop.eup %1200  ;;  %1226 = vrcp.f32 %v636_v62  ;;  %v639_v10 = vadd.f32 1.0, %v1199_v16 }
 0x113   : > { %v1203_v28 = vpop.eup %1202  ;;  %1228 = vrcp.f32 %v623_v18  ;;  %v621_v29 = vadd.f32 1.0, %v1201_v47 }
 0x114   : > { %v1205_v19 = vpop.eup %1204  ;;  %1230 = vrcp.f32 %v639_v10  ;;  %v637_v51 = vadd.f32 1.0, %v1203_v28 }
 0x115   : > { %v1207_v14 = vpop.eup %1206  ;;  %v682_v36 = vmul.f32 %v1205_v19, %v1386_v15  ;;  %1232 = vrcp.f32 %v621_v29 }
 0x116   : > { %v1209_v55 = vpop.eup %1208  ;;  %v698_v20 = vmul.f32 %v1207_v14, %v1390_v22  ;;  %1234 = vrcp.f32 %v637_v51 }
 0x117   : > { %v1211_v37 = vpop.eup %1210  ;;  %v1008_v40 = vpack.c.bf16 %v682_v36, %v682_v36  ;;  %v680_v59 = vmul.f32 %v1209_v55, %v1393_v26 }
 0x118   : > { %v1213_v25 = vpop.eup %1212  ;;  %v1024_v42 = vpack.c.bf16 %v698_v20, %v698_v20  ;;  %v696_v45 = vmul.f32 %v1211_v37, %v1396_v32 }
 0x119   : > { %v1215_v63 = vpop.eup %1214  ;;  %843 = vst.msk [vmem:[%s1450_s25 + $0x28] sm:$0xf] %vm832_vm1, %v1008_v40  ;;  %v1006_v15 = vpack.c.bf16 %v680_v59, %v680_v59  ;;  %v683_v30 = vmul.f32 %v1213_v25, %v1405_v60 }
 0x11a   : > { %v1217_v21 = vpop.eup %1216  ;;  %859 = vst.msk [vmem:[%s1450_s25 + $0x68] sm:$0xf] %vm832_vm1, %v1024_v42  ;;  %v1022_v22 = vpack.c.bf16 %v696_v45, %v696_v45  ;;  %v699_v46 = vmul.f32 %v1215_v63, %v1410_v2 }
 0x11b   : > { %v1219_v26 = vpop.eup %1218  ;;  %841 = vst.msk [vmem:[%s1450_s25 + $0x20] sm:$0xf] %vm832_vm1, %v1006_v15  ;;  %v1009_v3 = vpack.c.bf16 %v683_v30, %v683_v30  ;;  %v681_v32 = vmul.f32 %v1217_v21, %v1415_v8 }
 0x11c   : > { %v1221_v41 = vpop.eup %1220  ;;  %857 = vst.msk [vmem:[%s1450_s25 + $0x60] sm:$0xf] %vm832_vm1, %v1022_v22  ;;  %v1025_v49 = vpack.c.bf16 %v699_v46, %v699_v46  ;;  %v697_v60 = vmul.f32 %v1219_v26, %v1420_v13 }
 0x11d   : > { %v1223_v24 = vpop.eup %1222  ;;  %844 = vst.msk [vmem:[%s1450_s25 + $0x2c] sm:$0xf] %vm832_vm1, %v1009_v3  ;;  %v1007_v7 = vpack.c.bf16 %v681_v32, %v681_v32  ;;  %v686_v2 = vmul.f32 %v1221_v41, %v1424_v23 }
 0x11e   : > { %v1225_v50 = vpop.eup %1224  ;;  %860 = vst.msk [vmem:[%s1450_s25 + $0x6c] sm:$0xf] %vm832_vm1, %v1025_v49  ;;  %v1023_v52 = vpack.c.bf16 %v697_v60, %v697_v60  ;;  %v702_v8 = vmul.f32 %v1223_v24, %v1428_v33 }
 0x11f   : > { %v1227_v27 = vpop.eup %1226  ;;  %842 = vst.msk [vmem:[%s1450_s25 + $0x24] sm:$0xf] %vm832_vm1, %v1007_v7  ;;  %v1012_v11 = vpack.c.bf16 %v686_v2, %v686_v2  ;;  %v684_v13 = vmul.f32 %v1225_v50, %v1432_v38 }
 0x120   : > { %v1229_v1 = vpop.eup %1228  ;;  %858 = vst.msk [vmem:[%s1450_s25 + $0x64] sm:$0xf] %vm832_vm1, %v1023_v52  ;;  %v1028_v56 = vpack.c.bf16 %v702_v8, %v702_v8  ;;  %v700_v23 = vmul.f32 %v1227_v27, %v1436_v44 }
 0x121   : > { %v1231_v31 = vpop.eup %1230  ;;  %847 = vst.msk [vmem:[%s1450_s25 + $0x38] sm:$0xf] %vm832_vm1, %v1012_v11  ;;  %v1010_v33 = vpack.c.bf16 %v684_v13, %v684_v13  ;;  %v687_v6 = vmul.f32 %v1229_v1, %v1456_v34 }
 0x122   : > { %v1233_v57 = vpop.eup %1232  ;;  %863 = vst.msk [vmem:[%s1450_s25 + $0x78] sm:$0xf] %vm832_vm1, %v1028_v56  ;;  %v1026_v38 = vpack.c.bf16 %v700_v23, %v700_v23  ;;  %v703_v61 = vmul.f32 %v1231_v31, %v1465_v48 }
 0x123   : > { %v1235_v35 = vpop.eup %1234  ;;  %845 = vst.msk [vmem:[%s1450_s25 + $0x30] sm:$0xf] %vm832_vm1, %v1010_v33  ;;  %v1013_v44 = vpack.c.bf16 %v687_v6, %v687_v6  ;;  %v685_v0 = vmul.f32 %v1233_v57, %v1472_v58 }
 0x124   : > { %861 = vst.msk [vmem:[%s1450_s25 + $0x70] sm:$0xf] %vm832_vm1, %v1026_v38  ;;  %v1029_v17 = vpack.c.bf16 %v703_v61, %v703_v61  ;;  %v701_v12 = vmul.f32 %v1235_v35, %v1479_v54 }
 0x125   : > { %848 = vst.msk [vmem:[%s1450_s25 + $0x3c] sm:$0xf] %vm832_vm1, %v1013_v44  ;;  %v1011_v34 = vpack.c.bf16 %v685_v0, %v685_v0 }
 0x126   : > { %864 = vst.msk [vmem:[%s1450_s25 + $0x7c] sm:$0xf] %vm832_vm1, %v1029_v17  ;;  %v1027_v4 = vpack.c.bf16 %v701_v12, %v701_v12 }
 0x127   : > { %846 = vst.msk [vmem:[%s1450_s25 + $0x34] sm:$0xf] %vm832_vm1, %v1011_v34 }
 0x128   : > { %862 = vst.msk [vmem:[%s1450_s25 + $0x74] sm:$0xf] %vm832_vm1, %v1027_v4 }
 0x129 PF: > { %s13_s12 = sadd.s32 1, %s1242_s12  }
 0x12a   : > { %p10_p4 = scmp.ge.s32.totalorder %s13_s12, 4  }
 0x12c   :  { %12 = sbr.rel (!%p10_p4) target bundleno = 1 (0x1), region = 62 }

// kernel: bottleneck_csp_forward.5
= control target key start
LH: loop header
LB: loop body
LE: loop exit
PB: predicated region body
PF: predicated region fallthrough
CT: control target
= control target key end

     0   :  { %s2558_s30 = smov 0   ;;  %s3034_s0 = inlined_call_operand.vmem [shape: bf16[512,16], index: 0, kind: input, shape index: {}]   ;;  %s3035_s1 = inlined_call_operand.vmem [shape: bf16[512,8], index: 1, kind: input, shape index: {}]   ;;  %s3036_s2 = inlined_call_operand.vmem [shape: bf16[8,8], index: 2, kind: input, shape index: {}]   ;;  %s3037_s3 = inlined_call_operand.vmem [shape: f32[1,8], index: 3, kind: input, shape index: {}]   ;;  %s3038_s4 = inlined_call_operand.vmem [shape: bf16[16,8], index: 4, kind: input, shape index: {}]   ;;  %s3039_s5 = inlined_call_operand.vmem [shape: f32[1,8], index: 5, kind: input, shape index: {}]   ;;  %s3040_s6 = inlined_call_operand.vmem [shape: bf16[8,16], index: 6, kind: input, shape index: {}]   ;;  %s3041_s7 = inlined_call_operand.vmem [shape: bf16[8,16], index: 7, kind: input, shape index: {}]   ;;  %s3042_s8 = inlined_call_operand.vmem [shape: f32[1,16], index: 8, kind: input, shape index: {}]   ;;  %s3043_s9 = inlined_call_operand.vmem [shape: f32[512,16], index: 9, kind: output, shape index: {}]  }
   0x1 LB: > { %s2011_s10 = sadd.s32 4294967295, %s2506_s30   ;;  %p2015_p0 = scmp.ge.s32.totalorder %s2506_s30, 1  ;;  %s2506_s30 = sphi %s2558_s30, %s19_s30  }
   0x2   : > { %p299_p1 = scmp.lt.s32.totalorder %s2506_s30, 3 }
   0x4   : > { %p300_p2 = pnand %p2015_p0, %p299_p1 }
   0x5   : > { %s2016_s15 = sshll.u32 (!%p300_p2), %s2011_s10, 5 }
   0x6   : > { %303 = sbr.rel (%p300_p2) target bundleno = 531 (0x213), region = 56  ;;  %p341_p3 = scmp.lt.s32.totalorder (!%p300_p2), %s2016_s15, 63 }
   0xb   : > { %v391_v0 = vld [vmem:[%s3036_s2] sm:$0xf]  ;;  %vm528_vm0 = vcmask 1043456   ;;  %s3045_s15 = smov (!%p341_p3, %s2016_s15), 63  ;;  %vm479_vm1 = vcmask 64512   ;;  %vm916_vm2 = vcmask 130048  }
   0xc   : > { %v2339_v1 = vld [vmem:[%s3038_s4] sm:$0xff]   ;;  %2328 = vmatprep.subr.msk.bf16.mxu0 %vm528_vm0, %v391_v0  ;;  %v530_v2 = vsel %vm528_vm0, %v391_v0, 0  ;;  %s2017_s20 = sshll.u32 %s3045_s15, 2  ;;  %s2021_s13 = sshll.u32 %s3045_s15, 3 }
   0xd   : > { %2226 = vmatprep.subr.bf16.mxu1 %v2339_v1  ;;  %2193 = vmatpush3.bf16.msra.mxu0 %v530_v2  ;;  %v1255_v3 = vld [vmem:[%s3041_s7] sm:$0xf]  ;;  %s2588_s23 = scalar_lea.vmem %s3035_s1, %s2017_s20  ;;  %s2594_s26 = scalar_lea.vmem %s3034_s0, %s2017_s20 }
   0xe   : > { %v1238_v4 = vld [vmem:[%s3040_s6] sm:$0xf]  ;;  %2227 = vmatpush3.bf16.msra.mxu1 %v2339_v1  ;;  %2329 = vmatprep.subr.msk.bf16.mxu0 %vm528_vm0, %v1255_v3  ;;  %v2342_v7 = vld [vmem:[%s2588_s23 + $0x8] sm:$0xff]   ;;  %v1305_v8 = vsel %vm528_vm0, %v1255_v3, 0  ;;  %v2344_v11 = vld [vmem:[%s2588_s23 + $0x10] sm:$0xff]   ;;  %s2864_s16 = scalar_lea.vmem %s3043_s9, %s2021_s13 }
   0xf   : > { %2330 = vmatprep.subr.msk.bf16.mxu1 %vm528_vm0, %v1238_v4  ;;  %v2340_v5 = vld [vmem:[%s2588_s23] sm:$0xff]   ;;  %v2343_v9 = vld [vmem:[%s2594_s26 + $0x8] sm:$0xff]   ;;  %v1517_v10 = vsel %vm528_vm0, %v1238_v4, 0  ;;  %v2345_v12 = vld [vmem:[%s2594_s26 + $0x10] sm:$0xff]  }
  0x10   : > { %v2341_v6 = vld [vmem:[%s2594_s26] sm:$0xff]   ;;  %2194 = vmatprep.mubr.msk.bf16.mxu0 %vm479_vm1, %v2340_v5  ;;  %v2346_v13 = vld [vmem:[%s2588_s23 + $0x18] sm:$0xff]   ;;  %v2350_v17 = vld [vmem:[%s2588_s23 + $0x28] sm:$0xff]  }
  0x11   : > { %2228 = vmatprep.mubr.msk.bf16.mxu1 %vm916_vm2, %v2341_v6  ;;  %2195 = vmatmul.mubr.msk.bf16.vlgmr.msra.gmra.mxu0 %vm479_vm1, %v2342_v7  ;;  %v2347_v14 = vld [vmem:[%s2594_s26 + $0x18] sm:$0xff]   ;;  %v2348_v15 = vld [vmem:[%s2588_s23 + $0x20] sm:$0xff]   ;;  %v2351_v18 = vld [vmem:[%s2594_s26 + $0x28] sm:$0xff]  }
  0x12   : > { %2229 = vmatmul.mubr.msk.bf16.vlgmr.msra.gmra.mxu1 %vm916_vm2, %v2343_v9  ;;  %2261 = vmatpush3.bf16.msra.mxu0 %v1305_v8  ;;  %v2349_v16 = vld [vmem:[%s2594_s26 + $0x20] sm:$0xff]   ;;  %v2352_v19 = vld [vmem:[%s2588_s23 + $0x30] sm:$0xff]   ;;  %v2354_v21 = vld [vmem:[%s2588_s23 + $0x38] sm:$0xff]  }
  0x13   : > { %2198 = vmatprep.mubr.msk.bf16.mxu0 %vm479_vm1, %v2344_v11  ;;  %2295 = vmatpush3.bf16.msra.mxu1 %v1517_v10  ;;  %v2353_v20 = vld [vmem:[%s2594_s26 + $0x30] sm:$0xff]   ;;  %v2355_v22 = vld [vmem:[%s2594_s26 + $0x38] sm:$0xff]   ;;  %v2356_v23 = vld [vmem:[%s2588_s23 + $0x40] sm:$0xff]  }
  0x14   : > { %2232 = vmatprep.mubr.msk.bf16.mxu1 %vm916_vm2, %v2345_v12  ;;  %v2357_v24 = vld [vmem:[%s2594_s26 + $0x40] sm:$0xff]   ;;  %v2358_v25 = vld [vmem:[%s2588_s23 + $0x48] sm:$0xff]   ;;  %v2360_v27 = vld [vmem:[%s2588_s23 + $0x50] sm:$0xff]  }
  0x15   : > { %v2359_v26 = vld [vmem:[%s2594_s26 + $0x48] sm:$0xff]   ;;  %v2361_v28 = vld [vmem:[%s2594_s26 + $0x50] sm:$0xff]   ;;  %v2362_v29 = vld [vmem:[%s2588_s23 + $0x58] sm:$0xff]  }
  0x16   : > { %v2363_v30 = vld [vmem:[%s2594_s26 + $0x58] sm:$0xff]   ;;  %v2364_v31 = vld [vmem:[%s2588_s23 + $0x60] sm:$0xff]   ;;  %v2366_v33 = vld [vmem:[%s2588_s23 + $0x68] sm:$0xff]  }
  0x17   : > { %v2365_v32 = vld [vmem:[%s2594_s26 + $0x60] sm:$0xff]   ;;  %v2367_v34 = vld [vmem:[%s2594_s26 + $0x68] sm:$0xff]   ;;  %v2368_v35 = vld [vmem:[%s2588_s23 + $0x70] sm:$0xff]  }
  0x18   : > { %v2369_v36 = vld [vmem:[%s2594_s26 + $0x70] sm:$0xff]   ;;  %v2370_v37 = vld [vmem:[%s2588_s23 + $0x78] sm:$0xff]   ;;  %v2664_v39 = vld [vmem:[%s3037_s3] ss:$0 sm:$0xff] }
  0x19   : > { %2199 = vmatmul.mubr.msk.bf16.gmra.mxu0 %vm479_vm1, %v2346_v13  ;;  %v2371_v38 = vld [vmem:[%s2594_s26 + $0x78] sm:$0xff]   ;;  %v2669_v40 = vld [vmem:[%s3039_s5] ss:$0 sm:$0xff] }
  0x1a   : > { %2233 = vmatmul.mubr.msk.bf16.gmra.mxu1 %vm916_vm2, %v2347_v14  ;;  %2202 = vmatprep.mubr.msk.bf16.mxu0 %vm479_vm1, %v2348_v15 }
  0x1b   : > { %2236 = vmatprep.mubr.msk.bf16.mxu1 %vm916_vm2, %v2349_v16 }
  0x21   : > { %2203 = vmatmul.mubr.msk.bf16.gmra.mxu0 %vm479_vm1, %v2350_v17 }
  0x22   : > { %2237 = vmatmul.mubr.msk.bf16.gmra.mxu1 %vm916_vm2, %v2351_v18  ;;  %2206 = vmatprep.mubr.msk.bf16.mxu0 %vm479_vm1, %v2352_v19 }
  0x23   : > { %2240 = vmatprep.mubr.msk.bf16.mxu1 %vm916_vm2, %v2353_v20 }
  0x29   : > { %2207 = vmatmul.mubr.msk.bf16.gmra.mxu0 %vm479_vm1, %v2354_v21 }
  0x2a   : > { %2241 = vmatmul.mubr.msk.bf16.gmra.mxu1 %vm916_vm2, %v2355_v22  ;;  %2210 = vmatprep.mubr.msk.bf16.mxu0 %vm479_vm1, %v2356_v23 }
  0x2b   : > { %2244 = vmatprep.mubr.msk.bf16.mxu1 %vm916_vm2, %v2357_v24 }
  0x31   : > { %2211 = vmatmul.mubr.msk.bf16.gmra.mxu0 %vm479_vm1, %v2358_v25 }
  0x32   : > { %2245 = vmatmul.mubr.msk.bf16.gmra.mxu1 %vm916_vm2, %v2359_v26  ;;  %2214 = vmatprep.mubr.msk.bf16.mxu0 %vm479_vm1, %v2360_v27 }
  0x33   : > { %2248 = vmatprep.mubr.msk.bf16.mxu1 %vm916_vm2, %v2361_v28 }
  0x39   : > { %2215 = vmatmul.mubr.msk.bf16.gmra.mxu0 %vm479_vm1, %v2362_v29 }
  0x3a   : > { %2249 = vmatmul.mubr.msk.bf16.gmra.mxu1 %vm916_vm2, %v2363_v30  ;;  %2218 = vmatprep.mubr.msk.bf16.mxu0 %vm479_vm1, %v2364_v31 }
  0x3b   : > { %2252 = vmatprep.mubr.msk.bf16.mxu1 %vm916_vm2, %v2365_v32 }
  0x41   : > { %2219 = vmatmul.mubr.msk.bf16.gmra.mxu0 %vm479_vm1, %v2366_v33 }
  0x42   : > { %2253 = vmatmul.mubr.msk.bf16.gmra.mxu1 %vm916_vm2, %v2367_v34  ;;  %2222 = vmatprep.mubr.msk.bf16.mxu0 %vm479_vm1, %v2368_v35 }
  0x43   : > { %2256 = vmatprep.mubr.msk.bf16.mxu1 %vm916_vm2, %v2369_v36 }
  0x49   : > { %2223 = vmatmul.mubr.msk.bf16.gmra.mxu0 %vm479_vm1, %v2370_v37 }
  0x4a   : > { %2257 = vmatmul.mubr.msk.bf16.gmra.mxu1 %vm916_vm2, %v2371_v38 }
  0xd1   : > { %v2196_v41 = vpop.f32.mrf.mxu0 }
  0xd2   : > { %v575_v42 = vadd.f32 %v2196_v41, %v2664_v39  ;;  %v2230_v43 = vpop.f32.mrf.mxu1 }
  0xd3   : > { %v1008_v44 = vadd.f32 %v2230_v43, %v2669_v40  ;;  %v566_v45 = vpop.f32.mrf.mxu0 }
  0xd4   : > { %v567_v46 = vadd.f32 %v2664_v39, %v566_v45  ;;  %v999_v47 = vpop.f32.mrf.mxu1  ;;  %vm695_vm3 = vcmp.gt.f32.partialorder %v575_v42, 0.0  ;;  %v727_v50 = vmul.f32 0.1, %v575_v42 }
  0xd5   : > { %v1000_v48 = vadd.f32 %v2669_v40, %v999_v47  ;;  %v2197_v49 = vpop.f32.mrf.mxu0  ;;  %v1160_v51 = vmul.f32 0.1, %v1008_v44  ;;  %vm1128_vm4 = vcmp.gt.f32.partialorder %v1008_v44, 0.0 }
  0xd6   : > { %v578_v52 = vadd.f32 %v2197_v49, %v2664_v39  ;;  %v2231_v53 = vpop.f32.mrf.mxu1  ;;  %vm693_vm5 = vcmp.gt.f32.partialorder %v567_v46, 0.0  ;;  %v725_v54 = vmul.f32 0.1, %v567_v46  ;;  %v759_v0 = vsel %vm695_vm3, %v575_v42, %v727_v50 }
  0xd7   : > { %v1011_v55 = vadd.f32 %v2231_v53, %v2669_v40  ;;  %v569_v56 = vpop.f32.mrf.mxu0  ;;  %v1158_v57 = vmul.f32 0.1, %v1000_v48  ;;  %vm1126_vm7 = vcmp.gt.f32.partialorder %v1000_v48, 0.0  ;;  %v1192_v1 = vsel %vm1128_vm4, %v1008_v44, %v1160_v51 }
  0xd8   : > { %vm696_vm6 = vcmp.gt.f32.partialorder %v578_v52, 0.0  ;;  %v728_v58 = vmul.f32 0.1, %v578_v52  ;;  %v570_v59 = vadd.f32 %v2664_v39, %v569_v56  ;;  %v1002_v60 = vpop.f32.mrf.mxu1  ;;  %v757_v8 = vsel %vm693_vm5, %v567_v46, %v725_v54 }
  0xd9   : > { %vm1129_vm8 = vcmp.gt.f32.partialorder %v1011_v55, 0.0  ;;  %v1161_v61 = vmul.f32 0.1, %v1011_v55  ;;  %v1003_v62 = vadd.f32 %v2669_v40, %v1002_v60  ;;  %v2200_v63 = vpop.f32.mrf.mxu0  ;;  %v1190_v9 = vsel %vm1126_vm7, %v1000_v48, %v1158_v57 }
  0xda   : > { %vm694_vm9 = vcmp.gt.f32.partialorder %v570_v59, 0.0  ;;  %v726_v2 = vmul.f32 0.1, %v570_v59  ;;  %v2234_v3 = vpop.f32.mrf.mxu1  ;;  %v760_v4 = vsel %vm696_vm6, %v578_v52, %v728_v58  ;;  %v591_v6 = vadd.f32 %v2200_v63, %v2664_v39 }
  0xdb   : > { %vm1127_vm10 = vcmp.gt.f32.partialorder %v1003_v62, 0.0  ;;  %v1159_v5 = vmul.f32 0.1, %v1003_v62  ;;  %v582_v7 = vpop.f32.mrf.mxu0  ;;  %v1193_v10 = vsel %vm1129_vm8, %v1011_v55, %v1161_v61  ;;  %v1024_v15 = vadd.f32 %v2234_v3, %v2669_v40 }
  0xdc   : > { %v758_v11 = vsel %vm694_vm9, %v570_v59, %v726_v2  ;;  %v1015_v12 = vpop.f32.mrf.mxu1  ;;  %v583_v16 = vadd.f32 %v2664_v39, %v582_v7  ;;  %v1223_v18 = vpack.c.bf16 %v760_v4, %v759_v0  ;;  %v1240_v23 = vpack.c.bf16 %v1193_v10, %v1192_v1 }
  0xdd   : > { %v1222_v13 = vpack.c.bf16 %v758_v11, %v757_v8  ;;  %v1191_v14 = vsel %vm1127_vm10, %v1003_v62, %v1159_v5  ;;  %v2201_v17 = vpop.f32.mrf.mxu0  ;;  %v1016_v20 = vadd.f32 %v2669_v40, %v1015_v12  ;;  %v731_v24 = vmul.f32 0.1, %v591_v6 }
  0xde   : > { %v1239_v19 = vpack.c.bf16 %v1191_v14, %v1190_v9  ;;  %v594_v21 = vadd.f32 %v2201_v17, %v2664_v39  ;;  %v2235_v22 = vpop.f32.mrf.mxu1  ;;  %vm697_vm11 = vcmp.gt.f32.partialorder %v583_v16, 0.0  ;;  %v729_v25 = vmul.f32 0.1, %v583_v16 }
  0xdf   : > { %v585_v26 = vpop.f32.mrf.mxu0  ;;  %2296 = vmatprep.mubr.msk.bf16.mxu1 %vm479_vm1, %v1222_v13  ;;  %vm699_vm12 = vcmp.gt.f32.partialorder %v591_v6, 0.0  ;;  %vm1130_vm13 = vcmp.gt.f32.partialorder %v1016_v20, 0.0  ;;  %v1162_v27 = vmul.f32 0.1, %v1016_v20  ;;  %vm1132_vm14 = vcmp.gt.f32.partialorder %v1024_v15, 0.0 }
  0xe0   : > { %v732_v28 = vmul.f32 0.1, %v594_v21  ;;  %v1018_v29 = vpop.f32.mrf.mxu1  ;;  %2262 = vmatprep.mubr.msk.bf16.mxu0 %vm479_vm1, %v1239_v19  ;;  %2297 = vmatmul.mubr.msk.bf16.vlgmr.msra.gmra.mxu1 %vm479_vm1, %v1223_v18  ;;  %vm700_vm15 = vcmp.gt.f32.partialorder %v594_v21, 0.0  ;;  %v1027_v30 = vadd.f32 %v2235_v22, %v2669_v40  ;;  %v586_v31 = vadd.f32 %v2664_v39, %v585_v26 }
  0xe1   : > { %2263 = vmatmul.mubr.msk.bf16.vlgmr.msra.gmra.mxu0 %vm479_vm1, %v1240_v23  ;;  %v2204_v32 = vpop.f32.mrf.mxu0  ;;  %v1164_v33 = vmul.f32 0.1, %v1024_v15  ;;  %v761_v34 = vsel %vm697_vm11, %v583_v16, %v729_v25  ;;  %v1019_v35 = vadd.f32 %v2669_v40, %v1018_v29  ;;  %v1194_v38 = vsel %vm1130_vm13, %v1016_v20, %v1162_v27 }
  0xe2   : > { %v607_v36 = vadd.f32 %v2204_v32, %v2664_v39  ;;  %v2238_v37 = vpop.f32.mrf.mxu1  ;;  %vm1133_vm0 = vcmp.gt.f32.partialorder %v1027_v30, 0.0  ;;  %v1165_v41 = vmul.f32 0.1, %v1027_v30  ;;  %vm698_vm3 = vcmp.gt.f32.partialorder %v586_v31, 0.0 }
  0xe3   : > { %v598_v42 = vpop.f32.mrf.mxu0  ;;  %v764_v43 = vsel %vm700_vm15, %v594_v21, %v732_v28  ;;  %v730_v44 = vmul.f32 0.1, %v586_v31  ;;  %vm1131_vm4 = vcmp.gt.f32.partialorder %v1019_v35, 0.0  ;;  %v1163_v45 = vmul.f32 0.1, %v1019_v35 }
  0xe4   : > { %v1031_v46 = vpop.f32.mrf.mxu1  ;;  %v1197_v47 = vsel %vm1133_vm0, %v1027_v30, %v1165_v41  ;;  %vm703_vm5 = vcmp.gt.f32.partialorder %v607_v36, 0.0  ;;  %v735_v48 = vmul.f32 0.1, %v607_v36  ;;  %v1040_v49 = vadd.f32 %v2238_v37, %v2669_v40 }
  0xe5   : > { %v2205_v50 = vpop.f32.mrf.mxu0  ;;  %v762_v51 = vsel %vm698_vm3, %v586_v31, %v730_v44  ;;  %v1195_v52 = vsel %vm1131_vm4, %v1019_v35, %v1163_v45  ;;  %v599_v53 = vadd.f32 %v2664_v39, %v598_v42  ;;  %v1032_v54 = vadd.f32 %v2669_v40, %v1031_v46 }
  0xe6   : > { %v2239_v55 = vpop.f32.mrf.mxu1  ;;  %v763_v56 = vsel %vm699_vm12, %v591_v6, %v731_v24  ;;  %v1196_v57 = vsel %vm1132_vm14, %v1024_v15, %v1164_v33  ;;  %v1224_v58 = vpack.c.bf16 %v762_v51, %v761_v34  ;;  %v1241_v59 = vpack.c.bf16 %v1195_v52, %v1194_v38 }
  0xe7   : > { %v601_v60 = vpop.f32.mrf.mxu0  ;;  %v1225_v61 = vpack.c.bf16 %v764_v43, %v763_v56  ;;  %v1242_v62 = vpack.c.bf16 %v1197_v47, %v1196_v57  ;;  %v2705_v63 = vsel %vm703_vm5, %v607_v36, %v735_v48  ;;  %v1168_v1 = vmul.f32 0.1, %v1040_v49 }
  0xe8   : > { %v1034_v0 = vpop.f32.mrf.mxu1  ;;  %v610_v2 = vadd.f32 %v2205_v50, %v2664_v39  ;;  %v1043_v3 = vadd.f32 %v2239_v55, %v2669_v40  ;;  %v602_v4 = vadd.f32 %v2664_v39, %v601_v60  ;;  %2266 = vmatprep.mubr.msk.bf16.mxu0 %vm479_vm1, %v1241_v59  ;;  %2300 = vmatprep.mubr.msk.bf16.mxu1 %vm479_vm1, %v1224_v58  ;;  %vm701_vm6 = vcmp.gt.f32.partialorder %v599_v53, 0.0 }
  0xe9   : > { %v2208_v5 = vpop.f32.mrf.mxu0  ;;  %v733_v6 = vmul.f32 0.1, %v599_v53  ;;  %vm1134_vm7 = vcmp.gt.f32.partialorder %v1032_v54, 0.0  ;;  %v1035_v7 = vadd.f32 %v2669_v40, %v1034_v0  ;;  %2267 = vmatmul.mubr.msk.bf16.gmra.mxu0 %vm479_vm1, %v1242_v62  ;;  %2301 = vmatmul.mubr.msk.bf16.gmra.mxu1 %vm479_vm1, %v1225_v61  ;;  %v1166_v9 = vmul.f32 0.1, %v1032_v54 }
  0xea   : > { %v2242_v8 = vpop.f32.mrf.mxu1  ;;  %vm704_vm8 = vcmp.gt.f32.partialorder %v610_v2, 0.0  ;;  %v736_v10 = vmul.f32 0.1, %v610_v2  ;;  %vm1137_vm9 = vcmp.gt.f32.partialorder %v1043_v3, 0.0  ;;  %v1169_v12 = vmul.f32 0.1, %v1043_v3 }
  0xeb   : > { %v614_v11 = vpop.f32.mrf.mxu0  ;;  %vm702_vm10 = vcmp.gt.f32.partialorder %v602_v4, 0.0  ;;  %v734_v13 = vmul.f32 0.1, %v602_v4  ;;  %vm1135_vm11 = vcmp.gt.f32.partialorder %v1035_v7, 0.0  ;;  %vm1136_vm12 = vcmp.gt.f32.partialorder %v1040_v49, 0.0 }
  0xec   : > { %v1047_v14 = vpop.f32.mrf.mxu1  ;;  %v768_v15 = vsel %vm704_vm8, %v610_v2, %v736_v10  ;;  %v1167_v16 = vmul.f32 0.1, %v1035_v7  ;;  %v623_v17 = vadd.f32 %v2208_v5, %v2664_v39  ;;  %v765_v19 = vsel %vm701_vm6, %v599_v53, %v733_v6 }
  0xed   : > { %v2209_v18 = vpop.f32.mrf.mxu0  ;;  %v1201_v20 = vsel %vm1137_vm9, %v1043_v3, %v1169_v12  ;;  %v766_v21 = vsel %vm702_vm10, %v602_v4, %v734_v13  ;;  %v615_v22 = vadd.f32 %v2664_v39, %v614_v11  ;;  %v1198_v24 = vsel %vm1134_vm7, %v1032_v54, %v1166_v9 }
  0xee   : > { %v2243_v23 = vpop.f32.mrf.mxu1  ;;  %v1226_v25 = vpack.c.bf16 %v766_v21, %v765_v19  ;;  %v1199_v26 = vsel %vm1135_vm11, %v1035_v7, %v1167_v16  ;;  %v1056_v27 = vadd.f32 %v2242_v8, %v2669_v40  ;;  %v1200_v29 = vsel %vm1136_vm12, %v1040_v49, %v1168_v1 }
  0xef   : > { %v617_v28 = vpop.f32.mrf.mxu0  ;;  %v1227_v30 = vpack.c.bf16 %v768_v15, %v2705_v63  ;;  %v1243_v31 = vpack.c.bf16 %v1199_v26, %v1198_v24  ;;  %v1244_v33 = vpack.c.bf16 %v1201_v20, %v1200_v29  ;;  %vm707_vm13 = vcmp.gt.f32.partialorder %v623_v17, 0.0 }
  0xf0   : > { %v1050_v32 = vpop.f32.mrf.mxu1  ;;  %v1048_v34 = vadd.f32 %v2669_v40, %v1047_v14  ;;  %v626_v35 = vadd.f32 %v2209_v18, %v2664_v39  ;;  %2304 = vmatprep.mubr.msk.bf16.mxu1 %vm479_vm1, %v1226_v25  ;;  %v739_v37 = vmul.f32 0.1, %v623_v17  ;;  %v737_v38 = vmul.f32 0.1, %v615_v22 }
  0xf1   : > { %v2212_v36 = vpop.f32.mrf.mxu0  ;;  %v1059_v41 = vadd.f32 %v2243_v23, %v2669_v40  ;;  %v618_v42 = vadd.f32 %v2664_v39, %v617_v28  ;;  %2270 = vmatprep.mubr.msk.bf16.mxu0 %vm479_vm1, %v1243_v31  ;;  %vm1140_vm14 = vcmp.gt.f32.partialorder %v1056_v27, 0.0  ;;  %v1172_v44 = vmul.f32 0.1, %v1056_v27  ;;  %2305 = vmatmul.mubr.msk.bf16.gmra.mxu1 %vm479_vm1, %v1227_v30 }
  0xf2   : > { %v2246_v43 = vpop.f32.mrf.mxu1  ;;  %vm705_vm15 = vcmp.gt.f32.partialorder %v615_v22, 0.0  ;;  %vm708_vm0 = vcmp.gt.f32.partialorder %v626_v35, 0.0  ;;  %2271 = vmatmul.mubr.msk.bf16.gmra.mxu0 %vm479_vm1, %v1244_v33  ;;  %v740_v46 = vmul.f32 0.1, %v626_v35  ;;  %v1170_v49 = vmul.f32 0.1, %v1048_v34 }
  0xf3   : > { %v630_v45 = vpop.f32.mrf.mxu0  ;;  %vm1141_vm3 = vcmp.gt.f32.partialorder %v1059_v41, 0.0  ;;  %v1173_v47 = vmul.f32 0.1, %v1059_v41  ;;  %vm706_vm4 = vcmp.gt.f32.partialorder %v618_v42, 0.0  ;;  %v738_v50 = vmul.f32 0.1, %v618_v42 }
  0xf4   : > { %v1063_v48 = vpop.f32.mrf.mxu1  ;;  %v1051_v51 = vadd.f32 %v2669_v40, %v1050_v32  ;;  %v639_v52 = vadd.f32 %v2212_v36, %v2664_v39  ;;  %v769_v54 = vsel %vm705_vm15, %v615_v22, %v737_v38  ;;  %vm1138_vm5 = vcmp.gt.f32.partialorder %v1048_v34, 0.0 }
  0xf5   : > { %v2213_v53 = vpop.f32.mrf.mxu0  ;;  %v772_v55 = vsel %vm708_vm0, %v626_v35, %v740_v46  ;;  %v1205_v56 = vsel %vm1141_vm3, %v1059_v41, %v1173_v47  ;;  %v770_v58 = vsel %vm706_vm4, %v618_v42, %v738_v50  ;;  %v1072_v59 = vadd.f32 %v2246_v43, %v2669_v40 }
  0xf6   : > { %v2247_v57 = vpop.f32.mrf.mxu1  ;;  %vm1139_vm6 = vcmp.gt.f32.partialorder %v1051_v51, 0.0  ;;  %v631_v60 = vadd.f32 %v2664_v39, %v630_v45  ;;  %v771_v62 = vsel %vm707_vm13, %v623_v17, %v739_v37  ;;  %v1204_v63 = vsel %vm1140_vm14, %v1056_v27, %v1172_v44 }
  0xf7   : > { %v633_v61 = vpop.f32.mrf.mxu0  ;;  %v1228_v0 = vpack.c.bf16 %v770_v58, %v769_v54  ;;  %v1171_v1 = vmul.f32 0.1, %v1051_v51  ;;  %v1202_v3 = vsel %vm1138_vm5, %v1048_v34, %v1170_v49  ;;  %v1229_v4 = vpack.c.bf16 %v772_v55, %v771_v62 }
  0xf8   : > { %v1066_v2 = vpop.f32.mrf.mxu1  ;;  %v1246_v5 = vpack.c.bf16 %v1205_v56, %v1204_v63  ;;  %vm711_vm7 = vcmp.gt.f32.partialorder %v639_v52, 0.0  ;;  %v743_v8 = vmul.f32 0.1, %v639_v52  ;;  %v1064_v9 = vadd.f32 %v2669_v40, %v1063_v48 }
  0xf9   : > { %v2216_v6 = vpop.f32.mrf.mxu0  ;;  %v1203_v7 = vsel %vm1139_vm6, %v1051_v51, %v1171_v1  ;;  %v642_v10 = vadd.f32 %v2213_v53, %v2664_v39  ;;  %2308 = vmatprep.mubr.msk.bf16.mxu1 %vm479_vm1, %v1228_v0  ;;  %v1176_v13 = vmul.f32 0.1, %v1072_v59  ;;  %v741_v14 = vmul.f32 0.1, %v631_v60 }
  0xfa   : > { %v2250_v11 = vpop.f32.mrf.mxu1  ;;  %v1245_v12 = vpack.c.bf16 %v1203_v7, %v1202_v3  ;;  %v1075_v15 = vadd.f32 %v2247_v57, %v2669_v40  ;;  %2309 = vmatmul.mubr.msk.bf16.gmra.mxu1 %vm479_vm1, %v1229_v4  ;;  %vm1144_vm8 = vcmp.gt.f32.partialorder %v1072_v59, 0.0  ;;  %v1174_v17 = vmul.f32 0.1, %v1064_v9 }
  0xfb   : > { %v646_v16 = vpop.f32.mrf.mxu0  ;;  %vm712_vm9 = vcmp.gt.f32.partialorder %v642_v10, 0.0  ;;  %v744_v18 = vmul.f32 0.1, %v642_v10  ;;  %v634_v21 = vadd.f32 %v2664_v39, %v633_v61  ;;  %v1067_v22 = vadd.f32 %v2669_v40, %v1066_v2 }
  0xfc   : > { %v1079_v19 = vpop.f32.mrf.mxu1  ;;  %vm1145_vm10 = vcmp.gt.f32.partialorder %v1075_v15, 0.0  ;;  %v1177_v20 = vmul.f32 0.1, %v1075_v15  ;;  %2274 = vmatprep.mubr.msk.bf16.mxu0 %vm479_vm1, %v1245_v12  ;;  %v775_v24 = vsel %vm711_vm7, %v639_v52, %v743_v8  ;;  %vm709_vm11 = vcmp.gt.f32.partialorder %v631_v60, 0.0 }
  0xfd   : > { %v2217_v23 = vpop.f32.mrf.mxu0  ;;  %vm1142_vm12 = vcmp.gt.f32.partialorder %v1064_v9, 0.0  ;;  %v776_v25 = vsel %vm712_vm9, %v642_v10, %v744_v18  ;;  %2275 = vmatmul.mubr.msk.bf16.gmra.mxu0 %vm479_vm1, %v1246_v5  ;;  %v1208_v27 = vsel %vm1144_vm8, %v1072_v59, %v1176_v13  ;;  %vm710_vm13 = vcmp.gt.f32.partialorder %v634_v21, 0.0 }
  0xfe   : > { %v2251_v26 = vpop.f32.mrf.mxu1  ;;  %v742_v28 = vmul.f32 0.1, %v634_v21  ;;  %v655_v29 = vadd.f32 %v2216_v6, %v2664_v39  ;;  %v1209_v31 = vsel %vm1145_vm10, %v1075_v15, %v1177_v20  ;;  %vm1143_vm14 = vcmp.gt.f32.partialorder %v1067_v22, 0.0 }
  0xff   : > { %v649_v30 = vpop.f32.mrf.mxu0  ;;  %v1175_v32 = vmul.f32 0.1, %v1067_v22  ;;  %v1088_v33 = vadd.f32 %v2250_v11, %v2669_v40  ;;  %v773_v35 = vsel %vm709_vm11, %v631_v60, %v741_v14  ;;  %v1206_v36 = vsel %vm1142_vm12, %v1064_v9, %v1174_v17 }
 0x100   : > { %v1082_v34 = vpop.f32.mrf.mxu1  ;;  %v1231_v37 = vpack.c.bf16 %v776_v25, %v775_v24  ;;  %v774_v38 = vsel %vm710_vm13, %v634_v21, %v742_v28  ;;  %v647_v44 = vadd.f32 %v2664_v39, %v646_v16  ;;  %v1080_v45 = vadd.f32 %v2669_v40, %v1079_v19 }
 0x101   : > { %v2220_v41 = vpop.f32.mrf.mxu0  ;;  %v1230_v42 = vpack.c.bf16 %v774_v38, %v773_v35  ;;  %v1207_v43 = vsel %vm1143_vm14, %v1067_v22, %v1175_v32  ;;  %v1248_v47 = vpack.c.bf16 %v1209_v31, %v1208_v27  ;;  %v747_v49 = vmul.f32 0.1, %v655_v29 }
 0x102   : > { %v2254_v46 = vpop.f32.mrf.mxu1  ;;  %v1247_v48 = vpack.c.bf16 %v1207_v43, %v1206_v36  ;;  %v658_v50 = vadd.f32 %v2217_v23, %v2664_v39  ;;  %vm715_vm15 = vcmp.gt.f32.partialorder %v655_v29, 0.0  ;;  %vm1148_vm0 = vcmp.gt.f32.partialorder %v1088_v33, 0.0 }
 0x103   : > { %v662_v51 = vpop.f32.mrf.mxu0  ;;  %v1180_v52 = vmul.f32 0.1, %v1088_v33  ;;  %v745_v53 = vmul.f32 0.1, %v647_v44  ;;  %2312 = vmatprep.mubr.msk.bf16.mxu1 %vm479_vm1, %v1230_v42  ;;  %v1091_v56 = vadd.f32 %v2251_v26, %v2669_v40  ;;  %v650_v57 = vadd.f32 %v2664_v39, %v649_v30 }
 0x104   : > { %v1095_v54 = vpop.f32.mrf.mxu1  ;;  %vm716_vm3 = vcmp.gt.f32.partialorder %v658_v50, 0.0  ;;  %v748_v55 = vmul.f32 0.1, %v658_v50  ;;  %2278 = vmatprep.mubr.msk.bf16.mxu0 %vm479_vm1, %v1247_v48  ;;  %2313 = vmatmul.mubr.msk.bf16.gmra.mxu1 %vm479_vm1, %v1231_v37  ;;  %vm713_vm4 = vcmp.gt.f32.partialorder %v647_v44, 0.0  ;;  %vm1146_vm5 = vcmp.gt.f32.partialorder %v1080_v45, 0.0 }
 0x105   : > { %v2221_v58 = vpop.f32.mrf.mxu0  ;;  %v1178_v59 = vmul.f32 0.1, %v1080_v45  ;;  %v1083_v60 = vadd.f32 %v2669_v40, %v1082_v34  ;;  %2279 = vmatmul.mubr.msk.bf16.gmra.mxu0 %vm479_vm1, %v1248_v47  ;;  %vm1149_vm6 = vcmp.gt.f32.partialorder %v1091_v56, 0.0  ;;  %v1181_v62 = vmul.f32 0.1, %v1091_v56 }
 0x106   : > { %v2255_v61 = vpop.f32.mrf.mxu1  ;;  %vm714_vm7 = vcmp.gt.f32.partialorder %v650_v57, 0.0  ;;  %v671_v63 = vadd.f32 %v2220_v41, %v2664_v39  ;;  %v780_v1 = vsel %vm716_vm3, %v658_v50, %v748_v55  ;;  %v746_v2 = vmul.f32 0.1, %v650_v57 }
 0x107   : > { %v665_v0 = vpop.f32.mrf.mxu0  ;;  %vm1147_vm8 = vcmp.gt.f32.partialorder %v1083_v60, 0.0  ;;  %v1179_v3 = vmul.f32 0.1, %v1083_v60  ;;  %v779_v5 = vsel %vm715_vm15, %v655_v29, %v747_v49  ;;  %v777_v6 = vsel %vm713_vm4, %v647_v44, %v745_v53 }
 0x108   : > { %v1098_v4 = vpop.f32.mrf.mxu1  ;;  %v1213_v7 = vsel %vm1149_vm6, %v1091_v56, %v1181_v62  ;;  %v1104_v8 = vadd.f32 %v2254_v46, %v2669_v40  ;;  %v1210_v10 = vsel %vm1146_vm5, %v1080_v45, %v1178_v59  ;;  %v778_v11 = vsel %vm714_vm7, %v650_v57, %v746_v2 }
 0x109   : > { %v2224_v9 = vpop.f32.mrf.mxu0  ;;  %v1211_v12 = vsel %vm1147_vm8, %v1083_v60, %v1179_v3  ;;  %v663_v13 = vadd.f32 %v2664_v39, %v662_v51  ;;  %v1212_v15 = vsel %vm1148_vm0, %v1088_v33, %v1180_v52  ;;  %v1233_v16 = vpack.c.bf16 %v780_v1, %v779_v5 }
 0x10a   : > { %v2258_v14 = vpop.f32.mrf.mxu1  ;;  %v1232_v17 = vpack.c.bf16 %v778_v11, %v777_v6  ;;  %v1249_v18 = vpack.c.bf16 %v1211_v12, %v1210_v10  ;;  %v1250_v20 = vpack.c.bf16 %v1213_v7, %v1212_v15  ;;  %v751_v21 = vmul.f32 0.1, %v671_v63 }
 0x10b   : > { %v678_v19 = vpop.f32.mrf.mxu0  ;;  %v1184_v22 = vmul.f32 0.1, %v1104_v8  ;;  %v1096_v23 = vadd.f32 %v2669_v40, %v1095_v54  ;;  %v674_v24 = vadd.f32 %v2221_v58, %v2664_v39  ;;  %v1107_v25 = vadd.f32 %v2255_v61, %v2669_v40 }
 0x10c   : > { %v666_v26 = vadd.f32 %v2664_v39, %v665_v0  ;;  %v1099_v27 = vadd.f32 %v2669_v40, %v1098_v4  ;;  %2282 = vmatprep.mubr.msk.bf16.mxu0 %vm479_vm1, %v1249_v18  ;;  %vm719_vm9 = vcmp.gt.f32.partialorder %v671_v63, 0.0  ;;  %vm717_vm10 = vcmp.gt.f32.partialorder %v663_v13, 0.0  ;;  %2316 = vmatprep.mubr.msk.bf16.mxu1 %vm479_vm1, %v1232_v17  ;;  %v1111_v30 = vpop.f32.mrf.mxu1  ;;  %v2799_v17 = vld [vmem:[%s3042_s8] ss:$0 sm:$0xff] }
 0x10d   : > { %v749_v28 = vmul.f32 0.1, %v663_v13  ;;  %v1182_v29 = vmul.f32 0.1, %v1096_v23  ;;  %2283 = vmatmul.mubr.msk.bf16.gmra.mxu0 %vm479_vm1, %v1250_v20  ;;  %vm720_vm11 = vcmp.gt.f32.partialorder %v674_v24, 0.0  ;;  %vm1153_vm12 = vcmp.gt.f32.partialorder %v1107_v25, 0.0  ;;  %2317 = vmatmul.mubr.msk.bf16.gmra.mxu1 %vm479_vm1, %v1233_v16  ;;  %v2225_v33 = vpop.f32.mrf.mxu0 }
 0x10e   : > { %v752_v31 = vmul.f32 0.1, %v674_v24  ;;  %v1185_v32 = vmul.f32 0.1, %v1107_v25  ;;  %vm1150_vm13 = vcmp.gt.f32.partialorder %v1096_v23, 0.0  ;;  %vm718_vm14 = vcmp.gt.f32.partialorder %v666_v26, 0.0  ;;  %v2259_v43 = vpop.f32.mrf.mxu1 }
 0x10f   : > { %v750_v34 = vmul.f32 0.1, %v666_v26  ;;  %vm1151_vm15 = vcmp.gt.f32.partialorder %v1099_v27, 0.0  ;;  %vm1152_vm0 = vcmp.gt.f32.partialorder %v1104_v8, 0.0  ;;  %v1183_v36 = vmul.f32 0.1, %v1099_v27  ;;  %v681_v48 = vpop.f32.mrf.mxu0 }
 0x110   : > { %v784_v35 = vsel %vm720_vm11, %v674_v24, %v752_v31  ;;  %v783_v37 = vsel %vm719_vm9, %v671_v63, %v751_v21  ;;  %v781_v38 = vsel %vm717_vm10, %v663_v13, %v749_v28  ;;  %v1217_v41 = vsel %vm1153_vm12, %v1107_v25, %v1185_v32  ;;  %v1114_v59 = vpop.f32.mrf.mxu1 }
 0x111   : > { %v782_v42 = vsel %vm718_vm14, %v666_v26, %v750_v34  ;;  %v1214_v44 = vsel %vm1150_vm13, %v1096_v23, %v1182_v29  ;;  %v1215_v46 = vsel %vm1151_vm15, %v1099_v27, %v1183_v36  ;;  %v687_v47 = vadd.f32 %v2224_v9, %v2664_v39 }
 0x112   : > { %v1234_v45 = vpack.c.bf16 %v782_v42, %v781_v38  ;;  %v1216_v49 = vsel %vm1152_vm0, %v1104_v8, %v1184_v22  ;;  %v1235_v50 = vpack.c.bf16 %v784_v35, %v783_v37  ;;  %v1251_v51 = vpack.c.bf16 %v1215_v46, %v1214_v44 }
 0x113   : > { %v679_v52 = vadd.f32 %v2664_v39, %v678_v19  ;;  %v1252_v53 = vpack.c.bf16 %v1217_v41, %v1216_v49  ;;  %v1112_v54 = vadd.f32 %v2669_v40, %v1111_v30  ;;  %v690_v55 = vadd.f32 %v2225_v33, %v2664_v39 }
 0x114   : > { %v1123_v56 = vadd.f32 %v2259_v43, %v2669_v40  ;;  %2320 = vmatprep.mubr.msk.bf16.mxu1 %vm479_vm1, %v1234_v45  ;;  %v1120_v57 = vadd.f32 %v2258_v14, %v2669_v40  ;;  %v682_v58 = vadd.f32 %v2664_v39, %v681_v48  ;;  %2286 = vmatprep.mubr.msk.bf16.mxu0 %vm479_vm1, %v1251_v51  ;;  %vm723_vm3 = vcmp.gt.f32.partialorder %v687_v47, 0.0 }
 0x115   : > { %v753_v60 = vmul.f32 0.1, %v679_v52  ;;  %vm724_vm4 = vcmp.gt.f32.partialorder %v690_v55, 0.0  ;;  %v756_v61 = vmul.f32 0.1, %v690_v55  ;;  %2287 = vmatmul.mubr.msk.bf16.gmra.mxu0 %vm479_vm1, %v1252_v53  ;;  %2321 = vmatmul.mubr.msk.bf16.gmra.mxu1 %vm479_vm1, %v1235_v50  ;;  %vm721_vm5 = vcmp.gt.f32.partialorder %v679_v52, 0.0 }
 0x116   : > { %v755_v62 = vmul.f32 0.1, %v687_v47  ;;  %v1189_v63 = vmul.f32 0.1, %v1123_v56  ;;  %vm722_vm6 = vcmp.gt.f32.partialorder %v682_v58, 0.0  ;;  %vm1157_vm7 = vcmp.gt.f32.partialorder %v1123_v56, 0.0 }
 0x117   : > { %v1186_v0 = vmul.f32 0.1, %v1112_v54  ;;  %v754_v1 = vmul.f32 0.1, %v682_v58  ;;  %v1115_v39 = vadd.f32 %v2669_v40, %v1114_v59  ;;  %vm1156_vm8 = vcmp.gt.f32.partialorder %v1120_v57, 0.0 }
 0x118   : > { %v1188_v2 = vmul.f32 0.1, %v1120_v57  ;;  %vm1154_vm9 = vcmp.gt.f32.partialorder %v1112_v54, 0.0  ;;  %v788_v3 = vsel %vm724_vm4, %v690_v55, %v756_v61  ;;  %v785_v4 = vsel %vm721_vm5, %v679_v52, %v753_v60 }
 0x119   : > { %v786_v5 = vsel %vm722_vm6, %v682_v58, %v754_v1  ;;  %vm1155_vm10 = vcmp.gt.f32.partialorder %v1115_v39, 0.0  ;;  %v1187_v6 = vmul.f32 0.1, %v1115_v39  ;;  %v787_v7 = vsel %vm723_vm3, %v687_v47, %v755_v62 }
 0x11a   : > { %v1221_v8 = vsel %vm1157_vm7, %v1123_v56, %v1189_v63  ;;  %v1236_v9 = vpack.c.bf16 %v786_v5, %v785_v4  ;;  %v1218_v10 = vsel %vm1154_vm9, %v1112_v54, %v1186_v0  ;;  %v1237_v11 = vpack.c.bf16 %v788_v3, %v787_v7 }
 0x11b   : > { %v1219_v12 = vsel %vm1155_vm10, %v1115_v39, %v1187_v6  ;;  %v1220_v13 = vsel %vm1156_vm8, %v1120_v57, %v1188_v2 }
 0x11c   : > { %v1253_v14 = vpack.c.bf16 %v1219_v12, %v1218_v10  ;;  %2324 = vmatprep.mubr.msk.bf16.mxu1 %vm479_vm1, %v1236_v9  ;;  %v1254_v40 = vpack.c.bf16 %v1221_v8, %v1220_v13 }
 0x11d   : > { %2325 = vmatmul.mubr.msk.bf16.gmra.mxu1 %vm479_vm1, %v1237_v11 }
 0x11e   : > { %2290 = vmatprep.mubr.msk.bf16.mxu0 %vm479_vm1, %v1253_v14 }
 0x11f   : > { %2291 = vmatmul.mubr.msk.bf16.gmra.mxu0 %vm479_vm1, %v1254_v40 }
 0x1a0   : > { %v2298_v15 = vpop.f32.mrf.mxu1 }
 0x1a1   : > { %v2264_v16 = vpop.f32.mrf.mxu0 }
 0x1a2   : > { %v1562_v18 = vadd.f32 %v2298_v15, %v2264_v16  ;;  %v1553_v19 = vpop.f32.mrf.mxu1 }
 0x1a3   : > { %v1341_v20 = vpop.f32.mrf.mxu0 }
 0x1a4   : > { %v2802_v21 = vadd.f32 %v2799_v17, %v1562_v18  ;;  %v1554_v22 = vadd.f32 %v1553_v19, %v1341_v20  ;;  %v2299_v23 = vpop.f32.mrf.mxu1 }
 0x1a5   : > { %v2265_v24 = vpop.f32.mrf.mxu0 }
 0x1a6   : > { %v1721_v25 = vsub.f32 0.0, %v2802_v21  ;;  %v2806_v26 = vadd.f32 %v2799_v17, %v1554_v22  ;;  %v1565_v27 = vadd.f32 %v2299_v23, %v2265_v24  ;;  %v1556_v28 = vpop.f32.mrf.mxu1 }
 0x1a7   : > { %v1344_v29 = vpop.f32.mrf.mxu0 }
 0x1a8   : > { %v1755_v30 = vmul.f32 1.442695, %v1721_v25  ;;  %v1719_v31 = vsub.f32 0.0, %v2806_v26  ;;  %v2810_v32 = vadd.f32 %v2799_v17, %v1565_v27  ;;  %v1557_v33 = vadd.f32 %v1556_v28, %v1344_v29 }
 0x1a9   : > { %v2268_v37 = vpop.f32.mrf.mxu0  ;;  %v2302_v38 = vpop.f32.mrf.mxu1 }
 0x1aa   : > { %2372 = vpow2.f32 %v1755_v30  ;;  %v1751_v34 = vmul.f32 1.442695, %v1719_v31  ;;  %v1722_v35 = vsub.f32 0.0, %v2810_v32  ;;  %v2814_v36 = vadd.f32 %v2799_v17, %v1557_v33 }
 0x1ab   : > { %v1578_v41 = vadd.f32 %v2302_v38, %v2268_v37  ;;  %v1357_v44 = vpop.f32.mrf.mxu0  ;;  %v1569_v45 = vpop.f32.mrf.mxu1 }
 0x1ac   : > { %2374 = vpow2.f32 %v1751_v34  ;;  %v1757_v42 = vmul.f32 1.442695, %v1722_v35  ;;  %v1720_v43 = vsub.f32 0.0, %v2814_v36  ;;  %v1570_v47 = vadd.f32 %v1569_v45, %v1357_v44 }
 0x1ad   : > { %v2818_v46 = vadd.f32 %v2799_v17, %v1578_v41  ;;  %v2269_v49 = vpop.f32.mrf.mxu0  ;;  %v2303_v50 = vpop.f32.mrf.mxu1 }
 0x1ae   : > { %2376 = vpow2.f32 %v1757_v42  ;;  %v1753_v48 = vmul.f32 1.442695, %v1720_v43  ;;  %v2822_v52 = vadd.f32 %v2799_v17, %v1570_v47  ;;  %v1581_v53 = vadd.f32 %v2303_v50, %v2269_v49 }
 0x1af   : > { %v1725_v51 = vsub.f32 0.0, %v2818_v46  ;;  %v1360_v54 = vpop.f32.mrf.mxu0  ;;  %v1572_v55 = vpop.f32.mrf.mxu1 }
 0x1b0   : > { %2378 = vpow2.f32 %v1753_v48  ;;  %v1723_v57 = vsub.f32 0.0, %v2822_v52  ;;  %v2826_v58 = vadd.f32 %v2799_v17, %v1581_v53  ;;  %v1573_v59 = vadd.f32 %v1572_v55, %v1360_v54 }
 0x1b1   : > { %v1763_v56 = vmul.f32 1.442695, %v1725_v51  ;;  %v2306_v0 = vpop.f32.mrf.mxu1 }
 0x1b2   : > { %v1759_v60 = vmul.f32 1.442695, %v1723_v57  ;;  %v1726_v61 = vsub.f32 0.0, %v2826_v58  ;;  %v2830_v62 = vadd.f32 %v2799_v17, %v1573_v59  ;;  %v2272_v63 = vpop.f32.mrf.mxu0 }
 0x1b3   : > { %2380 = vpow2.f32 %v1763_v56  ;;  %v1594_v1 = vadd.f32 %v2306_v0, %v2272_v63  ;;  %v1585_v4 = vpop.f32.mrf.mxu1 }
 0x1b4   : > { %2382 = vpow2.f32 %v1759_v60  ;;  %v1765_v39 = vmul.f32 1.442695, %v1726_v61  ;;  %v1724_v2 = vsub.f32 0.0, %v2830_v62  ;;  %v1373_v3 = vpop.f32.mrf.mxu0 }
 0x1b5   : > { %v2834_v5 = vadd.f32 %v2799_v17, %v1594_v1  ;;  %v1586_v6 = vadd.f32 %v1585_v4, %v1373_v3  ;;  %v2307_v10 = vpop.f32.mrf.mxu1 }
 0x1b6   : > { %2384 = vpow2.f32 %v1765_v39  ;;  %v1761_v8 = vmul.f32 1.442695, %v1724_v2  ;;  %v2273_v9 = vpop.f32.mrf.mxu0 }
 0x1b7   : > { %v2373_v7 = vpop.eup %2372  ;;  %v1729_v12 = vsub.f32 0.0, %v2834_v5  ;;  %v2838_v13 = vadd.f32 %v2799_v17, %v1586_v6  ;;  %v1597_v14 = vadd.f32 %v2307_v10, %v2273_v9  ;;  %v1588_v16 = vpop.f32.mrf.mxu1 }
 0x1b8   : > { %v1817_v11 = vadd.f32 1.0, %v2373_v7  ;;  %2386 = vpow2.f32 %v1761_v8  ;;  %v1376_v15 = vpop.f32.mrf.mxu0 }
 0x1b9   : > { %v2375_v40 = vpop.eup %2374  ;;  %v1771_v19 = vmul.f32 1.442695, %v1729_v12  ;;  %v1727_v20 = vsub.f32 0.0, %v2838_v13  ;;  %v2842_v23 = vadd.f32 %v2799_v17, %v1597_v14  ;;  %v1589_v24 = vadd.f32 %v1588_v16, %v1376_v15 }
 0x1ba   : > { %2388 = vrcp.f32 %v1817_v11  ;;  %v1815_v18 = vadd.f32 1.0, %v2375_v40  ;;  %v2310_v25 = vpop.f32.mrf.mxu1 }
 0x1bb   : > { %v2377_v22 = vpop.eup %2376  ;;  %v1767_v28 = vmul.f32 1.442695, %v1727_v20  ;;  %v1730_v30 = vsub.f32 0.0, %v2842_v23  ;;  %v2846_v31 = vadd.f32 %v2799_v17, %v1589_v24 }
 0x1bc   : > { %2390 = vrcp.f32 %v1815_v18  ;;  %v1818_v27 = vadd.f32 1.0, %v2377_v22  ;;  %v1601_v33 = vpop.f32.mrf.mxu1 }
 0x1bd   : > { %v2379_v29 = vpop.eup %2378  ;;  %2392 = vpow2.f32 %v1771_v19  ;;  %v2276_v35 = vpop.f32.mrf.mxu0  ;;  %v1773_v37 = vmul.f32 1.442695, %v1730_v30  ;;  %v1728_v38 = vsub.f32 0.0, %v2846_v31 }
 0x1be   : > { %2394 = vrcp.f32 %v1818_v27  ;;  %v1816_v34 = vadd.f32 1.0, %v2379_v29  ;;  %v1610_v41 = vadd.f32 %v2310_v25, %v2276_v35  ;;  %v2311_v42 = vpop.f32.mrf.mxu1 }
 0x1bf   : > { %2396 = vpow2.f32 %v1767_v28  ;;  %v1389_v44 = vpop.f32.mrf.mxu0  ;;  %v1769_v47 = vmul.f32 1.442695, %v1728_v38 }
 0x1c0   : > { %v2381_v43 = vpop.eup %2380  ;;  %2398 = vrcp.f32 %v1816_v34  ;;  %v2850_v48 = vadd.f32 %v2799_v17, %v1610_v41  ;;  %v1604_v49 = vpop.f32.mrf.mxu1  ;;  %v1602_v51 = vadd.f32 %v1601_v33, %v1389_v44 }
 0x1c1   : > { %v1821_v45 = vadd.f32 1.0, %v2381_v43  ;;  %2400 = vpow2.f32 %v1773_v37  ;;  %v2383_v50 = vpop.eup %2382  ;;  %v2277_v53 = vpop.f32.mrf.mxu0 }
 0x1c2   : > { %v1819_v54 = vadd.f32 1.0, %v2383_v50  ;;  %v1733_v55 = vsub.f32 0.0, %v2850_v48  ;;  %v1613_v56 = vadd.f32 %v2311_v42, %v2277_v53  ;;  %v2855_v59 = vadd.f32 %v2799_v17, %v1602_v51 }
 0x1c3   : > { %2402 = vrcp.f32 %v1821_v45  ;;  %v2385_v57 = vpop.eup %2384  ;;  %v1392_v60 = vpop.f32.mrf.mxu0 }
 0x1c4   : > { %2404 = vpow2.f32 %v1769_v47  ;;  %v1822_v61 = vadd.f32 1.0, %v2385_v57  ;;  %v1779_v63 = vmul.f32 1.442695, %v1733_v55  ;;  %v2858_v0 = vadd.f32 %v2799_v17, %v1613_v56  ;;  %v2314_v1 = vpop.f32.mrf.mxu1 }
 0x1c5   : > { %2406 = vrcp.f32 %v1819_v54  ;;  %v2387_v39 = vpop.eup %2386  ;;  %v1731_v2 = vsub.f32 0.0, %v2855_v59  ;;  %v1605_v3 = vadd.f32 %v1604_v49, %v1392_v60  ;;  %v2280_v4 = vpop.f32.mrf.mxu0 }
 0x1c6   : > { %2408 = vrcp.f32 %v1822_v61  ;;  %v1820_v7 = vadd.f32 1.0, %v2387_v39  ;;  %v1734_v8 = vsub.f32 0.0, %v2858_v0  ;;  %v1626_v9 = vadd.f32 %v2314_v1, %v2280_v4  ;;  %v1617_v10 = vpop.f32.mrf.mxu1 }
 0x1c7   : > { %v2389_v6 = vpop.eup %2388  ;;  %2410 = vpow2.f32 %v1779_v63  ;;  %v1775_v12 = vmul.f32 1.442695, %v1731_v2  ;;  %v2869_v14 = vadd.f32 %v2799_v17, %v1605_v3  ;;  %v1405_v40 = vpop.f32.mrf.mxu0 }
 0x1c8   : > { %v1881_v11 = vmul.f32 %v2389_v6, %v2802_v21  ;;  %2412 = vrcp.f32 %v1820_v7  ;;  %v1781_v16 = vmul.f32 1.442695, %v1734_v8  ;;  %v2872_v18 = vadd.f32 %v2799_v17, %v1626_v9  ;;  %v2315_v20 = vpop.f32.mrf.mxu1 }
 0x1c9   : > { %v2391_v15 = vpop.eup %2390  ;;  %v1618_v19 = vadd.f32 %v1617_v10, %v1405_v40  ;;  %2414 = vpow2.f32 %v1775_v12  ;;  %v1732_v24 = vsub.f32 0.0, %v2869_v14  ;;  %v2281_v25 = vpop.f32.mrf.mxu0 }
 0x1ca   : > { %v2393_v22 = vpop.eup %2392  ;;  %1913 = vst.msk [vmem:[%s2864_s16 + $0x10] sm:$0xff] %vm916_vm2, %v1881_v11  ;;  %v1879_v21 = vmul.f32 %v2391_v15, %v2806_v26  ;;  %2416 = vpow2.f32 %v1781_v16  ;;  %v1737_v29 = vsub.f32 0.0, %v2872_v18  ;;  %v1620_v33 = vpop.f32.mrf.mxu1  ;;  %v1629_v37 = vadd.f32 %v2315_v20, %v2281_v25 }
 0x1cb   : > { %v2395_v27 = vpop.eup %2394  ;;  %v1825_v28 = vadd.f32 1.0, %v2393_v22  ;;  %v2880_v30 = vadd.f32 %v2799_v17, %v1618_v19  ;;  %v1777_v26 = vmul.f32 1.442695, %v1732_v24  ;;  %v1408_v38 = vpop.f32.mrf.mxu0 }
 0x1cc   : > { %v2397_v34 = vpop.eup %2396  ;;  %1911 = vst.msk [vmem:[%s2864_s16] sm:$0xff] %vm916_vm2, %v1879_v21  ;;  %v1882_v35 = vmul.f32 %v2395_v27, %v2810_v32  ;;  %v1787_v43 = vmul.f32 1.442695, %v1737_v29  ;;  %v2890_v49 = vadd.f32 %v2799_v17, %v1629_v37  ;;  %v1621_v32 = vadd.f32 %v1620_v33, %v1408_v38 }
 0x1cd   : > { %v2399_v41 = vpop.eup %2398  ;;  %2418 = vrcp.f32 %v1825_v28  ;;  %v1823_v42 = vadd.f32 1.0, %v2397_v34  ;;  %v1735_v44 = vsub.f32 0.0, %v2880_v30  ;;  %v2284_v50 = vpop.f32.mrf.mxu0 }
 0x1ce   : > { %v2401_v45 = vpop.eup %2400  ;;  %1914 = vst.msk [vmem:[%s2864_s16 + $0x18] sm:$0xff] %vm916_vm2, %v1882_v35  ;;  %v1880_v47 = vmul.f32 %v2399_v41, %v2814_v36  ;;  %2420 = vpow2.f32 %v1777_v26  ;;  %v2318_v54 = vpop.f32.mrf.mxu1  ;;  %v1738_v56 = vsub.f32 0.0, %v2890_v49  ;;  %v2896_v57 = vadd.f32 %v2799_v17, %v1621_v32 }
 0x1cf   : > { %2422 = vrcp.f32 %v1823_v42  ;;  %v1826_v51 = vadd.f32 1.0, %v2401_v45  ;;  %v1783_v53 = vmul.f32 1.442695, %v1735_v44  ;;  %v1642_v36 = vadd.f32 %v2318_v54, %v2284_v50  ;;  %v1421_v60 = vpop.f32.mrf.mxu0 }
 0x1d0   : > { %v2403_v55 = vpop.eup %2402  ;;  %1912 = vst.msk [vmem:[%s2864_s16 + $0x8] sm:$0xff] %vm916_vm2, %v1880_v47  ;;  %2424 = vpow2.f32 %v1787_v43  ;;  %v1633_v1 = vpop.f32.mrf.mxu1  ;;  %v1789_v3 = vmul.f32 1.442695, %v1738_v56  ;;  %v1736_v4 = vsub.f32 0.0, %v2896_v57 }
 0x1d1   : > { %v2405_v61 = vpop.eup %2404  ;;  %v1885_v63 = vmul.f32 %v2403_v55, %v2818_v46  ;;  %2426 = vrcp.f32 %v1826_v51  ;;  %v2285_v6 = vpop.f32.mrf.mxu0  ;;  %v2904_v8 = vadd.f32 %v2799_v17, %v1642_v36  ;;  %v1634_v9 = vadd.f32 %v1633_v1, %v1421_v60 }
 0x1d2   : > { %v2407_v39 = vpop.eup %2406  ;;  %v1824_v2 = vadd.f32 1.0, %v2405_v61  ;;  %2428 = vpow2.f32 %v1783_v53  ;;  %v2319_v10 = vpop.f32.mrf.mxu1  ;;  %v1785_v11 = vmul.f32 1.442695, %v1736_v4 }
 0x1d3   : > { %1917 = vst.msk [vmem:[%s2864_s16 + $0x30] sm:$0xff] %vm916_vm2, %v1885_v63  ;;  %v1883_v7 = vmul.f32 %v2407_v39, %v2822_v52  ;;  %v2409_v46 = vpop.eup %2408  ;;  %v1645_v12 = vadd.f32 %v2319_v10, %v2285_v6  ;;  %v1424_v40 = vpop.f32.mrf.mxu0  ;;  %v1741_v19 = vsub.f32 0.0, %v2904_v8  ;;  %v2911_v52 = vadd.f32 %v2799_v17, %v1634_v9 }
 0x1d4   : > { %2430 = vrcp.f32 %v1824_v2  ;;  %v2411_v15 = vpop.eup %2410  ;;  %v1886_v16 = vmul.f32 %v2409_v46, %v2826_v58  ;;  %v1636_v20 = vpop.f32.mrf.mxu1 }
 0x1d5   : > { %1915 = vst.msk [vmem:[%s2864_s16 + $0x20] sm:$0xff] %vm916_vm2, %v1883_v7  ;;  %2432 = vpow2.f32 %v1789_v3  ;;  %v2413_v22 = vpop.eup %2412  ;;  %v1829_v21 = vadd.f32 1.0, %v2411_v15  ;;  %v2914_v24 = vadd.f32 %v2799_v17, %v1645_v12  ;;  %v1637_v25 = vadd.f32 %v1636_v20, %v1424_v40  ;;  %v2288_v33 = vpop.f32.mrf.mxu0 }
 0x1d6   : > { %2434 = vpow2.f32 %v1785_v11  ;;  %v2415_v27 = vpop.eup %2414  ;;  %1918 = vst.msk [vmem:[%s2864_s16 + $0x38] sm:$0xff] %vm916_vm2, %v1886_v16  ;;  %v1884_v58 = vmul.f32 %v2413_v22, %v2830_v62  ;;  %v1795_v28 = vmul.f32 1.442695, %v1741_v19  ;;  %v1739_v29 = vsub.f32 0.0, %v2911_v52  ;;  %v2322_v34 = vpop.f32.mrf.mxu1 }
 0x1d7   : > { %v2417_v35 = vpop.eup %2416  ;;  %2436 = vrcp.f32 %v1829_v21  ;;  %v1827_v26 = vadd.f32 1.0, %v2415_v27  ;;  %v1742_v37 = vsub.f32 0.0, %v2914_v24  ;;  %v2922_v38 = vadd.f32 %v2799_v17, %v1637_v25  ;;  %v1437_v62 = vpop.f32.mrf.mxu0 }
 0x1d8   : > { %1916 = vst.msk [vmem:[%s2864_s16 + $0x28] sm:$0xff] %vm916_vm2, %v1884_v58  ;;  %v1830_v41 = vadd.f32 1.0, %v2417_v35  ;;  %2438 = vpow2.f32 %v1795_v28  ;;  %v1791_v42 = vmul.f32 1.442695, %v1739_v29  ;;  %v1658_v43 = vadd.f32 %v2322_v34, %v2288_v33  ;;  %v1649_v44 = vpop.f32.mrf.mxu1 }
 0x1d9   : > { %2440 = vrcp.f32 %v1827_v26  ;;  %v1797_v47 = vmul.f32 1.442695, %v1742_v37  ;;  %v1740_v32 = vsub.f32 0.0, %v2922_v38  ;;  %v1650_v50 = vadd.f32 %v1649_v44, %v1437_v62  ;;  %v2289_v55 = vpop.f32.mrf.mxu0 }
 0x1da   : > { %v2419_v45 = vpop.eup %2418  ;;  %2442 = vrcp.f32 %v1830_v41  ;;  %v2929_v54 = vadd.f32 %v2799_v17, %v1658_v43  ;;  %v2323_v56 = vpop.f32.mrf.mxu1 }
 0x1db   : > { %v2421_v51 = vpop.eup %2420  ;;  %v1889_v53 = vmul.f32 %v2419_v45, %v2834_v5  ;;  %2444 = vpow2.f32 %v1791_v42  ;;  %v1793_v61 = vmul.f32 1.442695, %v1740_v32  ;;  %v2932_v63 = vadd.f32 %v2799_v17, %v1650_v50  ;;  %v1440_v3 = vpop.f32.mrf.mxu0 }
 0x1dc   : > { %v2423_v36 = vpop.eup %2422  ;;  %v1828_v60 = vadd.f32 1.0, %v2421_v51  ;;  %2446 = vpow2.f32 %v1797_v47  ;;  %v1745_v5 = vsub.f32 0.0, %v2929_v54  ;;  %v1661_v2 = vadd.f32 %v2323_v56, %v2289_v55  ;;  %v1652_v4 = vpop.f32.mrf.mxu1 }
 0x1dd   : > { %v2425_v1 = vpop.eup %2424  ;;  %1921 = vst.msk [vmem:[%s2864_s16 + $0x50] sm:$0xff] %vm916_vm2, %v1889_v53  ;;  %v1887_v39 = vmul.f32 %v2423_v36, %v2838_v13  ;;  %v1743_v9 = vsub.f32 0.0, %v2932_v63  ;;  %v1653_v10 = vadd.f32 %v1652_v4, %v1440_v3 }
 0x1de   : > { %v2427_v6 = vpop.eup %2426  ;;  %2448 = vrcp.f32 %v1828_v60  ;;  %v1833_v7 = vadd.f32 1.0, %v2425_v1  ;;  %v1803_v13 = vmul.f32 1.442695, %v1745_v5  ;;  %v2943_v12 = vadd.f32 %v2799_v17, %v1661_v2  ;;  %v2326_v40 = vpop.f32.mrf.mxu1 }
 0x1df   : > { %v2429_v46 = vpop.eup %2428  ;;  %1919 = vst.msk [vmem:[%s2864_s16 + $0x40] sm:$0xff] %vm916_vm2, %v1887_v39  ;;  %v1890_v11 = vmul.f32 %v2427_v6, %v2842_v23  ;;  %2450 = vpow2.f32 %v1793_v61  ;;  %v1799_v16 = vmul.f32 1.442695, %v1743_v9  ;;  %v2946_v19 = vadd.f32 %v2799_v17, %v1653_v10  ;;  %v2292_v23 = vpop.f32.mrf.mxu0 }
 0x1e0   : > { %2452 = vrcp.f32 %v1833_v7  ;;  %v1831_v15 = vadd.f32 1.0, %v2429_v46  ;;  %v1746_v22 = vsub.f32 0.0, %v2943_v12  ;;  %v1665_v21 = vpop.f32.mrf.mxu1  ;;  %v1674_v28 = vadd.f32 %v2326_v40, %v2292_v23 }
 0x1e1   : > { %v2431_v20 = vpop.eup %2430  ;;  %1922 = vst.msk [vmem:[%s2864_s16 + $0x58] sm:$0xff] %vm916_vm2, %v1890_v11  ;;  %2454 = vpow2.f32 %v1803_v13  ;;  %v1744_v58 = vsub.f32 0.0, %v2946_v19  ;;  %v1453_v35 = vpop.f32.mrf.mxu0 }
 0x1e2   : > { %v2433_v25 = vpop.eup %2432  ;;  %v1888_v27 = vmul.f32 %v2431_v20, %v2846_v31  ;;  %2456 = vrcp.f32 %v1831_v15  ;;  %v1805_v34 = vmul.f32 1.442695, %v1746_v22  ;;  %v2327_v26 = vpop.f32.mrf.mxu1  ;;  %v2956_v42 = vadd.f32 %v2799_v17, %v1674_v28 }
 0x1e3   : > { %v2435_v29 = vpop.eup %2434  ;;  %v1834_v33 = vadd.f32 1.0, %v2433_v25  ;;  %2458 = vpow2.f32 %v1799_v16  ;;  %v1801_v41 = vmul.f32 1.442695, %v1744_v58  ;;  %v1666_v43 = vadd.f32 %v1665_v21, %v1453_v35  ;;  %v2293_v62 = vpop.f32.mrf.mxu0 }
 0x1e4   : > { %1920 = vst.msk [vmem:[%s2864_s16 + $0x48] sm:$0xff] %vm916_vm2, %v1888_v27  ;;  %v1832_v37 = vadd.f32 1.0, %v2435_v29  ;;  %v2437_v31 = vpop.eup %2436  ;;  %v1749_v47 = vsub.f32 0.0, %v2956_v42  ;;  %v1668_v50 = vpop.f32.mrf.mxu1  ;;  %v1677_v55 = vadd.f32 %v2327_v26, %v2293_v62 }
 0x1e5   : > { %2460 = vrcp.f32 %v1834_v33  ;;  %v2439_v44 = vpop.eup %2438  ;;  %v1893_v45 = vmul.f32 %v2437_v31, %v2850_v48  ;;  %v2961_v32 = vadd.f32 %v2799_v17, %v1666_v43  ;;  %v1456_v56 = vpop.f32.mrf.mxu0 }
 0x1e6   : > { %2462 = vrcp.f32 %v1832_v37  ;;  %v2441_v51 = vpop.eup %2440  ;;  %v1837_v53 = vadd.f32 1.0, %v2439_v44  ;;  %v1811_v48 = vmul.f32 1.442695, %v1749_v47  ;;  %v2969_v5 = vadd.f32 %v2799_v17, %v1677_v55 }
 0x1e7   : > { %2464 = vpow2.f32 %v1805_v34  ;;  %v2443_v36 = vpop.eup %2442  ;;  %1925 = vst.msk [vmem:[%s2864_s16 + $0x70] sm:$0xff] %vm916_vm2, %v1893_v45  ;;  %v1891_v60 = vmul.f32 %v2441_v51, %v2855_v59  ;;  %v1747_v61 = vsub.f32 0.0, %v2961_v32  ;;  %v1669_v2 = vadd.f32 %v1668_v50, %v1456_v56 }
 0x1e8   : > { %2466 = vpow2.f32 %v1801_v41  ;;  %v2445_v1 = vpop.eup %2444  ;;  %v1894_v39 = vmul.f32 %v2443_v36, %v2858_v0  ;;  %v1750_v9 = vsub.f32 0.0, %v2969_v5 }
 0x1e9   : > { %2468 = vrcp.f32 %v1837_v53  ;;  %v2447_v3 = vpop.eup %2446  ;;  %1923 = vst.msk [vmem:[%s2864_s16 + $0x60] sm:$0xff] %vm916_vm2, %v1891_v60  ;;  %v1835_v4 = vadd.f32 1.0, %v2445_v1  ;;  %v1807_v6 = vmul.f32 1.442695, %v1747_v61  ;;  %v2977_v0 = vadd.f32 %v2799_v17, %v1669_v2 }
 0x1ea   : > { %2470 = vpow2.f32 %v1811_v48  ;;  %1926 = vst.msk [vmem:[%s2864_s16 + $0x78] sm:$0xff] %vm916_vm2, %v1894_v39  ;;  %v1838_v7 = vadd.f32 1.0, %v2447_v3  ;;  %v1813_v40 = vmul.f32 1.442695, %v1750_v9 }
 0x1eb   : > { %v2449_v59 = vpop.eup %2448  ;;  %2472 = vrcp.f32 %v1835_v4  ;;  %v1748_v15 = vsub.f32 0.0, %v2977_v0 }
 0x1ec   : > { %v2451_v10 = vpop.eup %2450  ;;  %v1892_v46 = vmul.f32 %v2449_v59, %v2869_v14  ;;  %2474 = vrcp.f32 %v1838_v7 }
 0x1ed   : > { %v2453_v11 = vpop.eup %2452  ;;  %v1836_v13 = vadd.f32 1.0, %v2451_v10  ;;  %2476 = vpow2.f32 %v1807_v6  ;;  %v1809_v23 = vmul.f32 1.442695, %v1748_v15 }
 0x1ee   : > { %v2455_v16 = vpop.eup %2454  ;;  %1924 = vst.msk [vmem:[%s2864_s16 + $0x68] sm:$0xff] %vm916_vm2, %v1892_v46  ;;  %v1897_v20 = vmul.f32 %v2453_v11, %v2872_v18 }
 0x1ef   : > { %v2457_v17 = vpop.eup %2456  ;;  %2478 = vrcp.f32 %v1836_v13  ;;  %v1841_v22 = vadd.f32 1.0, %v2455_v16 }
 0x1f0   : > { %v2459_v14 = vpop.eup %2458  ;;  %1929 = vst.msk [vmem:[%s2864_s16 + $0x90] sm:$0xff] %vm916_vm2, %v1897_v20  ;;  %v1895_v21 = vmul.f32 %v2457_v17, %v2880_v30  ;;  %2480 = vpow2.f32 %v1813_v40 }
 0x1f1   : > { %2482 = vrcp.f32 %v1841_v22  ;;  %v1839_v25 = vadd.f32 1.0, %v2459_v14 }
 0x1f2   : > { %v2461_v27 = vpop.eup %2460  ;;  %1927 = vst.msk [vmem:[%s2864_s16 + $0x80] sm:$0xff] %vm916_vm2, %v1895_v21  ;;  %2484 = vpow2.f32 %v1809_v23 }
 0x1f3   : > { %v2463_v18 = vpop.eup %2462  ;;  %v1898_v58 = vmul.f32 %v2461_v27, %v2890_v49  ;;  %2486 = vrcp.f32 %v1839_v25 }
 0x1f4   : > { %v2465_v28 = vpop.eup %2464  ;;  %v1896_v29 = vmul.f32 %v2463_v18, %v2896_v57 }
 0x1f5   : > { %v2467_v33 = vpop.eup %2466  ;;  %1930 = vst.msk [vmem:[%s2864_s16 + $0x98] sm:$0xff] %vm916_vm2, %v1898_v58  ;;  %v1842_v30 = vadd.f32 1.0, %v2465_v28 }
 0x1f6   : > { %v2469_v34 = vpop.eup %2468  ;;  %1928 = vst.msk [vmem:[%s2864_s16 + $0x88] sm:$0xff] %vm916_vm2, %v1896_v29  ;;  %v1840_v35 = vadd.f32 1.0, %v2467_v33 }
 0x1f7   : > { %v2471_v26 = vpop.eup %2470  ;;  %v1901_v37 = vmul.f32 %v2469_v34, %v2904_v8  ;;  %2488 = vrcp.f32 %v1842_v30 }
 0x1f8   : > { %2490 = vrcp.f32 %v1840_v35  ;;  %v1845_v49 = vadd.f32 1.0, %v2471_v26  ;;  %v2473_v41 = vpop.eup %2472 }
 0x1f9   : > { %1933 = vst.msk [vmem:[%s2864_s16 + $0xb0] sm:$0xff] %vm916_vm2, %v1901_v37  ;;  %v2475_v57 = vpop.eup %2474  ;;  %v1899_v43 = vmul.f32 %v2473_v41, %v2911_v52 }
 0x1fa   : > { %2492 = vrcp.f32 %v1845_v49  ;;  %v2477_v31 = vpop.eup %2476  ;;  %v1902_v62 = vmul.f32 %v2475_v57, %v2914_v24 }
 0x1fb   : > { %1931 = vst.msk [vmem:[%s2864_s16 + $0xa0] sm:$0xff] %vm916_vm2, %v1899_v43  ;;  %v1843_v45 = vadd.f32 1.0, %v2477_v31 }
 0x1fc   : > { %v2479_v44 = vpop.eup %2478  ;;  %1934 = vst.msk [vmem:[%s2864_s16 + $0xb8] sm:$0xff] %vm916_vm2, %v1902_v62 }
 0x1fd   : > { %v2481_v8 = vpop.eup %2480  ;;  %v1900_v47 = vmul.f32 %v2479_v44, %v2922_v38  ;;  %2494 = vrcp.f32 %v1843_v45 }
 0x1fe   : > { %v2483_v50 = vpop.eup %2482  ;;  %v1846_v51 = vadd.f32 1.0, %v2481_v8 }
 0x1ff   : > { %v2485_v52 = vpop.eup %2484  ;;  %1932 = vst.msk [vmem:[%s2864_s16 + $0xa8] sm:$0xff] %vm916_vm2, %v1900_v47  ;;  %v1905_v24 = vmul.f32 %v2483_v50, %v2929_v54 }
 0x200   : > { %v2487_v53 = vpop.eup %2486  ;;  %2496 = vrcp.f32 %v1846_v51  ;;  %v1844_v55 = vadd.f32 1.0, %v2485_v52 }
 0x201   : > { %1937 = vst.msk [vmem:[%s2864_s16 + $0xd0] sm:$0xff] %vm916_vm2, %v1905_v24  ;;  %v1903_v56 = vmul.f32 %v2487_v53, %v2932_v63 }
 0x202   : > { %2498 = vrcp.f32 %v1844_v55 }
 0x203   : > { %1935 = vst.msk [vmem:[%s2864_s16 + $0xc0] sm:$0xff] %vm916_vm2, %v1903_v56 }
 0x204   : > { %v2489_v38 = vpop.eup %2488 }
 0x205   : > { %v2491_v36 = vpop.eup %2490  ;;  %v1906_v60 = vmul.f32 %v2489_v38, %v2943_v12 }
 0x206   : > { %v1904_v54 = vmul.f32 %v2491_v36, %v2946_v19 }
 0x207   : > { %v2493_v48 = vpop.eup %2492  ;;  %1938 = vst.msk [vmem:[%s2864_s16 + $0xd8] sm:$0xff] %vm916_vm2, %v1906_v60 }
 0x208   : > { %1936 = vst.msk [vmem:[%s2864_s16 + $0xc8] sm:$0xff] %vm916_vm2, %v1904_v54  ;;  %v1909_v61 = vmul.f32 %v2493_v48, %v2956_v42 }
 0x20a   : > { %1941 = vst.msk [vmem:[%s2864_s16 + $0xf0] sm:$0xff] %vm916_vm2, %v1909_v61  ;;  %v2495_v63 = vpop.eup %2494 }
 0x20b   : > { %v1907_v1 = vmul.f32 %v2495_v63, %v2961_v32 }
 0x20d   : > { %v2497_v39 = vpop.eup %2496  ;;  %1939 = vst.msk [vmem:[%s2864_s16 + $0xe0] sm:$0xff] %vm916_vm2, %v1907_v1 }
 0x20e   : > { %v1910_v2 = vmul.f32 %v2497_v39, %v2969_v5 }
 0x20f   : > { %v2499_v12 = vpop.eup %2498 }
 0x210   : > { %1942 = vst.msk [vmem:[%s2864_s16 + $0xf8] sm:$0xff] %vm916_vm2, %v1910_v2  ;;  %v1908_v19 = vmul.f32 %v2499_v12, %v2977_v0 }
 0x212   : > { %1940 = vst.msk [vmem:[%s2864_s16 + $0xe8] sm:$0xff] %vm916_vm2, %v1908_v19 }
 0x213 PF: > { %s19_s30 = sadd.s32 1, %s2506_s30  }
 0x214   : > { %p16_p4 = scmp.ge.s32.totalorder %s19_s30, 4  }
 0x216   :  { %18 = sbr.rel (!%p16_p4) target bundleno = 1 (0x1), region = 89 }

// kernel: bottleneck_csp_forward.4
= control target key start
LH: loop header
LB: loop body
LE: loop exit
PB: predicated region body
PF: predicated region fallthrough
CT: control target
= control target key end

     0   :  { %s4761_s18 = smov 0   ;;  %s6621_s0 = inlined_call_operand.vmem [shape: bf16[2,16,16,8], index: 0, kind: input, shape index: {}]   ;;  %s6622_s1 = inlined_call_operand.vmem [shape: bf16[8,8], index: 1, kind: input, shape index: {}]   ;;  %s6623_s2 = inlined_call_operand.vmem [shape: f32[1,8], index: 2, kind: input, shape index: {}]   ;;  %s6624_s3 = inlined_call_operand.vmem [shape: bf16[72,8], index: 3, kind: input, shape index: {}]   ;;  %s6625_s4 = inlined_call_operand.vmem [shape: f32[1,8], index: 4, kind: input, shape index: {}]   ;;  %s6626_s5 = inlined_call_operand.vmem [shape: bf16[2,16,16,8], index: 5, kind: output, shape index: {}]  }
   0x1 LB: > { %s3634_s19 = sadd.s32 4294967295, %s4728_s18   ;;  %p3638_p0 = scmp.ge.s32.totalorder %s4728_s18, 1  ;;  %s4728_s18 = sphi %s4761_s18, %s15_s18  }
   0x2   : > { %p187_p1 = scmp.lt.s32.totalorder %s4728_s18, 3 }
   0x4   : > { %p188_p2 = pnand %p3638_p0, %p187_p1 }
   0x6   : > { %191 = sbr.rel (%p188_p2) target bundleno = 835 (0x343), region = 40 }
   0xb   : > { %v258_v0 = vld [vmem:[%s6622_s1] sm:$0xf]  ;;  %vm395_vm0 = vcmask 1043456   ;;  %p215_p3 = scmp.lt.s32.totalorder %s3634_s19, 1  ;;  %vm346_vm1 = vcmask 64512   ;;  %v4730_v18 = vmov 0.0  }
   0xc   : > { %4399 = vmatprep.subr.msk.bf16.mxu0 %vm395_vm0, %v258_v0  ;;  %v397_v1 = vsel %vm395_vm0, %v258_v0, 0  ;;  %759 = vst.msk [vmem:[#allocation2 + $0x30] sm:$0xff] %vm346_vm1, %v4730_v18  ;;  %760 = vst.msk [vmem:[#allocation2 + $0x38] sm:$0xff] %vm346_vm1, %v4730_v18  ;;  %vm754_vm2 = vcmask 58368   ;;  %v917_v19 = vld [vmem:[%s6624_s3] sm:$0xf] }
   0xd   : > { %4060 = vmatpush3.bf16.msra.mxu0 %v397_v1  ;;  %s6741_s19 = smov (!%p215_p3, %s3634_s19), 1  ;;  %752 = vst.msk [vmem:[#allocation2] sm:$0xff] %vm346_vm1, %v4730_v18  ;;  %753 = vst.msk [vmem:[#allocation2 + $0x8] sm:$0xff] %vm346_vm1, %v4730_v18  ;;  %4400 = vmatprep.subr.msk.bf16.mxu1 %vm395_vm0, %v917_v19  ;;  %v967_v20 = vsel %vm395_vm0, %v917_v19, 0  ;;  %v1355_v30 = vld [vmem:[%s6624_s3 + $0x4] sm:$0xf] }
   0xe   : > { %s3855_s22 = sshll.u32 %s6741_s19, 7  ;;  %756 = vst.msk [vmem:[#allocation2 + $0x18] sm:$0xff] %vm346_vm1, %v4730_v18  ;;  %757 = vst.msk [vmem:[#allocation2 + $0x20] sm:$0xff] %vm346_vm1, %v4730_v18  ;;  %4094 = vmatpush3.bf16.msra.mxu1 %v967_v20  ;;  %4401 = vmatprep.subr.msk.bf16.mxu0 %vm395_vm0, %v1355_v30  ;;  %v1405_v31 = vsel %vm395_vm0, %v1355_v30, 0  ;;  %vm1178_vm3 = vsmask.f32 7424 }
   0xf   : > { %s4782_s25 = scalar_lea.vmem %s6621_s0, %s3855_s22  ;;  %762 = vst.msk [vmem:[#allocation2 + $0x48] sm:$0xff] %vm346_vm1, %v4730_v18  ;;  %763 = vst.msk [vmem:[#allocation2 + $0x50] sm:$0xff] %vm346_vm1, %v4730_v18  ;;  %v4894_v35 = vld [vmem:[%s6624_s3 + $0x8] sm:$0xf]  ;;  %v4901_v36 = vld [vmem:[%s6624_s3 + $0xc] sm:$0xf]  ;;  %s6430_s29 = scalar_lea.vmem %s6626_s5, %s3855_s22 }
  0x10   : > { %v226_v2 = vld [vmem:[%s4782_s25] sm:$0xff]   ;;  %v228_v3 = vld [vmem:[%s4782_s25 + $0x8] sm:$0xff]   ;;  %v230_v4 = vld [vmem:[%s4782_s25 + $0x10] sm:$0xff]   ;;  %765 = vst.msk [vmem:[#allocation2 + $0x60] sm:$0xff] %vm346_vm1, %v4730_v18  ;;  %4402 = vmatprep.subr.msk.bf16.mxu1 %vm395_vm0, %v4894_v35  ;;  %vm1632_vm4 = vcmask 1046528   ;;  %vm3546_vm5 = vcmask 60416  }
  0x11   : > { %4061 = vmatprep.mubr.msk.bf16.mxu0 %vm346_vm1, %v226_v2  ;;  %v232_v5 = vld [vmem:[%s4782_s25 + $0x18] sm:$0xff]   ;;  %v234_v6 = vld [vmem:[%s4782_s25 + $0x20] sm:$0xff]   ;;  %v236_v7 = vld [vmem:[%s4782_s25 + $0x28] sm:$0xff]   ;;  %766 = vst.msk [vmem:[#allocation2 + $0x68] sm:$0xff] %vm346_vm1, %v4730_v18 }
  0x12   : > { %4062 = vmatmul.mubr.msk.bf16.vlgmr.msra.gmra.mxu0 %vm346_vm1, %v228_v3  ;;  %v238_v8 = vld [vmem:[%s4782_s25 + $0x30] sm:$0xff]   ;;  %v240_v9 = vld [vmem:[%s4782_s25 + $0x38] sm:$0xff]   ;;  %v242_v10 = vld [vmem:[%s4782_s25 + $0x40] sm:$0xff]   ;;  %768 = vst.msk [vmem:[#allocation2 + $0x78] sm:$0xff] %vm346_vm1, %v4730_v18 }
  0x13   : > { %4065 = vmatprep.mubr.msk.bf16.mxu0 %vm346_vm1, %v230_v4  ;;  %v244_v11 = vld [vmem:[%s4782_s25 + $0x48] sm:$0xff]   ;;  %v246_v12 = vld [vmem:[%s4782_s25 + $0x50] sm:$0xff]   ;;  %v248_v13 = vld [vmem:[%s4782_s25 + $0x58] sm:$0xff]   ;;  %769 = vst.msk [vmem:[#allocation2 + $0x80] sm:$0xff] %vm346_vm1, %v4730_v18  ;;  %4128 = vmatpush3.bf16.msra.mxu0 %v1405_v31 }
  0x14   : > { %v250_v14 = vld [vmem:[%s4782_s25 + $0x60] sm:$0xff]   ;;  %v252_v15 = vld [vmem:[%s4782_s25 + $0x68] sm:$0xff]   ;;  %v254_v16 = vld [vmem:[%s4782_s25 + $0x70] sm:$0xff]   ;;  %771 = vst.msk [vmem:[#allocation2 + $0x90] sm:$0xff] %vm346_vm1, %v4730_v18  ;;  %4403 = vmatprep.subr.msk.bf16.mxu0 %vm395_vm0, %v4901_v36 }
  0x15   : > { %v256_v17 = vld [vmem:[%s4782_s25 + $0x78] sm:$0xff]   ;;  %772 = vst.msk [vmem:[#allocation2 + $0x98] sm:$0xff] %vm346_vm1, %v4730_v18  ;;  %774 = vst.msk [vmem:[#allocation2 + $0xa8] sm:$0xff] %vm346_vm1, %v4730_v18  ;;  %v840_v21 = vld [vmem:[#allocation2] sm:$0xff] }
  0x16   : > { %775 = vst.msk [vmem:[#allocation2 + $0xb0] sm:$0xff] %vm346_vm1, %v4730_v18  ;;  %777 = vst.msk [vmem:[#allocation2 + $0xc0] sm:$0xff] %vm346_vm1, %v4730_v18  ;;  %v841_v22 = vld [vmem:[#allocation2 + $0x8] sm:$0xff]  ;;  %v4908_v37 = vld [vmem:[%s6623_s2] ss:$0 sm:$0xff] }
  0x17   : > { %778 = vst.msk [vmem:[#allocation2 + $0xc8] sm:$0xff] %vm346_vm1, %v4730_v18  ;;  %780 = vst.msk [vmem:[#allocation2 + $0xd8] sm:$0xff] %vm346_vm1, %v4730_v18  ;;  %v4875_v23 = vpack.c.bf16 %v841_v22, %v840_v21 }
  0x18   : > { %781 = vst.msk [vmem:[#allocation2 + $0xe0] sm:$0xff] %vm346_vm1, %v4730_v18  ;;  %783 = vst.msk [vmem:[#allocation2 + $0xf0] sm:$0xff] %vm346_vm1, %v4730_v18 }
  0x19   : > { %784 = vst.msk [vmem:[#allocation2 + $0xf8] sm:$0xff] %vm346_vm1, %v4730_v18  ;;  %786 = vst.msk [vmem:[#allocation2 + $0x108] sm:$0xff] %vm346_vm1, %v4730_v18  ;;  %4095 = vmatprep.mubr.msk.bf16.mxu1 %vm346_vm1, %v4875_v23  ;;  %v1181_v26 = vshll.u32 %v4875_v23, 16  ;;  %v1179_v27 = vshrl.u32 %v4875_v23, 16 }
  0x1a   : > { %4066 = vmatmul.mubr.msk.bf16.gmra.mxu0 %vm346_vm1, %v232_v5  ;;  %787 = vst.msk [vmem:[#allocation2 + $0x110] sm:$0xff] %vm346_vm1, %v4730_v18  ;;  %789 = vst.msk [vmem:[#allocation2 + $0x120] sm:$0xff] %vm346_vm1, %v4730_v18 }
  0x1b   : > { %4069 = vmatprep.mubr.msk.bf16.mxu0 %vm346_vm1, %v234_v6  ;;  %790 = vst.msk [vmem:[#allocation2 + $0x128] sm:$0xff] %vm346_vm1, %v4730_v18  ;;  %792 = vst.msk [vmem:[#allocation2 + $0x138] sm:$0xff] %vm346_vm1, %v4730_v18  ;;  %v1183_v28 = vrot.slane %v1181_v26, 1 }
  0x1c   : > { %793 = vst.msk [vmem:[#allocation2 + $0x140] sm:$0xff] %vm346_vm1, %v4730_v18  ;;  %795 = vst.msk [vmem:[#allocation2 + $0x150] sm:$0xff] %vm346_vm1, %v4730_v18 }
  0x1d   : > { %796 = vst.msk [vmem:[#allocation2 + $0x158] sm:$0xff] %vm346_vm1, %v4730_v18  ;;  %798 = vst.msk [vmem:[#allocation2 + $0x168] sm:$0xff] %vm346_vm1, %v4730_v18  ;;  %v1184_v32 = vor.u32 %v1183_v28, %v1179_v27 }
  0x1e   : > { %799 = vst.msk [vmem:[#allocation2 + $0x170] sm:$0xff] %vm346_vm1, %v4730_v18  ;;  %801 = vst.msk [vmem:[#allocation2 + $0x180] sm:$0xff] %vm346_vm1, %v4730_v18 }
  0x1f   : > { %802 = vst.msk [vmem:[#allocation2 + $0x188] sm:$0xff] %vm346_vm1, %v4730_v18  ;;  %804 = vst.msk [vmem:[#allocation2 + $0x198] sm:$0xff] %vm346_vm1, %v4730_v18 }
  0x20   : > { %805 = vst.msk [vmem:[#allocation2 + $0x1a0] sm:$0xff] %vm346_vm1, %v4730_v18 }
  0x21   : > { %761 = vst.msk [vmem:[#allocation2 + $0x40] sm:$0x3] %vm754_vm2, %v4730_v18  ;;  %755 = vst.msk [vmem:[#allocation2 + $0x10] sm:$0x3] %vm754_vm2, %v4730_v18 }
  0x22   : > { %4070 = vmatmul.mubr.msk.bf16.gmra.mxu0 %vm346_vm1, %v236_v7  ;;  %758 = vst.msk [vmem:[#allocation2 + $0x28] sm:$0x3] %vm754_vm2, %v4730_v18  ;;  %764 = vst.msk [vmem:[#allocation2 + $0x58] sm:$0x3] %vm754_vm2, %v4730_v18 }
  0x23   : > { %4073 = vmatprep.mubr.msk.bf16.mxu0 %vm346_vm1, %v238_v8  ;;  %767 = vst.msk [vmem:[#allocation2 + $0x70] sm:$0x3] %vm754_vm2, %v4730_v18  ;;  %770 = vst.msk [vmem:[#allocation2 + $0x88] sm:$0x3] %vm754_vm2, %v4730_v18 }
  0x24   : > { %773 = vst.msk [vmem:[#allocation2 + $0xa0] sm:$0x3] %vm754_vm2, %v4730_v18  ;;  %776 = vst.msk [vmem:[#allocation2 + $0xb8] sm:$0x3] %vm754_vm2, %v4730_v18 }
  0x25   : > { %779 = vst.msk [vmem:[#allocation2 + $0xd0] sm:$0x3] %vm754_vm2, %v4730_v18  ;;  %782 = vst.msk [vmem:[#allocation2 + $0xe8] sm:$0x3] %vm754_vm2, %v4730_v18 }
  0x26   : > { %785 = vst.msk [vmem:[#allocation2 + $0x100] sm:$0x3] %vm754_vm2, %v4730_v18  ;;  %788 = vst.msk [vmem:[#allocation2 + $0x118] sm:$0x3] %vm754_vm2, %v4730_v18 }
  0x27   : > { %791 = vst.msk [vmem:[#allocation2 + $0x130] sm:$0x3] %vm754_vm2, %v4730_v18  ;;  %794 = vst.msk [vmem:[#allocation2 + $0x148] sm:$0x3] %vm754_vm2, %v4730_v18 }
  0x28   : > { %797 = vst.msk [vmem:[#allocation2 + $0x160] sm:$0x3] %vm754_vm2, %v4730_v18  ;;  %800 = vst.msk [vmem:[#allocation2 + $0x178] sm:$0x3] %vm754_vm2, %v4730_v18  ;;  %v842_v24 = vld [vmem:[#allocation2 + $0x10] sm:$0x3] }
  0x29   : > { %803 = vst.msk [vmem:[#allocation2 + $0x190] sm:$0x3] %vm754_vm2, %v4730_v18  ;;  %806 = vst.msk [vmem:[#allocation2 + $0x1a8] sm:$0x3] %vm754_vm2, %v4730_v18  ;;  %v4879_v25 = vpack.c.bf16 %v842_v24, %v842_v24 }
  0x2a   : > { %4074 = vmatmul.mubr.msk.bf16.gmra.mxu0 %vm346_vm1, %v240_v9 }
  0x2b   : > { %4077 = vmatprep.mubr.msk.bf16.mxu0 %vm346_vm1, %v242_v10  ;;  %v1186_v29 = vshll.u32 %v4879_v25, 16 }
  0x2d   : > { %v1188_v33 = vrot.slane %v1186_v29, 1 }
  0x2f   : > { %v1189_v34 = vsel %vm1178_vm3, %v1184_v32, %v1188_v33 }
  0x32   : > { %4078 = vmatmul.mubr.msk.bf16.gmra.mxu0 %vm346_vm1, %v244_v11 }
  0x33   : > { %4081 = vmatprep.mubr.msk.bf16.mxu0 %vm346_vm1, %v246_v12 }
  0x3a   : > { %4082 = vmatmul.mubr.msk.bf16.gmra.mxu0 %vm346_vm1, %v248_v13 }
  0x3b   : > { %4085 = vmatprep.mubr.msk.bf16.mxu0 %vm346_vm1, %v250_v14 }
  0x42   : > { %4086 = vmatmul.mubr.msk.bf16.gmra.mxu0 %vm346_vm1, %v252_v15 }
  0x43   : > { %4089 = vmatprep.mubr.msk.bf16.mxu0 %vm346_vm1, %v254_v16 }
  0x4a   : > { %4090 = vmatmul.mubr.msk.bf16.gmra.mxu0 %vm346_vm1, %v256_v17 }
  0x4b   : > { %4129 = vmatprep.mubr.msk.bf16.mxu0 %vm346_vm1, %v1189_v34 }
  0xd2   : > { %v4063_v38 = vpop.f32.mrf.mxu0 }
  0xd3   : > { %v4911_v39 = vadd.f32 %v4063_v38, %v4908_v37 }
  0xd4   : > { %v433_v40 = vpop.f32.mrf.mxu0 }
  0xd5   : > { %v562_v41 = vsub.f32 0.0, %v4911_v39  ;;  %v4915_v42 = vadd.f32 %v4908_v37, %v433_v40 }
  0xd6   : > { %v4064_v43 = vpop.f32.mrf.mxu0 }
  0xd7   : > { %v596_v44 = vmul.f32 1.442695, %v562_v41  ;;  %v560_v45 = vsub.f32 0.0, %v4915_v42  ;;  %v4919_v46 = vadd.f32 %v4064_v43, %v4908_v37 }
  0xd8   : > { %v436_v47 = vpop.f32.mrf.mxu0 }
  0xd9   : > { %4450 = vpow2.f32 %v596_v44  ;;  %v592_v48 = vmul.f32 1.442695, %v560_v45  ;;  %v563_v49 = vsub.f32 0.0, %v4919_v46  ;;  %v4923_v50 = vadd.f32 %v4908_v37, %v436_v47 }
  0xda   : > { %v4067_v51 = vpop.f32.mrf.mxu0 }
  0xdb   : > { %4452 = vpow2.f32 %v592_v48  ;;  %v598_v52 = vmul.f32 1.442695, %v563_v49  ;;  %v561_v53 = vsub.f32 0.0, %v4923_v50  ;;  %v4927_v54 = vadd.f32 %v4067_v51, %v4908_v37 }
  0xdc   : > { %v449_v55 = vpop.f32.mrf.mxu0 }
  0xdd   : > { %4454 = vpow2.f32 %v598_v52  ;;  %v594_v56 = vmul.f32 1.442695, %v561_v53  ;;  %v566_v57 = vsub.f32 0.0, %v4927_v54  ;;  %v4931_v58 = vadd.f32 %v4908_v37, %v449_v55 }
  0xde   : > { %v4068_v59 = vpop.f32.mrf.mxu0 }
  0xdf   : > { %4456 = vpow2.f32 %v594_v56  ;;  %v604_v60 = vmul.f32 1.442695, %v566_v57  ;;  %v564_v61 = vsub.f32 0.0, %v4931_v58  ;;  %v4935_v62 = vadd.f32 %v4068_v59, %v4908_v37 }
  0xe0   : > { %v452_v63 = vpop.f32.mrf.mxu0 }
  0xe1   : > { %4458 = vpow2.f32 %v604_v60  ;;  %v600_v0 = vmul.f32 1.442695, %v564_v61  ;;  %v567_v1 = vsub.f32 0.0, %v4935_v62  ;;  %v4939_v2 = vadd.f32 %v4908_v37, %v452_v63 }
  0xe2   : > { %v4071_v3 = vpop.f32.mrf.mxu0 }
  0xe3   : > { %4460 = vpow2.f32 %v600_v0  ;;  %v606_v4 = vmul.f32 1.442695, %v567_v1  ;;  %v565_v5 = vsub.f32 0.0, %v4939_v2  ;;  %v4943_v6 = vadd.f32 %v4071_v3, %v4908_v37 }
  0xe4   : > { %v465_v7 = vpop.f32.mrf.mxu0 }
  0xe5   : > { %4462 = vpow2.f32 %v606_v4  ;;  %v602_v8 = vmul.f32 1.442695, %v565_v5  ;;  %v570_v9 = vsub.f32 0.0, %v4943_v6  ;;  %v4947_v10 = vadd.f32 %v4908_v37, %v465_v7 }
  0xe6   : > { %v4451_v11 = vpop.eup %4450  ;;  %v4072_v12 = vpop.f32.mrf.mxu0 }
  0xe7   : > { %v658_v13 = vadd.f32 1.0, %v4451_v11  ;;  %4464 = vpow2.f32 %v602_v8  ;;  %v612_v14 = vmul.f32 1.442695, %v570_v9  ;;  %v568_v15 = vsub.f32 0.0, %v4947_v10 }
  0xe8   : > { %v4453_v16 = vpop.eup %4452  ;;  %v4951_v17 = vadd.f32 %v4072_v12, %v4908_v37  ;;  %v468_v18 = vpop.f32.mrf.mxu0 }
  0xe9   : > { %4466 = vrcp.f32 %v658_v13  ;;  %v656_v19 = vadd.f32 1.0, %v4453_v16  ;;  %v608_v20 = vmul.f32 1.442695, %v568_v15  ;;  %v4954_v21 = vadd.f32 %v4908_v37, %v468_v18 }
  0xea   : > { %v4455_v22 = vpop.eup %4454  ;;  %4468 = vpow2.f32 %v612_v14  ;;  %v571_v24 = vsub.f32 0.0, %v4951_v17  ;;  %v4075_v26 = vpop.f32.mrf.mxu0 }
  0xeb   : > { %4470 = vrcp.f32 %v656_v19  ;;  %v659_v27 = vadd.f32 1.0, %v4455_v22  ;;  %v569_v28 = vsub.f32 0.0, %v4954_v21  ;;  %v4959_v29 = vadd.f32 %v4075_v26, %v4908_v37 }
  0xec   : > { %v4457_v30 = vpop.eup %4456  ;;  %4472 = vpow2.f32 %v608_v20  ;;  %v614_v31 = vmul.f32 1.442695, %v571_v24  ;;  %v481_v32 = vpop.f32.mrf.mxu0 }
  0xed   : > { %4474 = vrcp.f32 %v659_v27  ;;  %v657_v33 = vadd.f32 1.0, %v4457_v30  ;;  %v610_v34 = vmul.f32 1.442695, %v569_v28  ;;  %v574_v38 = vsub.f32 0.0, %v4959_v29 }
  0xee   : > { %v4459_v40 = vpop.eup %4458  ;;  %4476 = vpow2.f32 %v614_v31  ;;  %v4963_v41 = vadd.f32 %v4908_v37, %v481_v32  ;;  %v4076_v43 = vpop.f32.mrf.mxu0 }
  0xef   : > { %4478 = vrcp.f32 %v657_v33  ;;  %v662_v44 = vadd.f32 1.0, %v4459_v40  ;;  %v620_v45 = vmul.f32 1.442695, %v574_v38  ;;  %v4966_v47 = vadd.f32 %v4076_v43, %v4908_v37 }
  0xf0   : > { %v4461_v48 = vpop.eup %4460  ;;  %4480 = vpow2.f32 %v610_v34  ;;  %v572_v49 = vsub.f32 0.0, %v4963_v41  ;;  %v484_v51 = vpop.f32.mrf.mxu0 }
  0xf1   : > { %4482 = vrcp.f32 %v662_v44  ;;  %v660_v52 = vadd.f32 1.0, %v4461_v48  ;;  %v575_v53 = vsub.f32 0.0, %v4966_v47  ;;  %v4971_v55 = vadd.f32 %v4908_v37, %v484_v51 }
  0xf2   : > { %v4463_v56 = vpop.eup %4462  ;;  %4484 = vpow2.f32 %v620_v45  ;;  %v616_v57 = vmul.f32 1.442695, %v572_v49  ;;  %v4079_v59 = vpop.f32.mrf.mxu0 }
  0xf3   : > { %4486 = vrcp.f32 %v660_v52  ;;  %v663_v60 = vadd.f32 1.0, %v4463_v56  ;;  %v622_v61 = vmul.f32 1.442695, %v575_v53  ;;  %v573_v63 = vsub.f32 0.0, %v4971_v55 }
  0xf4   : > { %v4465_v0 = vpop.eup %4464  ;;  %4488 = vpow2.f32 %v616_v57  ;;  %v4975_v1 = vadd.f32 %v4079_v59, %v4908_v37  ;;  %v497_v3 = vpop.f32.mrf.mxu0 }
  0xf5   : > { %4490 = vrcp.f32 %v663_v60  ;;  %v661_v4 = vadd.f32 1.0, %v4465_v0  ;;  %v618_v5 = vmul.f32 1.442695, %v573_v63  ;;  %v4978_v7 = vadd.f32 %v4908_v37, %v497_v3 }
  0xf6   : > { %v4467_v8 = vpop.eup %4466  ;;  %4492 = vpow2.f32 %v622_v61  ;;  %v578_v9 = vsub.f32 0.0, %v4975_v1  ;;  %v4080_v11 = vpop.f32.mrf.mxu0 }
  0xf7   : > { %v4469_v12 = vpop.eup %4468  ;;  %v722_v13 = vmul.f32 %v4467_v8, %v4911_v39  ;;  %4494 = vrcp.f32 %v661_v4  ;;  %v576_v14 = vsub.f32 0.0, %v4978_v7  ;;  %v4984_v15 = vadd.f32 %v4080_v11, %v4908_v37 }
  0xf8   : > { %v4471_v16 = vpop.eup %4470  ;;  %v666_v18 = vadd.f32 1.0, %v4469_v12  ;;  %4496 = vpow2.f32 %v618_v5  ;;  %v628_v19 = vmul.f32 1.442695, %v578_v9  ;;  %v500_v20 = vpop.f32.mrf.mxu0 }
  0xf9   : > { %v4473_v22 = vpop.eup %4472  ;;  %810 = vst.msk [vmem:[#allocation2 + $0x31] sm:$0xff] %vm346_vm1, %v722_v13  ;;  %v720_v24 = vmul.f32 %v4471_v16, %v4915_v42  ;;  %v624_v26 = vmul.f32 1.442695, %v576_v14  ;;  %v579_v27 = vsub.f32 0.0, %v4984_v15  ;;  %v4990_v39 = vadd.f32 %v4908_v37, %v500_v20 }
  0xfa   : > { %v4475_v28 = vpop.eup %4474  ;;  %4498 = vrcp.f32 %v666_v18  ;;  %v664_v30 = vadd.f32 1.0, %v4473_v22  ;;  %v4083_v31 = vpop.f32.mrf.mxu0  ;;  %v1731_v14 = vsel %vm395_vm0, %v4894_v35, 0  ;;  %v5026_v35 = vsel %vm395_vm0, %v4901_v36, 0 }
  0xfb   : > { %v4477_v32 = vpop.eup %4476  ;;  %808 = vst.msk [vmem:[#allocation2 + $0x19] sm:$0xff] %vm346_vm1, %v720_v24  ;;  %v723_v33 = vmul.f32 %v4475_v28, %v4919_v46  ;;  %4500 = vpow2.f32 %v628_v19  ;;  %v630_v34 = vmul.f32 1.442695, %v579_v27  ;;  %v577_v38 = vsub.f32 0.0, %v4990_v39 }
  0xfc   : > { %v4479_v42 = vpop.eup %4478  ;;  %4502 = vrcp.f32 %v664_v30  ;;  %v667_v40 = vadd.f32 1.0, %v4477_v32  ;;  %v4996_v43 = vadd.f32 %v4083_v31, %v4908_v37  ;;  %v513_v44 = vpop.f32.mrf.mxu0 }
  0xfd   : > { %v4481_v45 = vpop.eup %4480  ;;  %811 = vst.msk [vmem:[#allocation2 + $0x39] sm:$0xff] %vm346_vm1, %v723_v33  ;;  %v721_v48 = vmul.f32 %v4479_v42, %v4923_v50  ;;  %4504 = vpow2.f32 %v624_v26  ;;  %v626_v49 = vmul.f32 1.442695, %v577_v38  ;;  %v5001_v46 = vadd.f32 %v4908_v37, %v513_v44 }
  0xfe   : > { %v4483_v51 = vpop.eup %4482  ;;  %4506 = vrcp.f32 %v667_v40  ;;  %v665_v52 = vadd.f32 1.0, %v4481_v45  ;;  %v582_v53 = vsub.f32 0.0, %v4996_v43  ;;  %v4084_v56 = vpop.f32.mrf.mxu0 }
  0xff   : > { %v4485_v57 = vpop.eup %4484  ;;  %809 = vst.msk [vmem:[#allocation2 + $0x21] sm:$0xff] %vm346_vm1, %v721_v48  ;;  %v726_v59 = vmul.f32 %v4483_v51, %v4927_v54  ;;  %4508 = vpow2.f32 %v630_v34  ;;  %v580_v60 = vsub.f32 0.0, %v5001_v46  ;;  %v5008_v50 = vadd.f32 %v4084_v56, %v4908_v37 }
 0x100   : > { %v4487_v61 = vpop.eup %4486  ;;  %4510 = vrcp.f32 %v665_v52  ;;  %v670_v63 = vadd.f32 1.0, %v4485_v57  ;;  %v636_v0 = vmul.f32 1.442695, %v582_v53  ;;  %v516_v3 = vpop.f32.mrf.mxu0  ;;  %v846_v32 = vld [vmem:[#allocation2 + $0x30] sm:$0xff] }
 0x101   : > { %v4489_v4 = vpop.eup %4488  ;;  %814 = vst.msk [vmem:[#allocation2 + $0x61] sm:$0xff] %vm346_vm1, %v726_v59  ;;  %v724_v5 = vmul.f32 %v4487_v61, %v4931_v58  ;;  %4512 = vpow2.f32 %v626_v49  ;;  %v632_v8 = vmul.f32 1.442695, %v580_v60  ;;  %v583_v54 = vsub.f32 0.0, %v5008_v50 }
 0x102   : > { %v4491_v9 = vpop.eup %4490  ;;  %4514 = vrcp.f32 %v670_v63  ;;  %v668_v11 = vadd.f32 1.0, %v4489_v4  ;;  %v5014_v12 = vadd.f32 %v4908_v37, %v516_v3  ;;  %v4087_v13 = vpop.f32.mrf.mxu0  ;;  %v843_v49 = vld [vmem:[#allocation2 + $0x18] sm:$0xff] }
 0x103   : > { %v4493_v16 = vpop.eup %4492  ;;  %812 = vst.msk [vmem:[#allocation2 + $0x49] sm:$0xff] %vm346_vm1, %v724_v5  ;;  %v727_v18 = vmul.f32 %v4491_v9, %v4935_v62  ;;  %4516 = vpow2.f32 %v636_v0  ;;  %v638_v58 = vmul.f32 1.442695, %v583_v54  ;;  %v5021_v19 = vadd.f32 %v4087_v13, %v4908_v37  ;;  %v5050_v0 = vld [vmem:[%s6624_s3 + $0x10] sm:$0xf] }
 0x104   : > { %v4495_v20 = vpop.eup %4494  ;;  %4518 = vrcp.f32 %v668_v11  ;;  %v671_v22 = vadd.f32 1.0, %v4493_v16  ;;  %v581_v24 = vsub.f32 0.0, %v5014_v12  ;;  %v529_v26 = vpop.f32.mrf.mxu0  ;;  %v847_v27 = vld [vmem:[#allocation2 + $0x38] sm:$0xff] }
 0x105   : > { %v4497_v28 = vpop.eup %4496  ;;  %815 = vst.msk [vmem:[#allocation2 + $0x69] sm:$0xff] %vm346_vm1, %v727_v18  ;;  %v725_v62 = vmul.f32 %v4495_v20, %v4939_v2  ;;  %4520 = vpow2.f32 %v632_v8  ;;  %v586_v30 = vsub.f32 0.0, %v5021_v19  ;;  %v5032_v31 = vadd.f32 %v4908_v37, %v529_v26 }
 0x106   : > { %4522 = vrcp.f32 %v671_v22  ;;  %v669_v33 = vadd.f32 1.0, %v4497_v28  ;;  %v634_v34 = vmul.f32 1.442695, %v581_v24  ;;  %v4088_v38 = vpop.f32.mrf.mxu0  ;;  %v844_v42 = vld [vmem:[#allocation2 + $0x20] sm:$0xff]  ;;  %v5034_v40 = vpack.c.bf16 %v847_v27, %v846_v32  ;;  %v845_v36 = vld [vmem:[#allocation2 + $0x28] sm:$0x3] }
 0x107   : > { %v4499_v44 = vpop.eup %4498  ;;  %813 = vst.msk [vmem:[#allocation2 + $0x51] sm:$0xff] %vm346_vm1, %v725_v62  ;;  %4524 = vpow2.f32 %v638_v58  ;;  %v644_v2 = vmul.f32 1.442695, %v586_v30  ;;  %v584_v45 = vsub.f32 0.0, %v5032_v31  ;;  %v5039_v48 = vadd.f32 %v4088_v38, %v4908_v37 }
 0x108   : > { %v4501_v51 = vpop.eup %4500  ;;  %v730_v52 = vmul.f32 %v4499_v44, %v4943_v6  ;;  %4526 = vrcp.f32 %v669_v33  ;;  %v532_v53 = vpop.f32.mrf.mxu0  ;;  %v5042_v56 = vpack.c.bf16 %v844_v42, %v843_v49  ;;  %v5044_v57 = vpack.c.bf16 %v845_v36, %v845_v36 }
 0x109   : > { %v4503_v59 = vpop.eup %4502  ;;  %v674_v60 = vadd.f32 1.0, %v4501_v51  ;;  %4528 = vpow2.f32 %v634_v34  ;;  %v640_v61 = vmul.f32 1.442695, %v584_v45  ;;  %v587_v63 = vsub.f32 0.0, %v5039_v48 }
 0x10a   : > { %v4505_v3 = vpop.eup %4504  ;;  %818 = vst.msk [vmem:[#allocation2 + $0x91] sm:$0xff] %vm346_vm1, %v730_v52  ;;  %v728_v6 = vmul.f32 %v4503_v59, %v4947_v10  ;;  %4530 = vpow2.f32 %v644_v2  ;;  %v5055_v4 = vadd.f32 %v4908_v37, %v532_v53  ;;  %4096 = vmatmul.mubr.msk.bf16.vlgmr.msra.gmra.mxu1 %vm346_vm1, %v5042_v56  ;;  %v4091_v5 = vpop.f32.mrf.mxu0  ;;  %v1190_v8 = vshrl.u32 %v5042_v56, 16 }
 0x10b   : > { %v4507_v54 = vpop.eup %4506  ;;  %4532 = vrcp.f32 %v674_v60  ;;  %v672_v9 = vadd.f32 1.0, %v4505_v3  ;;  %v646_v11 = vmul.f32 1.442695, %v587_v63  ;;  %4162 = vmatpush3.bf16.msra.mxu1 %v1731_v14  ;;  %v5061_v13 = vadd.f32 %v4091_v5, %v4908_v37  ;;  %4099 = vmatprep.mubr.msk.bf16.mxu1 %vm346_vm1, %v5034_v40  ;;  %v849_v63 = vld [vmem:[#allocation2 + $0x48] sm:$0xff]  ;;  %v848_v3 = vld [vmem:[#allocation2 + $0x40] sm:$0x3] }
 0x10c   : > { %v4509_v10 = vpop.eup %4508  ;;  %816 = vst.msk [vmem:[#allocation2 + $0x79] sm:$0xff] %vm346_vm1, %v728_v6  ;;  %v731_v16 = vmul.f32 %v4507_v54, %v4951_v17  ;;  %4534 = vpow2.f32 %v640_v61  ;;  %v585_v18 = vsub.f32 0.0, %v5055_v4  ;;  %v545_v58 = vpop.f32.mrf.mxu0  ;;  %v1192_v20 = vshll.u32 %v5042_v56, 16  ;;  %4404 = vmatprep.subr.msk.bf16.mxu1 %vm395_vm0, %v5050_v0 }
 0x10d   : > { %v4511_v14 = vpop.eup %4510  ;;  %4536 = vrcp.f32 %v672_v9  ;;  %v675_v22 = vadd.f32 1.0, %v4509_v10  ;;  %v590_v24 = vsub.f32 0.0, %v5061_v13  ;;  %v5073_v26 = vadd.f32 %v4908_v37, %v545_v58 }
 0x10e   : > { %v4513_v27 = vpop.eup %4512  ;;  %819 = vst.msk [vmem:[#allocation2 + $0x99] sm:$0xff] %vm346_vm1, %v731_v16  ;;  %v729_v17 = vmul.f32 %v4511_v14, %v4954_v21  ;;  %4538 = vpow2.f32 %v646_v11  ;;  %v642_v28 = vmul.f32 1.442695, %v585_v18  ;;  %v4092_v62 = vpop.f32.mrf.mxu0  ;;  %v1194_v30 = vrot.slane %v1192_v20, 1  ;;  %v850_v45 = vld [vmem:[#allocation2 + $0x50] sm:$0xff]  ;;  %v853_v20 = vld [vmem:[#allocation2 + $0x68] sm:$0xff] }
 0x10f   : > { %v4515_v32 = vpop.eup %4514  ;;  %4540 = vrcp.f32 %v675_v22  ;;  %v673_v33 = vadd.f32 1.0, %v4513_v27  ;;  %v652_v34 = vmul.f32 1.442695, %v590_v24  ;;  %v588_v38 = vsub.f32 0.0, %v5073_v26  ;;  %v851_v14 = vld [vmem:[#allocation2 + $0x58] sm:$0x3] }
 0x110   : > { %v4517_v42 = vpop.eup %4516  ;;  %817 = vst.msk [vmem:[#allocation2 + $0x81] sm:$0xff] %vm346_vm1, %v729_v17  ;;  %v734_v36 = vmul.f32 %v4515_v32, %v4959_v29  ;;  %4542 = vpow2.f32 %v642_v28  ;;  %v5081_v44 = vadd.f32 %v4092_v62, %v4908_v37  ;;  %v548_v21 = vpop.f32.mrf.mxu0  ;;  %v1195_v2 = vor.u32 %v1194_v30, %v1190_v8  ;;  %v5108_v17 = vld [vmem:[%s6624_s3 + $0x14] sm:$0xf]  ;;  %v852_v32 = vld [vmem:[#allocation2 + $0x60] sm:$0xff] }
 0x111   : > { %v4519_v49 = vpop.eup %4518  ;;  %4544 = vrcp.f32 %v673_v33  ;;  %v678_v51 = vadd.f32 1.0, %v4517_v42  ;;  %v648_v52 = vmul.f32 1.442695, %v588_v38  ;;  %v5084_v53 = vadd.f32 %v4908_v37, %v548_v21 }
 0x112   : > { %v4521_v59 = vpop.eup %4520  ;;  %822 = vst.msk [vmem:[#allocation2 + $0xc1] sm:$0xff] %vm346_vm1, %v734_v36  ;;  %v732_v60 = vmul.f32 %v4519_v49, %v4963_v41  ;;  %4546 = vpow2.f32 %v652_v34  ;;  %v591_v29 = vsub.f32 0.0, %v5081_v44  ;;  %v1197_v61 = vshll.u32 %v5044_v57, 16 }
 0x113   : > { %v4523_v6 = vpop.eup %4522  ;;  %4548 = vrcp.f32 %v678_v51  ;;  %v676_v5 = vadd.f32 1.0, %v4521_v59  ;;  %v589_v8 = vsub.f32 0.0, %v5084_v53  ;;  %v5091_v54 = vpack.c.bf16 %v850_v45, %v849_v63  ;;  %v854_v51 = vld [vmem:[#allocation2 + $0x70] sm:$0x3] }
 0x114   : > { %v4525_v37 = vpop.eup %4524  ;;  %820 = vst.msk [vmem:[#allocation2 + $0xa9] sm:$0xff] %vm346_vm1, %v732_v60  ;;  %v735_v9 = vmul.f32 %v4523_v6, %v4966_v47  ;;  %4550 = vpow2.f32 %v648_v52  ;;  %v654_v41 = vmul.f32 1.442695, %v591_v29  ;;  %v1199_v11 = vrot.slane %v1197_v61, 1  ;;  %v855_v29 = vld [vmem:[#allocation2 + $0x78] sm:$0xff] }
 0x115   : > { %v4527_v10 = vpop.eup %4526  ;;  %4552 = vrcp.f32 %v676_v5  ;;  %v679_v16 = vadd.f32 1.0, %v4525_v37  ;;  %v650_v18 = vmul.f32 1.442695, %v589_v8  ;;  %4100 = vmatmul.mubr.msk.bf16.gmra.mxu1 %vm346_vm1, %v5091_v54  ;;  %v5097_v58 = vpack.c.bf16 %v848_v3, %v848_v3 }
 0x116   : > { %v4529_v22 = vpop.eup %4528  ;;  %823 = vst.msk [vmem:[#allocation2 + $0xc9] sm:$0xff] %vm346_vm1, %v735_v9  ;;  %v733_v24 = vmul.f32 %v4527_v10, %v4971_v55  ;;  %4554 = vpow2.f32 %v654_v41  ;;  %v5102_v47 = vsel %vm1178_vm3, %v1195_v2, %v1199_v11  ;;  %v1201_v27 = vshrl.u32 %v5034_v40, 16  ;;  %v859_v41 = vld [vmem:[#allocation2 + $0x98] sm:$0xff] }
 0x117   : > { %v4531_v28 = vpop.eup %4530  ;;  %4556 = vrcp.f32 %v679_v16  ;;  %v677_v62 = vadd.f32 1.0, %v4529_v22  ;;  %4130 = vmatmul.mubr.msk.bf16.vlgmr.msra.gmra.mxu0 %vm346_vm1, %v5102_v47  ;;  %v1203_v30 = vshll.u32 %v5034_v40, 16  ;;  %v1208_v55 = vshll.u32 %v5097_v58, 16  ;;  %v856_v36 = vld [vmem:[#allocation2 + $0x80] sm:$0xff]  ;;  %v857_v11 = vld [vmem:[#allocation2 + $0x88] sm:$0x3] }
 0x118   : > { %v4533_v33 = vpop.eup %4532  ;;  %821 = vst.msk [vmem:[#allocation2 + $0xb1] sm:$0xff] %vm346_vm1, %v733_v24  ;;  %v682_v34 = vadd.f32 1.0, %v4531_v28  ;;  %4558 = vpow2.f32 %v650_v18  ;;  %v5115_v38 = vpack.c.bf16 %v853_v20, %v852_v32  ;;  %v5117_v42 = vpack.c.bf16 %v851_v14, %v851_v14  ;;  %4196 = vmatpush3.bf16.msra.mxu0 %v5026_v35  ;;  %v858_v28 = vld [vmem:[#allocation2 + $0x90] sm:$0xff] }
 0x119   : > { %v4535_v21 = vpop.eup %4534  ;;  %v738_v2 = vmul.f32 %v4533_v33, %v4975_v1  ;;  %4560 = vrcp.f32 %v677_v62  ;;  %v1205_v45 = vrot.slane %v1203_v30, 1  ;;  %v1210_v49 = vrot.slane %v1208_v55, 1  ;;  %4405 = vmatprep.subr.msk.bf16.mxu0 %vm395_vm0, %v5108_v17 }
 0x11a   : > { %v4537_v52 = vpop.eup %4536  ;;  %4562 = vrcp.f32 %v682_v34  ;;  %v680_v59 = vadd.f32 1.0, %v4535_v21  ;;  %4103 = vmatprep.mubr.msk.bf16.mxu1 %vm346_vm1, %v5115_v38  ;;  %v1212_v60 = vshrl.u32 %v5091_v54, 16  ;;  %v1214_v35 = vshll.u32 %v5091_v54, 16 }
 0x11b   : > { %v4539_v61 = vpop.eup %4538  ;;  %826 = vst.msk [vmem:[#allocation2 + $0xf1] sm:$0xff] %vm346_vm1, %v738_v2  ;;  %v736_v1 = vmul.f32 %v4537_v52, %v4978_v7  ;;  %v1206_v63 = vor.u32 %v1205_v45, %v1201_v27  ;;  %v1219_v3 = vshll.u32 %v5117_v42, 16  ;;  %v5130_v6 = vpack.c.bf16 %v856_v36, %v855_v29  ;;  %v860_v45 = vld [vmem:[#allocation2 + $0xa0] sm:$0x3] }
 0x11c   : > { %v4541_v5 = vpop.eup %4540  ;;  %4564 = vrcp.f32 %v680_v59  ;;  %v683_v8 = vadd.f32 1.0, %v4539_v61  ;;  %v1216_v37 = vrot.slane %v1214_v35, 1  ;;  %v5132_v9 = vpack.c.bf16 %v854_v51, %v854_v51 }
 0x11d   : > { %v4543_v10 = vpop.eup %4542  ;;  %824 = vst.msk [vmem:[#allocation2 + $0xd9] sm:$0xff] %vm346_vm1, %v736_v1  ;;  %v739_v16 = vmul.f32 %v4541_v5, %v4984_v15  ;;  %v5137_v7 = vsel %vm1178_vm3, %v1206_v63, %v1210_v49  ;;  %v1221_v18 = vrot.slane %v1219_v3, 1  ;;  %4104 = vmatmul.mubr.msk.bf16.gmra.mxu1 %vm346_vm1, %v5130_v6  ;;  %v1223_v20 = vshrl.u32 %v5115_v38, 16  ;;  %v861_v1 = vld [vmem:[#allocation2 + $0xa8] sm:$0xff] }
 0x11e   : > { %v4545_v14 = vpop.eup %4544  ;;  %4566 = vrcp.f32 %v683_v8  ;;  %v681_v22 = vadd.f32 1.0, %v4543_v10  ;;  %4133 = vmatprep.mubr.msk.bf16.mxu0 %vm346_vm1, %v5137_v7  ;;  %v1217_v24 = vor.u32 %v1216_v37, %v1212_v60  ;;  %v1225_v27 = vshll.u32 %v5115_v38, 16  ;;  %v865_v37 = vld [vmem:[#allocation2 + $0xc8] sm:$0xff] }
 0x11f   : > { %v4547_v15 = vpop.eup %4546  ;;  %827 = vst.msk [vmem:[#allocation2 + $0xf9] sm:$0xff] %vm346_vm1, %v739_v16  ;;  %v737_v62 = vmul.f32 %v4545_v14, %v4990_v39  ;;  %v1230_v30 = vshll.u32 %v5132_v9, 16  ;;  %v5148_v55 = vpack.c.bf16 %v859_v41, %v858_v28  ;;  %v5150_v32 = vpack.c.bf16 %v857_v11, %v857_v11  ;;  %v862_v2 = vld [vmem:[#allocation2 + $0xb0] sm:$0xff] }
 0x120   : > { %v4549_v33 = vpop.eup %4548  ;;  %4568 = vrcp.f32 %v681_v22  ;;  %v686_v34 = vadd.f32 1.0, %v4547_v15  ;;  %v5153_v36 = vsel %vm1178_vm3, %v1217_v24, %v1221_v18  ;;  %v1227_v21 = vrot.slane %v1225_v27, 1  ;;  %v863_v18 = vld [vmem:[#allocation2 + $0xb8] sm:$0x3]  ;;  %v864_v27 = vld [vmem:[#allocation2 + $0xc0] sm:$0xff] }
 0x121   : > { %v4551_v49 = vpop.eup %4550  ;;  %825 = vst.msk [vmem:[#allocation2 + $0xe1] sm:$0xff] %vm346_vm1, %v737_v62  ;;  %v742_v39 = vmul.f32 %v4549_v33, %v4996_v43  ;;  %4134 = vmatmul.mubr.msk.bf16.gmra.mxu0 %vm346_vm1, %v5153_v36  ;;  %v1232_v51 = vrot.slane %v1230_v30, 1  ;;  %4107 = vmatprep.mubr.msk.bf16.mxu1 %vm346_vm1, %v5148_v55  ;;  %v1234_v52 = vshrl.u32 %v5130_v6, 16  ;;  %v1236_v59 = vshll.u32 %v5130_v6, 16 }
 0x122   : > { %v4553_v60 = vpop.eup %4552  ;;  %4570 = vrcp.f32 %v686_v34  ;;  %v684_v35 = vadd.f32 1.0, %v4551_v49  ;;  %v1228_v29 = vor.u32 %v1227_v21, %v1223_v20  ;;  %v1241_v61 = vshll.u32 %v5150_v32, 16 }
 0x123   : > { %v4555_v63 = vpop.eup %4554  ;;  %830 = vst.msk [vmem:[#allocation2 + $0x121] sm:$0xff] %vm346_vm1, %v742_v39  ;;  %v740_v43 = vmul.f32 %v4553_v60, %v5001_v46  ;;  %v1238_v3 = vrot.slane %v1236_v59, 1  ;;  %v5166_v5 = vpack.c.bf16 %v862_v2, %v861_v1  ;;  %v5168_v8 = vpack.c.bf16 %v860_v45, %v860_v45  ;;  %v866_v45 = vld [vmem:[#allocation2 + $0xd0] sm:$0x3] }
 0x124   : > { %v4557_v41 = vpop.eup %4556  ;;  %4572 = vrcp.f32 %v684_v35  ;;  %v687_v11 = vadd.f32 1.0, %v4555_v63  ;;  %v5171_v10 = vsel %vm1178_vm3, %v1228_v29, %v1232_v51  ;;  %v1243_v16 = vrot.slane %v1241_v61, 1  ;;  %v867_v51 = vld [vmem:[#allocation2 + $0xd8] sm:$0xff] }
 0x125   : > { %v4559_v20 = vpop.eup %4558  ;;  %828 = vst.msk [vmem:[#allocation2 + $0x109] sm:$0xff] %vm346_vm1, %v740_v43  ;;  %v743_v14 = vmul.f32 %v4557_v41, %v5008_v50  ;;  %4137 = vmatprep.mubr.msk.bf16.mxu0 %vm346_vm1, %v5171_v10  ;;  %v1239_v46 = vor.u32 %v1238_v3, %v1234_v52  ;;  %4108 = vmatmul.mubr.msk.bf16.gmra.mxu1 %vm346_vm1, %v5166_v5  ;;  %v1245_v22 = vshrl.u32 %v5148_v55, 16  ;;  %v1247_v24 = vshll.u32 %v5148_v55, 16 }
 0x126   : > { %v4561_v28 = vpop.eup %4560  ;;  %4574 = vrcp.f32 %v687_v11  ;;  %v685_v15 = vadd.f32 1.0, %v4559_v20  ;;  %v1252_v62 = vshll.u32 %v5168_v8, 16  ;;  %v5182_v30 = vpack.c.bf16 %v865_v37, %v864_v27  ;;  %v871_v59 = vld [vmem:[#allocation2 + $0xf8] sm:$0xff]  ;;  %v870_v37 = vld [vmem:[#allocation2 + $0xf0] sm:$0xff] }
 0x127   : > { %v4563_v50 = vpop.eup %4562  ;;  %831 = vst.msk [vmem:[#allocation2 + $0x129] sm:$0xff] %vm346_vm1, %v743_v14  ;;  %v741_v33 = vmul.f32 %v4561_v28, %v5014_v12  ;;  %v5187_v34 = vsel %vm1178_vm3, %v1239_v46, %v1243_v16  ;;  %v1249_v21 = vrot.slane %v1247_v24, 1  ;;  %v5189_v2 = vpack.c.bf16 %v863_v18, %v863_v18  ;;  %v872_v14 = vld [vmem:[#allocation2 + $0x100] sm:$0x3] }
 0x128   : > { %v746_v49 = vmul.f32 %v4563_v50, %v5021_v19  ;;  %4576 = vrcp.f32 %v685_v15  ;;  %v1254_v39 = vrot.slane %v1252_v62, 1  ;;  %4111 = vmatprep.mubr.msk.bf16.mxu1 %vm346_vm1, %v5182_v30  ;;  %v868_v52 = vld [vmem:[#allocation2 + $0xe0] sm:$0xff]  ;;  %v1258_v35 = vshll.u32 %v5166_v5, 16  ;;  %v869_v61 = vld [vmem:[#allocation2 + $0xe8] sm:$0x3] }
 0x129   : > { %v4565_v60 = vpop.eup %4564  ;;  %829 = vst.msk [vmem:[#allocation2 + $0x111] sm:$0xff] %vm346_vm1, %v741_v33  ;;  %4138 = vmatmul.mubr.msk.bf16.gmra.mxu0 %vm346_vm1, %v5187_v34  ;;  %v1250_v12 = vor.u32 %v1249_v21, %v1245_v22  ;;  %v1263_v29 = vshll.u32 %v5189_v2, 16  ;;  %v5199_v19 = vpack.c.bf16 %v868_v52, %v867_v51  ;;  %v1256_v63 = vshrl.u32 %v5166_v5, 16 }
 0x12a   : > { %834 = vst.msk [vmem:[#allocation2 + $0x151] sm:$0xff] %vm346_vm1, %v746_v49  ;;  %v744_v1 = vmul.f32 %v4565_v60, %v5032_v31  ;;  %v5204_v43 = vpack.c.bf16 %v866_v45, %v866_v45  ;;  %v1269_v3 = vshll.u32 %v5182_v30, 16  ;;  %v1260_v16 = vrot.slane %v1258_v35, 1 }
 0x12b   : > { %v4567_v41 = vpop.eup %4566  ;;  %v5208_v11 = vsel %vm1178_vm3, %v1250_v12, %v1254_v39  ;;  %v1267_v18 = vshrl.u32 %v5182_v30, 16  ;;  %v5211_v20 = vpack.c.bf16 %v871_v59, %v870_v37  ;;  %v5218_v24 = vpack.c.bf16 %v869_v61, %v869_v61 }
 0x12c   : > { %832 = vst.msk [vmem:[#allocation2 + $0x139] sm:$0xff] %vm346_vm1, %v744_v1  ;;  %v747_v31 = vmul.f32 %v4567_v41, %v5039_v48  ;;  %4141 = vmatprep.mubr.msk.bf16.mxu0 %vm346_vm1, %v5208_v11  ;;  %v1271_v46 = vrot.slane %v1269_v3, 1  ;;  %v1274_v22 = vshll.u32 %v5204_v43, 16  ;;  %v1261_v28 = vor.u32 %v1260_v16, %v1256_v63  ;;  %v873_v12 = vld [vmem:[#allocation2 + $0x108] sm:$0xff] }
 0x12d   : > { %v4569_v27 = vpop.eup %4568  ;;  %v1265_v15 = vrot.slane %v1263_v29, 1  ;;  %4112 = vmatmul.mubr.msk.bf16.gmra.mxu1 %vm346_vm1, %v5199_v19  ;;  %v1280_v62 = vshll.u32 %v5199_v19, 16  ;;  %v5227_v33 = vpack.c.bf16 %v872_v14, %v872_v14  ;;  %v1291_v52 = vshll.u32 %v5211_v20, 16  ;;  %v876_v29 = vld [vmem:[#allocation2 + $0x120] sm:$0xff] }
 0x12e   : > { %835 = vst.msk [vmem:[#allocation2 + $0x159] sm:$0xff] %vm346_vm1, %v747_v31  ;;  %v745_v48 = vmul.f32 %v4569_v27, %v5055_v4  ;;  %v1272_v50 = vor.u32 %v1271_v46, %v1267_v18  ;;  %4115 = vmatprep.mubr.msk.bf16.mxu1 %vm346_vm1, %v5211_v20  ;;  %v877_v21 = vld [vmem:[#allocation2 + $0x128] sm:$0xff]  ;;  %v1276_v39 = vrot.slane %v1274_v22, 1  ;;  %v1278_v4 = vshrl.u32 %v5199_v19, 16 }
 0x12f   : > { %v4571_v45 = vpop.eup %4570  ;;  %v5230_v49 = vsel %vm1178_vm3, %v1261_v28, %v1265_v15  ;;  %v1282_v51 = vrot.slane %v1280_v62, 1  ;;  %v1285_v60 = vshll.u32 %v5218_v24, 16  ;;  %v1293_v3 = vrot.slane %v1291_v52, 1  ;;  %v878_v15 = vld [vmem:[#allocation2 + $0x130] sm:$0x3] }
 0x130   : > { %833 = vst.msk [vmem:[#allocation2 + $0x141] sm:$0xff] %vm346_vm1, %v745_v48  ;;  %v750_v59 = vmul.f32 %v4571_v45, %v5061_v13  ;;  %v874_v35 = vld [vmem:[#allocation2 + $0x110] sm:$0xff]  ;;  %v5240_v1 = vsel %vm1178_vm3, %v1272_v50, %v1276_v39  ;;  %v5244_v37 = vpack.c.bf16 %v877_v21, %v876_v29  ;;  %v875_v13 = vld [vmem:[#allocation2 + $0x118] sm:$0x3]  ;;  %v1289_v14 = vshrl.u32 %v5211_v20, 16 }
 0x131   : > { %v4573_v61 = vpop.eup %4572  ;;  %4142 = vmatmul.mubr.msk.bf16.gmra.mxu0 %vm346_vm1, %v5230_v49  ;;  %v5242_v63 = vpack.c.bf16 %v874_v35, %v873_v12  ;;  %v1283_v16 = vor.u32 %v1282_v51, %v1278_v4  ;;  %v1296_v31 = vshll.u32 %v5227_v33, 16  ;;  %v1287_v27 = vrot.slane %v1285_v60, 1  ;;  %v882_v12 = vld [vmem:[#allocation2 + $0x150] sm:$0xff] }
 0x132   : > { %838 = vst.msk [vmem:[#allocation2 + $0x181] sm:$0xff] %vm346_vm1, %v750_v59  ;;  %v748_v41 = vmul.f32 %v4573_v61, %v5073_v26  ;;  %4145 = vmatprep.mubr.msk.bf16.mxu0 %vm346_vm1, %v5240_v1  ;;  %v5255_v28 = vpack.c.bf16 %v875_v13, %v875_v13  ;;  %v1294_v62 = vor.u32 %v1293_v3, %v1289_v14  ;;  %v1313_v48 = vshll.u32 %v5244_v37, 16 }
 0x133   : > { %v4575_v18 = vpop.eup %4574  ;;  %v1302_v46 = vshll.u32 %v5242_v63, 16  ;;  %v5263_v21 = vsel %vm1178_vm3, %v1283_v16, %v1287_v27  ;;  %v1298_v39 = vrot.slane %v1296_v31, 1  ;;  %v879_v51 = vld [vmem:[#allocation2 + $0x138] sm:$0xff]  ;;  %v5267_v59 = vpack.c.bf16 %v878_v15, %v878_v15 }
 0x134   : > { %836 = vst.msk [vmem:[#allocation2 + $0x169] sm:$0xff] %vm346_vm1, %v748_v41  ;;  %v751_v22 = vmul.f32 %v4575_v18, %v5081_v44  ;;  %v1300_v4 = vshrl.u32 %v5242_v63, 16  ;;  %v1307_v60 = vshll.u32 %v5255_v28, 16  ;;  %v1315_v29 = vrot.slane %v1313_v48, 1 }
 0x135   : > { %v4577_v26 = vpop.eup %4576  ;;  %4116 = vmatmul.mubr.msk.bf16.gmra.mxu1 %vm346_vm1, %v5242_v63  ;;  %v1304_v44 = vrot.slane %v1302_v46, 1  ;;  %v883_v45 = vld [vmem:[#allocation2 + $0x158] sm:$0xff]  ;;  %v5277_v35 = vsel %vm1178_vm3, %v1294_v62, %v1298_v39  ;;  %v1311_v16 = vshrl.u32 %v5244_v37, 16  ;;  %v1318_v18 = vshll.u32 %v5267_v59, 16  ;;  %v884_v46 = vld [vmem:[#allocation2 + $0x160] sm:$0x3] }
 0x136   : > { %839 = vst.msk [vmem:[#allocation2 + $0x189] sm:$0xff] %vm346_vm1, %v751_v22  ;;  %v749_v50 = vmul.f32 %v4577_v26, %v5084_v53  ;;  %4119 = vmatprep.mubr.msk.bf16.mxu1 %vm346_vm1, %v5244_v37  ;;  %v5279_v61 = vpack.c.bf16 %v883_v45, %v882_v12  ;;  %v1309_v14 = vrot.slane %v1307_v60, 1  ;;  %v1633_v45 = vrot.slane %v4875_v23, 1 }
 0x137   : > { %v880_v52 = vld [vmem:[#allocation2 + $0x140] sm:$0xff]  ;;  %v881_v3 = vld [vmem:[#allocation2 + $0x148] sm:$0x3]  ;;  %v1305_v13 = vor.u32 %v1304_v44, %v1300_v4  ;;  %v1316_v22 = vor.u32 %v1315_v29, %v1311_v16  ;;  %v1320_v62 = vrot.slane %v1318_v18, 1  ;;  %v5296_v44 = vpack.c.bf16 %v884_v46, %v884_v46 }
 0x138   : > { %837 = vst.msk [vmem:[#allocation2 + $0x171] sm:$0xff] %vm346_vm1, %v749_v50  ;;  %v5272_v53 = vpack.c.bf16 %v880_v52, %v879_v51  ;;  %v5286_v31 = vpack.c.bf16 %v881_v3, %v881_v3  ;;  %v1335_v27 = vshll.u32 %v5279_v61, 16  ;;  %v1634_v39 = vrot.slane %v4879_v25, 1 }
 0x139   : > { %4146 = vmatmul.mubr.msk.bf16.gmra.mxu0 %vm346_vm1, %v5263_v21  ;;  %v5292_v15 = vsel %vm1178_vm3, %v1305_v13, %v1309_v14  ;;  %v5307_v60 = vsel %vm1178_vm3, %v1316_v22, %v1320_v62  ;;  %v1333_v3 = vshrl.u32 %v5279_v61, 16  ;;  %v1340_v13 = vshll.u32 %v5296_v44, 16 }
 0x13a   : > { %4149 = vmatprep.mubr.msk.bf16.mxu0 %vm346_vm1, %v5277_v35  ;;  %v1324_v41 = vshll.u32 %v5272_v53, 16  ;;  %v1322_v51 = vshrl.u32 %v5272_v53, 16  ;;  %v1329_v52 = vshll.u32 %v5286_v31, 16  ;;  %v1337_v12 = vrot.slane %v1335_v27, 1 }
 0x13b   : > { %v885_v48 = vld [vmem:[#allocation2 + $0x168] sm:$0xff]  ;;  %v1342_v27 = vrot.slane %v1340_v13, 1  ;;  %v1645_v13 = vrot.slane %v5115_v38, 1 }
 0x13c   : > { %v1326_v26 = vrot.slane %v1324_v41, 1  ;;  %v1635_v41 = vsel %vm1632_vm4, %v1633_v45, %v1634_v39  ;;  %v1331_v16 = vrot.slane %v1329_v52, 1  ;;  %v1338_v14 = vor.u32 %v1337_v12, %v1333_v3 }
 0x13d   : > { %4120 = vmatmul.mubr.msk.bf16.gmra.mxu1 %vm346_vm1, %v5272_v53  ;;  %v1639_v39 = vrot.slane %v5034_v40, 1  ;;  %v2144_v12 = vsel %vm395_vm0, %v5050_v0, 0  ;;  %v1642_v0 = vrot.slane %v5091_v54, 1  ;;  %v1643_v3 = vrot.slane %v5117_v42, 1 }
 0x13e   : > { %4123 = vmatprep.mubr.msk.bf16.mxu1 %vm346_vm1, %v5279_v61  ;;  %v1327_v23 = vor.u32 %v1326_v26, %v1322_v51  ;;  %v5330_v45 = vsel %vm1178_vm3, %v1338_v14, %v1342_v27  ;;  %v1640_v51 = vrot.slane %v5097_v58, 1  ;;  %v2349_v42 = vsel %vm395_vm0, %v5108_v17, 0 }
 0x13f   : > { %v886_v50 = vld [vmem:[#allocation2 + $0x170] sm:$0xff]  ;;  %v887_v29 = vld [vmem:[#allocation2 + $0x178] sm:$0x3]  ;;  %v1651_v27 = vrot.slane %v5148_v55, 1 }
 0x140   : > { %v5302_v4 = vpack.c.bf16 %v886_v50, %v885_v48  ;;  %v5315_v18 = vpack.c.bf16 %v887_v29, %v887_v29  ;;  %v5320_v46 = vsel %vm1178_vm3, %v1327_v23, %v1331_v16  ;;  %v1636_v48 = vrot.slane %v5042_v56, 1  ;;  %v5344_v23 = vld [vmem:[%s6624_s3 + $0x18] sm:$0xf] }
 0x141   : > { %4150 = vmatmul.mubr.msk.bf16.gmra.mxu0 %vm346_vm1, %v5292_v15  ;;  %v1637_v50 = vrot.slane %v5044_v57, 1  ;;  %v5349_v58 = vsel %vm1632_vm4, %v1639_v39, %v1640_v51  ;;  %v5367_v16 = vsel %vm1632_vm4, %v1642_v0, %v1643_v3  ;;  %v1667_v3 = vrot.slane %v5255_v28, 1 }
 0x142   : > { %4153 = vmatprep.mubr.msk.bf16.mxu0 %vm346_vm1, %v5307_v60  ;;  %v1346_v25 = vshll.u32 %v5302_v4, 16  ;;  %v1344_v26 = vshrl.u32 %v5302_v4, 16  ;;  %v1351_v62 = vshll.u32 %v5315_v18, 16  ;;  %v1672_v28 = vrot.slane %v5272_v53, 1 }
 0x143   : > { %v5339_v57 = vsel %vm1632_vm4, %v1636_v48, %v1637_v50  ;;  %v1657_v48 = vrot.slane %v5182_v30, 1  ;;  %v1658_v50 = vrot.slane %v5204_v43, 1  ;;  %v1663_v43 = vrot.slane %v5211_v20, 1 }
 0x144   : > { %v1348_v22 = vrot.slane %v1346_v25, 1  ;;  %v1353_v29 = vrot.slane %v1351_v62, 1  ;;  %v1655_v62 = vrot.slane %v5189_v2, 1  ;;  %v1660_v2 = vrot.slane %v5199_v19, 1 }
 0x145   : > { %4124 = vmatmul.mubr.msk.bf16.gmra.mxu1 %vm346_vm1, %v5302_v4  ;;  %v5417_v51 = vsel %vm1632_vm4, %v1657_v48, %v1658_v50  ;;  %v2962_v48 = vld [vmem:[%s6624_s3 + $0x20] sm:$0xf] }
 0x146   : > { %4163 = vmatprep.mubr.msk.bf16.mxu1 %vm346_vm1, %v1635_v41  ;;  %v1349_v52 = vor.u32 %v1348_v22, %v1344_v26  ;;  %v1646_v41 = vrot.slane %v5132_v9, 1  ;;  %v1648_v9 = vrot.slane %v5130_v6, 1  ;;  %v1649_v22 = vrot.slane %v5150_v32, 1  ;;  %v888_v50 = vld [vmem:[#allocation2 + $0x180] sm:$0xff] }
 0x147   : > { %v1652_v26 = vrot.slane %v5168_v8, 1  ;;  %v1654_v8 = vrot.slane %v5166_v5, 1 }
 0x148   : > { %v5352_v25 = vsel %vm1178_vm3, %v1349_v52, %v1353_v29  ;;  %v5372_v14 = vsel %vm1632_vm4, %v1645_v13, %v1646_v41  ;;  %v5394_v17 = vsel %vm1632_vm4, %v1648_v9, %v1649_v22  ;;  %v1661_v52 = vrot.slane %v5218_v24, 1 }
 0x149   : > { %4154 = vmatmul.mubr.msk.bf16.gmra.mxu0 %vm346_vm1, %v5320_v46  ;;  %v5399_v32 = vsel %vm1632_vm4, %v1651_v27, %v1652_v26  ;;  %v5412_v39 = vsel %vm1632_vm4, %v1654_v8, %v1655_v62  ;;  %v1666_v24 = vrot.slane %v5242_v63, 1  ;;  %v1670_v13 = vrot.slane %v5267_v59, 1  ;;  %v889_v62 = vld [vmem:[#allocation2 + $0x188] sm:$0xff] }
 0x14a   : > { %4157 = vmatprep.mubr.msk.bf16.mxu0 %vm346_vm1, %v5330_v45  ;;  %v5430_v29 = vsel %vm1632_vm4, %v1660_v2, %v1661_v52  ;;  %v1673_v9 = vrot.slane %v5286_v31, 1  ;;  %v1675_v59 = vrot.slane %v5279_v61, 1  ;;  %v1676_v22 = vrot.slane %v5296_v44, 1 }
 0x14b   : > { %v5448_v41 = vsel %vm1632_vm4, %v1666_v24, %v1667_v3  ;;  %v1678_v31 = vrot.slane %v5302_v4, 1  ;;  %v1679_v8 = vrot.slane %v5315_v18, 1  ;;  %v2550_v18 = vsel %vm395_vm0, %v5344_v23, 0 }
 0x14c   : > { %v5466_v27 = vsel %vm1632_vm4, %v1672_v28, %v1673_v9  ;;  %v5471_v26 = vsel %vm1632_vm4, %v1675_v59, %v1676_v22  ;;  %v2967_v28 = vsel %vm395_vm0, %v2962_v48, 0 }
 0x14d   : > { %4164 = vmatmul.mubr.msk.bf16.vlgmr.msra.gmra.mxu1 %vm346_vm1, %v5339_v57  ;;  %v5482_v44 = vsel %vm1632_vm4, %v1678_v31, %v1679_v8 }
 0x14e   : > { %4230 = vmatpush3.bf16.msra.mxu1 %v2144_v12  ;;  %4167 = vmatprep.mubr.msk.bf16.mxu1 %vm346_vm1, %v5349_v58  ;;  %v1664_v12 = vrot.slane %v5227_v33, 1  ;;  %v1669_v33 = vrot.slane %v5244_v37, 1 }
 0x14f   : > { %4406 = vmatprep.subr.msk.bf16.mxu1 %vm395_vm0, %v5344_v23 }
 0x150   : > { %v5435_v0 = vsel %vm1632_vm4, %v1663_v43, %v1664_v12 }
 0x151   : > { %4158 = vmatmul.mubr.msk.bf16.gmra.mxu0 %vm346_vm1, %v5352_v25 }
 0x152   : > { %4197 = vmatprep.mubr.msk.bf16.mxu0 %vm346_vm1, %v5042_v56  ;;  %v5383_v56 = vld [vmem:[%s6624_s3 + $0x1c] sm:$0xf] }
 0x153   : > { %v2762_v23 = vsel %vm395_vm0, %v5383_v56, 0 }
 0x155   : > { %4168 = vmatmul.mubr.msk.bf16.gmra.mxu1 %vm346_vm1, %v5367_v16 }
 0x156   : > { %4171 = vmatprep.mubr.msk.bf16.mxu1 %vm346_vm1, %v5372_v14 }
 0x159   : > { %4198 = vmatmul.mubr.msk.bf16.vlgmr.msra.gmra.mxu0 %vm346_vm1, %v5034_v40 }
 0x15a   : > { %4201 = vmatprep.mubr.msk.bf16.mxu0 %vm346_vm1, %v5091_v54  ;;  %4264 = vmatpush3.bf16.msra.mxu0 %v2349_v42  ;;  %v5453_v42 = vsel %vm1632_vm4, %v1669_v33, %v1670_v13 }
 0x15b   : > { %4407 = vmatprep.subr.msk.bf16.mxu0 %vm395_vm0, %v5383_v56 }
 0x15d   : > { %4172 = vmatmul.mubr.msk.bf16.gmra.mxu1 %vm346_vm1, %v5394_v17 }
 0x15e   : > { %4175 = vmatprep.mubr.msk.bf16.mxu1 %vm346_vm1, %v5399_v32 }
 0x161   : > { %4202 = vmatmul.mubr.msk.bf16.gmra.mxu0 %vm346_vm1, %v5115_v38 }
 0x162   : > { %4205 = vmatprep.mubr.msk.bf16.mxu0 %vm346_vm1, %v5130_v6 }
 0x165   : > { %4176 = vmatmul.mubr.msk.bf16.gmra.mxu1 %vm346_vm1, %v5412_v39 }
 0x166   : > { %4179 = vmatprep.mubr.msk.bf16.mxu1 %vm346_vm1, %v5417_v51 }
 0x169   : > { %4206 = vmatmul.mubr.msk.bf16.gmra.mxu0 %vm346_vm1, %v5148_v55 }
 0x16a   : > { %4209 = vmatprep.mubr.msk.bf16.mxu0 %vm346_vm1, %v5166_v5 }
 0x16d   : > { %4180 = vmatmul.mubr.msk.bf16.gmra.mxu1 %vm346_vm1, %v5430_v29 }
 0x16e   : > { %4183 = vmatprep.mubr.msk.bf16.mxu1 %vm346_vm1, %v5435_v0 }
 0x171   : > { %4210 = vmatmul.mubr.msk.bf16.gmra.mxu0 %vm346_vm1, %v5182_v30 }
 0x172   : > { %4213 = vmatprep.mubr.msk.bf16.mxu0 %vm346_vm1, %v5199_v19 }
 0x175   : > { %4184 = vmatmul.mubr.msk.bf16.gmra.mxu1 %vm346_vm1, %v5448_v41 }
 0x176   : > { %4187 = vmatprep.mubr.msk.bf16.mxu1 %vm346_vm1, %v5453_v42 }
 0x179   : > { %4214 = vmatmul.mubr.msk.bf16.gmra.mxu0 %vm346_vm1, %v5211_v20 }
 0x17a   : > { %4217 = vmatprep.mubr.msk.bf16.mxu0 %vm346_vm1, %v5242_v63 }
 0x17d   : > { %4188 = vmatmul.mubr.msk.bf16.gmra.mxu1 %vm346_vm1, %v5466_v27 }
 0x17e   : > { %4191 = vmatprep.mubr.msk.bf16.mxu1 %vm346_vm1, %v5471_v26 }
 0x181   : > { %4218 = vmatmul.mubr.msk.bf16.gmra.mxu0 %vm346_vm1, %v5244_v37 }
 0x182   : > { %4221 = vmatprep.mubr.msk.bf16.mxu0 %vm346_vm1, %v5272_v53 }
 0x185   : > { %4192 = vmatmul.mubr.msk.bf16.gmra.mxu1 %vm346_vm1, %v5482_v44 }
 0x186   : > { %4231 = vmatprep.mubr.msk.bf16.mxu1 %vm346_vm1, %v5102_v47  ;;  %v5501_v47 = vpack.c.bf16 %v889_v62, %v888_v50 }
 0x188   : > { %v2130_v56 = vshll.u32 %v5501_v47, 16  ;;  %v2128_v43 = vshrl.u32 %v5501_v47, 16  ;;  %v2341_v9 = vrot.slane %v5501_v47, 1 }
 0x189   : > { %4222 = vmatmul.mubr.msk.bf16.gmra.mxu0 %vm346_vm1, %v5279_v61 }
 0x18a   : > { %4225 = vmatprep.mubr.msk.bf16.mxu0 %vm346_vm1, %v5302_v4  ;;  %v2132_v52 = vrot.slane %v2130_v56, 1 }
 0x18c   : > { %v2133_v24 = vor.u32 %v2132_v52, %v2128_v43 }
 0x18d   : > { %4232 = vmatmul.mubr.msk.bf16.vlgmr.msra.gmra.mxu1 %vm346_vm1, %v5137_v7 }
 0x18e   : > { %4298 = vmatpush3.bf16.msra.mxu1 %v2550_v18  ;;  %4235 = vmatprep.mubr.msk.bf16.mxu1 %vm346_vm1, %v5153_v36  ;;  %v5587_v18 = vld [vmem:[%s6625_s4] ss:$0 sm:$0xff] }
 0x18f   : > { %4408 = vmatprep.subr.msk.bf16.mxu1 %vm395_vm0, %v2962_v48 }
 0x191   : > { %4226 = vmatmul.mubr.msk.bf16.gmra.mxu0 %vm346_vm1, %v5501_v47 }
 0x192   : > { %4265 = vmatprep.mubr.msk.bf16.mxu0 %vm346_vm1, %v5339_v57  ;;  %v890_v57 = vld [vmem:[#allocation2 + $0x190] sm:$0x3] }
 0x193   : > { %v2127_v2 = vpack.c.bf16 %v890_v57, %v890_v57 }
 0x195   : > { %4236 = vmatmul.mubr.msk.bf16.gmra.mxu1 %vm346_vm1, %v5171_v10  ;;  %v2135_v12 = vshll.u32 %v2127_v2, 16  ;;  %v2342_v59 = vrot.slane %v2127_v2, 1 }
 0x196   : > { %4239 = vmatprep.mubr.msk.bf16.mxu1 %vm346_vm1, %v5187_v34 }
 0x197   : > { %v2137_v3 = vrot.slane %v2135_v12, 1  ;;  %v5578_v31 = vsel %vm1632_vm4, %v2341_v9, %v2342_v59 }
 0x199   : > { %4266 = vmatmul.mubr.msk.bf16.vlgmr.msra.gmra.mxu0 %vm346_vm1, %v5349_v58  ;;  %v5561_v33 = vsel %vm1178_vm3, %v2133_v24, %v2137_v3 }
 0x19a   : > { %4269 = vmatprep.mubr.msk.bf16.mxu0 %vm346_vm1, %v5367_v16  ;;  %4332 = vmatpush3.bf16.msra.mxu0 %v2762_v23 }
 0x19d   : > { %4240 = vmatmul.mubr.msk.bf16.gmra.mxu1 %vm346_vm1, %v5208_v11 }
 0x19e   : > { %4243 = vmatprep.mubr.msk.bf16.mxu1 %vm346_vm1, %v5230_v49 }
 0x1a1   : > { %4270 = vmatmul.mubr.msk.bf16.gmra.mxu0 %vm346_vm1, %v5372_v14 }
 0x1a2   : > { %4273 = vmatprep.mubr.msk.bf16.mxu0 %vm346_vm1, %v5394_v17 }
 0x1a5   : > { %4244 = vmatmul.mubr.msk.bf16.gmra.mxu1 %vm346_vm1, %v5240_v1 }
 0x1a6   : > { %4247 = vmatprep.mubr.msk.bf16.mxu1 %vm346_vm1, %v5263_v21 }
 0x1a9   : > { %4274 = vmatmul.mubr.msk.bf16.gmra.mxu0 %vm346_vm1, %v5399_v32 }
 0x1aa   : > { %4277 = vmatprep.mubr.msk.bf16.mxu0 %vm346_vm1, %v5412_v39 }
 0x1ad   : > { %4248 = vmatmul.mubr.msk.bf16.gmra.mxu1 %vm346_vm1, %v5277_v35 }
 0x1ae   : > { %4251 = vmatprep.mubr.msk.bf16.mxu1 %vm346_vm1, %v5292_v15 }
 0x1b1   : > { %4278 = vmatmul.mubr.msk.bf16.gmra.mxu0 %vm346_vm1, %v5417_v51 }
 0x1b2   : > { %4281 = vmatprep.mubr.msk.bf16.mxu0 %vm346_vm1, %v5430_v29 }
 0x1b5   : > { %4252 = vmatmul.mubr.msk.bf16.gmra.mxu1 %vm346_vm1, %v5307_v60 }
 0x1b6   : > { %4255 = vmatprep.mubr.msk.bf16.mxu1 %vm346_vm1, %v5320_v46 }
 0x1b9   : > { %4282 = vmatmul.mubr.msk.bf16.gmra.mxu0 %vm346_vm1, %v5435_v0 }
 0x1ba   : > { %4285 = vmatprep.mubr.msk.bf16.mxu0 %vm346_vm1, %v5448_v41 }
 0x1bd   : > { %4256 = vmatmul.mubr.msk.bf16.gmra.mxu1 %vm346_vm1, %v5330_v45 }
 0x1be   : > { %4259 = vmatprep.mubr.msk.bf16.mxu1 %vm346_vm1, %v5352_v25 }
 0x1c1   : > { %4286 = vmatmul.mubr.msk.bf16.gmra.mxu0 %vm346_vm1, %v5453_v42 }
 0x1c2   : > { %4289 = vmatprep.mubr.msk.bf16.mxu0 %vm346_vm1, %v5466_v27 }
 0x1c5   : > { %4260 = vmatmul.mubr.msk.bf16.gmra.mxu1 %vm346_vm1, %v5561_v33 }
 0x1c6   : > { %4299 = vmatprep.mubr.msk.bf16.mxu1 %vm346_vm1, %v5034_v40 }
 0x1c9   : > { %4290 = vmatmul.mubr.msk.bf16.gmra.mxu0 %vm346_vm1, %v5471_v26 }
 0x1ca   : > { %4293 = vmatprep.mubr.msk.bf16.mxu0 %vm346_vm1, %v5482_v44  ;;  %v4097_v13 = vpop.f32.mrf.mxu1 }
 0x1cc   : > { %v1003_v22 = vpop.f32.mrf.mxu1 }
 0x1cd   : > { %4300 = vmatmul.mubr.msk.bf16.vlgmr.msra.gmra.mxu1 %vm346_vm1, %v5091_v54  ;;  %v1130_v50 = vadd.f32 %v5587_v18, %v1003_v22 }
 0x1ce   : > { %4366 = vmatpush3.bf16.msra.mxu1 %v2967_v28  ;;  %4303 = vmatprep.mubr.msk.bf16.mxu1 %vm346_vm1, %v5115_v38  ;;  %v4098_v40 = vpop.f32.mrf.mxu1  ;;  %v1132_v38 = vadd.f32 %v4097_v13, %v5587_v18 }
 0x1cf   : > { %v1133_v56 = vadd.f32 %v4098_v40, %v5587_v18 }
 0x1d0   : > { %v1006_v8 = vpop.f32.mrf.mxu1 }
 0x1d1   : > { %4294 = vmatmul.mubr.msk.bf16.gmra.mxu0 %vm346_vm1, %v5578_v31  ;;  %v1131_v52 = vadd.f32 %v5587_v18, %v1006_v8 }
 0x1d2   : > { %4333 = vmatprep.mubr.msk.bf16.mxu0 %vm346_vm1, %v5137_v7 }
 0x1d5   : > { %v4101_v54 = vpop.f32.mrf.mxu1  ;;  %4304 = vmatmul.mubr.msk.bf16.gmra.mxu1 %vm346_vm1, %v5130_v6 }
 0x1d6   : > { %4307 = vmatprep.mubr.msk.bf16.mxu1 %vm346_vm1, %v5148_v55 }
 0x1d7   : > { %v4131_v62 = vpop.f32.mrf.mxu0  ;;  %v1019_v48 = vpop.f32.mrf.mxu1 }
 0x1d8   : > { %v5595_v23 = vadd.f32 %v4131_v62, %v1132_v38  ;;  %v1134_v9 = vadd.f32 %v5587_v18, %v1019_v48 }
 0x1d9   : > { %4334 = vmatmul.mubr.msk.bf16.vlgmr.msra.gmra.mxu0 %vm346_vm1, %v5153_v36  ;;  %v1441_v7 = vpop.f32.mrf.mxu0  ;;  %v4102_v57 = vpop.f32.mrf.mxu1 }
 0x1da   : > { %4337 = vmatprep.mubr.msk.bf16.mxu0 %vm346_vm1, %v5171_v10  ;;  %v5602_v6 = vadd.f32 %v1441_v7, %v1130_v50  ;;  %v1136_v10 = vadd.f32 %v4101_v54, %v5587_v18  ;;  %v1137_v40 = vadd.f32 %v4102_v57, %v5587_v18 }
 0x1db   : > { %v4132_v2 = vpop.f32.mrf.mxu0  ;;  %v1022_v55 = vpop.f32.mrf.mxu1 }
 0x1dc   : > { %v5605_v43 = vadd.f32 %v4132_v2, %v1133_v56 }
 0x1dd   : > { %v1444_v12 = vpop.f32.mrf.mxu0  ;;  %v4105_v24 = vpop.f32.mrf.mxu1  ;;  %4308 = vmatmul.mubr.msk.bf16.gmra.mxu1 %vm346_vm1, %v5166_v5 }
 0x1de   : > { %v5609_v36 = vadd.f32 %v1444_v12, %v1131_v52  ;;  %4311 = vmatprep.mubr.msk.bf16.mxu1 %vm346_vm1, %v5182_v30  ;;  %v1140_v48 = vadd.f32 %v4105_v24, %v5587_v18 }
 0x1df   : > { %v1035_v3 = vpop.f32.mrf.mxu1 }
 0x1e1   : > { %v4135_v13 = vpop.f32.mrf.mxu0  ;;  %4338 = vmatmul.mubr.msk.bf16.gmra.mxu0 %vm346_vm1, %v5187_v34  ;;  %v4106_v28 = vpop.f32.mrf.mxu1  ;;  %v1135_v34 = vadd.f32 %v5587_v18, %v1022_v55 }
 0x1e2   : > { %v5617_v59 = vadd.f32 %v4135_v13, %v1136_v10  ;;  %4341 = vmatprep.mubr.msk.bf16.mxu0 %vm346_vm1, %v5208_v11  ;;  %v1141_v55 = vadd.f32 %v4106_v28, %v5587_v18 }
 0x1e3   : > { %v1457_v5 = vpop.f32.mrf.mxu0  ;;  %v1038_v22 = vpop.f32.mrf.mxu1 }
 0x1e4   : > { %v5622_v30 = vadd.f32 %v1457_v5, %v1134_v9 }
 0x1e5   : > { %v4136_v8 = vpop.f32.mrf.mxu0  ;;  %v4109_v54 = vpop.f32.mrf.mxu1  ;;  %4312 = vmatmul.mubr.msk.bf16.gmra.mxu1 %vm346_vm1, %v5199_v19  ;;  %v1138_v19 = vadd.f32 %v5587_v18, %v1035_v3 }
 0x1e6   : > { %v5627_v38 = vadd.f32 %v4136_v8, %v1137_v40  ;;  %4315 = vmatprep.mubr.msk.bf16.mxu1 %vm346_vm1, %v5211_v20  ;;  %v1144_v13 = vadd.f32 %v4109_v54, %v5587_v18 }
 0x1e7   : > { %v1460_v62 = vpop.f32.mrf.mxu0  ;;  %v1051_v11 = vpop.f32.mrf.mxu1 }
 0x1e8   : > { %v5632_v50 = vadd.f32 %v1460_v62, %v1135_v34 }
 0x1e9   : > { %v4139_v7 = vpop.f32.mrf.mxu0  ;;  %4342 = vmatmul.mubr.msk.bf16.gmra.mxu0 %vm346_vm1, %v5230_v49  ;;  %v4110_v57 = vpop.f32.mrf.mxu1  ;;  %v1139_v49 = vadd.f32 %v5587_v18, %v1038_v22 }
 0x1ea   : > { %v5637_v56 = vadd.f32 %v4139_v7, %v1140_v48  ;;  %4345 = vmatprep.mubr.msk.bf16.mxu0 %vm346_vm1, %v5240_v1  ;;  %v1145_v8 = vadd.f32 %v4110_v57, %v5587_v18 }
 0x1eb   : > { %v1473_v2 = vpop.f32.mrf.mxu0  ;;  %v1054_v20 = vpop.f32.mrf.mxu1 }
 0x1ec   : > { %v5642_v52 = vadd.f32 %v1473_v2, %v1138_v19 }
 0x1ed   : > { %v4140_v12 = vpop.f32.mrf.mxu0  ;;  %v4113_v24 = vpop.f32.mrf.mxu1  ;;  %4316 = vmatmul.mubr.msk.bf16.gmra.mxu1 %vm346_vm1, %v5242_v63  ;;  %v1142_v63 = vadd.f32 %v5587_v18, %v1051_v11 }
 0x1ee   : > { %v5647_v10 = vadd.f32 %v4140_v12, %v1141_v55  ;;  %4319 = vmatprep.mubr.msk.bf16.mxu1 %vm346_vm1, %v5244_v37  ;;  %v1148_v7 = vadd.f32 %v4113_v24, %v5587_v18  ;;  %v891_v12 = vld [vmem:[#allocation2 + $0x198] sm:$0xff] }
 0x1ef   : > { %v1476_v3 = vpop.f32.mrf.mxu0  ;;  %v1067_v1 = vpop.f32.mrf.mxu1 }
 0x1f0   : > { %v5652_v9 = vadd.f32 %v1476_v3, %v1139_v49  ;;  %v892_v49 = vld [vmem:[#allocation2 + $0x1a0] sm:$0xff] }
 0x1f1   : > { %v4143_v28 = vpop.f32.mrf.mxu0  ;;  %4346 = vmatmul.mubr.msk.bf16.gmra.mxu0 %vm346_vm1, %v5263_v21  ;;  %v4114_v5 = vpop.f32.mrf.mxu1  ;;  %v1143_v21 = vadd.f32 %v5587_v18, %v1054_v20 }
 0x1f2   : > { %v5657_v40 = vadd.f32 %v4143_v28, %v1144_v13  ;;  %4349 = vmatprep.mubr.msk.bf16.mxu0 %vm346_vm1, %v5277_v35  ;;  %v1149_v24 = vadd.f32 %v4114_v5, %v5587_v18 }
 0x1f3   : > { %v1489_v22 = vpop.f32.mrf.mxu0  ;;  %v1070_v37 = vpop.f32.mrf.mxu1 }
 0x1f4   : > { %v5662_v34 = vadd.f32 %v1489_v22, %v1142_v63 }
 0x1f5   : > { %v4144_v54 = vpop.f32.mrf.mxu0  ;;  %v4117_v62 = vpop.f32.mrf.mxu1  ;;  %4320 = vmatmul.mubr.msk.bf16.gmra.mxu1 %vm346_vm1, %v5272_v53  ;;  %v1146_v53 = vadd.f32 %v5587_v18, %v1067_v1 }
 0x1f6   : > { %v5667_v48 = vadd.f32 %v4144_v54, %v1145_v8  ;;  %4323 = vmatprep.mubr.msk.bf16.mxu1 %vm346_vm1, %v5279_v61  ;;  %v893_v8 = vld [vmem:[#allocation2 + $0x1a8] sm:$0x3]  ;;  %v1152_v5 = vadd.f32 %v4117_v62, %v5587_v18 }
 0x1f7   : > { %v1492_v11 = vpop.f32.mrf.mxu0  ;;  %v1083_v35 = vpop.f32.mrf.mxu1 }
 0x1f8   : > { %v5672_v19 = vadd.f32 %v1492_v11, %v1143_v21 }
 0x1f9   : > { %v4147_v57 = vpop.f32.mrf.mxu0  ;;  %4350 = vmatmul.mubr.msk.bf16.gmra.mxu0 %vm346_vm1, %v5292_v15  ;;  %v4118_v2 = vpop.f32.mrf.mxu1  ;;  %v1147_v15 = vadd.f32 %v5587_v18, %v1070_v37  ;;  %v1150_v37 = vadd.f32 %v5587_v18, %v1083_v35 }
 0x1fa   : > { %v5677_v55 = vadd.f32 %v4147_v57, %v1148_v7  ;;  %4353 = vmatprep.mubr.msk.bf16.mxu0 %vm346_vm1, %v5307_v60  ;;  %v5691_v60 = vpack.c.bf16 %v892_v49, %v891_v12 }
 0x1fb   : > { %v1505_v20 = vpop.f32.mrf.mxu0  ;;  %v1086_v61 = vpop.f32.mrf.mxu1 }
 0x1fc   : > { %v5682_v3 = vadd.f32 %v1505_v20, %v1146_v53  ;;  %v2748_v7 = vshll.u32 %v5691_v60, 16  ;;  %v1153_v53 = vadd.f32 %v4118_v2, %v5587_v18  ;;  %v2746_v35 = vshrl.u32 %v5691_v60, 16 }
 0x1fd   : > { %v4148_v13 = vpop.f32.mrf.mxu0  ;;  %v4121_v28 = vpop.f32.mrf.mxu1  ;;  %4324 = vmatmul.mubr.msk.bf16.gmra.mxu1 %vm346_vm1, %v5302_v4  ;;  %v1151_v49 = vadd.f32 %v5587_v18, %v1086_v61 }
 0x1fe   : > { %v5687_v1 = vadd.f32 %v4148_v13, %v1149_v24  ;;  %4327 = vmatprep.mubr.msk.bf16.mxu1 %vm346_vm1, %v5501_v47  ;;  %v5703_v47 = vpack.c.bf16 %v893_v8, %v893_v8  ;;  %v2750_v24 = vrot.slane %v2748_v7, 1 }
 0x1ff   : > { %v1508_v63 = vpop.f32.mrf.mxu0  ;;  %v1099_v22 = vpop.f32.mrf.mxu1 }
 0x200   : > { %v5694_v54 = vadd.f32 %v1508_v63, %v1147_v15  ;;  %v2753_v13 = vshll.u32 %v5703_v47, 16  ;;  %v1156_v63 = vadd.f32 %v4121_v28, %v5587_v18  ;;  %v1154_v61 = vadd.f32 %v5587_v18, %v1099_v22 }
 0x201   : > { %v4151_v21 = vpop.f32.mrf.mxu0  ;;  %4354 = vmatmul.mubr.msk.bf16.gmra.mxu0 %vm346_vm1, %v5320_v46  ;;  %v4122_v4 = vpop.f32.mrf.mxu1 }
 0x202   : > { %v5699_v11 = vadd.f32 %v4151_v21, %v1152_v5  ;;  %4357 = vmatprep.mubr.msk.bf16.mxu0 %vm346_vm1, %v5330_v45  ;;  %v2755_v7 = vrot.slane %v2753_v13, 1  ;;  %v1157_v28 = vadd.f32 %v4122_v4, %v5587_v18 }
 0x203   : > { %v1521_v57 = vpop.f32.mrf.mxu0  ;;  %v1102_v62 = vpop.f32.mrf.mxu1 }
 0x204   : > { %v5707_v20 = vadd.f32 %v1521_v57, %v1150_v37 }
 0x205   : > { %v4152_v12 = vpop.f32.mrf.mxu0  ;;  %v4125_v46 = vpop.f32.mrf.mxu1  ;;  %4328 = vmatmul.mubr.msk.bf16.gmra.mxu1 %vm346_vm1, %v5691_v60 }
 0x206   : > { %v5713_v45 = vadd.f32 %v4152_v12, %v1153_v53  ;;  %4367 = vmatprep.mubr.msk.bf16.mxu1 %vm346_vm1, %v5349_v58  ;;  %v2751_v58 = vor.u32 %v2750_v24, %v2746_v35  ;;  %v1160_v24 = vadd.f32 %v4125_v46, %v5587_v18 }
 0x207   : > { %v1524_v2 = vpop.f32.mrf.mxu0  ;;  %v1115_v15 = vpop.f32.mrf.mxu1 }
 0x208   : > { %v5719_v8 = vadd.f32 %v1524_v2, %v1151_v49 }
 0x209   : > { %v4155_v5 = vpop.f32.mrf.mxu0  ;;  %4358 = vmatmul.mubr.msk.bf16.gmra.mxu0 %vm346_vm1, %v5352_v25  ;;  %v4126_v21 = vpop.f32.mrf.mxu1  ;;  %v1155_v25 = vadd.f32 %v5587_v18, %v1102_v62 }
 0x20a   : > { %v5724_v37 = vadd.f32 %v4155_v5, %v1156_v63  ;;  %4361 = vmatprep.mubr.msk.bf16.mxu0 %vm346_vm1, %v5561_v33  ;;  %v2756_v63 = vsel %vm1178_vm3, %v2751_v58, %v2755_v7 }
 0x20b   : > { %v1537_v57 = vpop.f32.mrf.mxu0  ;;  %v1118_v53 = vpop.f32.mrf.mxu1 }
 0x20c   : > { %v5729_v12 = vadd.f32 %v1537_v57, %v1154_v61  ;;  %v1158_v61 = vadd.f32 %v5587_v18, %v1115_v15  ;;  %v1161_v57 = vadd.f32 %v4126_v21, %v5587_v18 }
 0x20d   : > { %v4156_v49 = vpop.f32.mrf.mxu0  ;;  %v4165_v2 = vpop.f32.mrf.mxu1  ;;  %4368 = vmatmul.mubr.msk.bf16.vlgmr.msra.gmra.mxu1 %vm346_vm1, %v5367_v16 }
 0x20e   : > { %v5734_v22 = vadd.f32 %v4156_v49, %v1157_v28  ;;  %v1896_v33 = vadd.f32 %v4165_v2, %v5595_v23  ;;  %4371 = vmatprep.mubr.msk.bf16.mxu1 %vm346_vm1, %v5372_v14  ;;  %v1159_v2 = vadd.f32 %v5587_v18, %v1118_v53 }
 0x20f   : > { %v1540_v35 = vpop.f32.mrf.mxu0  ;;  %v1767_v4 = vpop.f32.mrf.mxu1 }
 0x210   : > { %v5741_v13 = vadd.f32 %v1540_v35, %v1155_v25  ;;  %v1894_v5 = vadd.f32 %v1767_v4, %v5602_v6 }
 0x211   : > { %v4159_v16 = vpop.f32.mrf.mxu0  ;;  %4362 = vmatmul.mubr.msk.bf16.gmra.mxu0 %vm346_vm1, %v2756_v63  ;;  %v4166_v62 = vpop.f32.mrf.mxu1 }
 0x212   : > { %v5746_v58 = vadd.f32 %v4159_v16, %v1160_v24  ;;  %v1897_v23 = vadd.f32 %v4166_v62, %v5605_v43 }
 0x213   : > { %v1553_v7 = vpop.f32.mrf.mxu0  ;;  %v1770_v14 = vpop.f32.mrf.mxu1 }
 0x214   : > { %v5750_v28 = vadd.f32 %v1553_v7, %v1158_v61  ;;  %v1895_v46 = vadd.f32 %v1770_v14, %v5609_v36 }
 0x215   : > { %v4160_v49 = vpop.f32.mrf.mxu0  ;;  %v4169_v6 = vpop.f32.mrf.mxu1  ;;  %4372 = vmatmul.mubr.msk.bf16.gmra.mxu1 %vm346_vm1, %v5394_v17 }
 0x216   : > { %v5756_v15 = vadd.f32 %v4160_v49, %v1161_v57  ;;  %v1900_v25 = vadd.f32 %v4169_v6, %v5617_v59  ;;  %4375 = vmatprep.mubr.msk.bf16.mxu1 %vm346_vm1, %v5399_v32 }
 0x217   : > { %v1556_v43 = vpop.f32.mrf.mxu0  ;;  %v1783_v21 = vpop.f32.mrf.mxu1 }
 0x218   : > { %v5761_v63 = vadd.f32 %v1556_v43, %v1159_v2  ;;  %v1898_v36 = vadd.f32 %v1783_v21, %v5622_v30 }
 0x219   : > { %v4199_v35 = vpop.f32.mrf.mxu0  ;;  %v4170_v4 = vpop.f32.mrf.mxu1 }
 0x21a   : > { %v5764_v24 = vadd.f32 %v4199_v35, %v1896_v33  ;;  %v1901_v17 = vadd.f32 %v4170_v4, %v5627_v38 }
 0x21b   : > { %v1968_v18 = vpop.f32.mrf.mxu0  ;;  %v1786_v53 = vpop.f32.mrf.mxu1 }
 0x21c   : > { %v5767_v16 = vadd.f32 %v1968_v18, %v1894_v5  ;;  %v1899_v59 = vadd.f32 %v1786_v53, %v5632_v50 }
 0x21d   : > { %v4200_v62 = vpop.f32.mrf.mxu0  ;;  %v4173_v32 = vpop.f32.mrf.mxu1  ;;  %4376 = vmatmul.mubr.msk.bf16.gmra.mxu1 %vm346_vm1, %v5412_v39 }
 0x21e   : > { %v5772_v61 = vadd.f32 %v4200_v62, %v1897_v23  ;;  %v1904_v30 = vadd.f32 %v4173_v32, %v5637_v56  ;;  %4379 = vmatprep.mubr.msk.bf16.mxu1 %vm346_vm1, %v5417_v51 }
 0x21f   : > { %v1971_v33 = vpop.f32.mrf.mxu0  ;;  %v1799_v38 = vpop.f32.mrf.mxu1 }
 0x220   : > { %v5777_v7 = vadd.f32 %v1971_v33, %v1895_v46  ;;  %v1902_v5 = vadd.f32 %v1799_v38, %v5642_v52 }
 0x221   : > { %v4203_v14 = vpop.f32.mrf.mxu0  ;;  %v4174_v50 = vpop.f32.mrf.mxu1 }
 0x222   : > { %v5780_v57 = vadd.f32 %v4203_v14, %v1900_v25  ;;  %v1905_v49 = vadd.f32 %v4174_v50, %v5647_v10 }
 0x223   : > { %v1984_v39 = vpop.f32.mrf.mxu0  ;;  %v1802_v23 = vpop.f32.mrf.mxu1 }
 0x224   : > { %v5783_v6 = vadd.f32 %v1984_v39, %v1898_v36  ;;  %v1903_v56 = vadd.f32 %v1802_v23, %v5652_v9 }
 0x225   : > { %v4204_v2 = vpop.f32.mrf.mxu0  ;;  %v4177_v51 = vpop.f32.mrf.mxu1  ;;  %4380 = vmatmul.mubr.msk.bf16.gmra.mxu1 %vm346_vm1, %v5430_v29 }
 0x226   : > { %v5788_v46 = vadd.f32 %v4204_v2, %v1901_v17  ;;  %v1908_v52 = vadd.f32 %v4177_v51, %v5657_v40  ;;  %4383 = vmatprep.mubr.msk.bf16.mxu1 %vm346_vm1, %v5435_v0 }
 0x227   : > { %v1987_v25 = vpop.f32.mrf.mxu0  ;;  %v1815_v10 = vpop.f32.mrf.mxu1 }
 0x228   : > { %v5793_v43 = vadd.f32 %v1987_v25, %v1899_v59  ;;  %v1906_v21 = vadd.f32 %v1815_v10, %v5662_v34 }
 0x229   : > { %v4207_v36 = vpop.f32.mrf.mxu0  ;;  %v4178_v9 = vpop.f32.mrf.mxu1 }
 0x22a   : > { %v5796_v35 = vadd.f32 %v4207_v36, %v1904_v30  ;;  %v1909_v4 = vadd.f32 %v4178_v9, %v5667_v48 }
 0x22b   : > { %v2000_v29 = vpop.f32.mrf.mxu0  ;;  %v1818_v17 = vpop.f32.mrf.mxu1 }
 0x22c   : > { %v5799_v18 = vadd.f32 %v2000_v29, %v1902_v5  ;;  %v1907_v40 = vadd.f32 %v1818_v17, %v5672_v19 }
 0x22d   : > { %v4208_v53 = vpop.f32.mrf.mxu0  ;;  %v4181_v0 = vpop.f32.mrf.mxu1  ;;  %4384 = vmatmul.mubr.msk.bf16.gmra.mxu1 %vm346_vm1, %v5448_v41 }
 0x22e   : > { %v5804_v59 = vadd.f32 %v4208_v53, %v1905_v49  ;;  %v1912_v34 = vadd.f32 %v4181_v0, %v5677_v55  ;;  %4387 = vmatprep.mubr.msk.bf16.mxu1 %vm346_vm1, %v5453_v42 }
 0x22f   : > { %v2003_v62 = vpop.f32.mrf.mxu0  ;;  %v1831_v48 = vpop.f32.mrf.mxu1 }
 0x230   : > { %v5809_v32 = vadd.f32 %v2003_v62, %v1903_v56  ;;  %v1910_v30 = vadd.f32 %v1831_v48, %v5682_v3 }
 0x231   : > { %v4211_v33 = vpop.f32.mrf.mxu0  ;;  %v4182_v19 = vpop.f32.mrf.mxu1 }
 0x232   : > { %v5812_v38 = vadd.f32 %v4211_v33, %v1908_v52  ;;  %v1913_v5 = vadd.f32 %v4182_v19, %v5687_v1 }
 0x233   : > { %v2016_v41 = vpop.f32.mrf.mxu0  ;;  %v1834_v14 = vpop.f32.mrf.mxu1 }
 0x234   : > { %v5815_v50 = vadd.f32 %v2016_v41, %v1906_v21  ;;  %v1911_v55 = vadd.f32 %v1834_v14, %v5694_v54 }
 0x235   : > { %v4212_v49 = vpop.f32.mrf.mxu0  ;;  %v4185_v42 = vpop.f32.mrf.mxu1  ;;  %4388 = vmatmul.mubr.msk.bf16.gmra.mxu1 %vm346_vm1, %v5466_v27 }
 0x236   : > { %v5820_v39 = vadd.f32 %v4212_v49, %v1909_v4  ;;  %v1916_v3 = vadd.f32 %v4185_v42, %v5699_v11  ;;  %4391 = vmatprep.mubr.msk.bf16.mxu1 %vm346_vm1, %v5471_v26  ;;  %v2960_v4 = vrot.slane %v5703_v47, 1 }
 0x237   : > { %v2019_v23 = vpop.f32.mrf.mxu0  ;;  %v1847_v1 = vpop.f32.mrf.mxu1 }
 0x238   : > { %v5825_v56 = vadd.f32 %v2019_v23, %v1907_v40  ;;  %v1914_v2 = vadd.f32 %v1847_v1, %v5707_v20 }
 0x239   : > { %v4215_v51 = vpop.f32.mrf.mxu0  ;;  %v4186_v54 = vpop.f32.mrf.mxu1 }
 0x23a   : > { %v5828_v52 = vadd.f32 %v4215_v51, %v1912_v34  ;;  %v1917_v25 = vadd.f32 %v4186_v54, %v5713_v45  ;;  %v2959_v45 = vrot.slane %v5691_v60, 1 }
 0x23b   : > { %v2032_v27 = vpop.f32.mrf.mxu0  ;;  %v1850_v10 = vpop.f32.mrf.mxu1 }
 0x23c   : > { %v5831_v21 = vadd.f32 %v2032_v27, %v1910_v30  ;;  %v1915_v11 = vadd.f32 %v1850_v10, %v5719_v8 }
 0x23d   : > { %v4216_v36 = vpop.f32.mrf.mxu0  ;;  %v4189_v26 = vpop.f32.mrf.mxu1  ;;  %4392 = vmatmul.mubr.msk.bf16.gmra.mxu1 %vm346_vm1, %v5482_v44 }
 0x23e   : > { %v5836_v9 = vadd.f32 %v4216_v36, %v1913_v5  ;;  %v1920_v20 = vadd.f32 %v4189_v26, %v5724_v37  ;;  %4395 = vmatprep.mubr.msk.bf16.mxu1 %vm346_vm1, %v5578_v31  ;;  %v2961_v37 = vsel %vm1632_vm4, %v2959_v45, %v2960_v4 }
 0x23f   : > { %v2035_v29 = vpop.f32.mrf.mxu0  ;;  %v1863_v17 = vpop.f32.mrf.mxu1 }
 0x240   : > { %v5843_v40 = vadd.f32 %v2035_v29, %v1911_v55  ;;  %v1918_v8 = vadd.f32 %v1863_v17, %v5729_v12 }
 0x241   : > { %v4219_v53 = vpop.f32.mrf.mxu0  ;;  %v4190_v0 = vpop.f32.mrf.mxu1 }
 0x242   : > { %v5846_v44 = vadd.f32 %v4219_v53, %v1916_v3  ;;  %v1921_v34 = vadd.f32 %v4190_v0, %v5734_v22 }
 0x243   : > { %v2048_v62 = vpop.f32.mrf.mxu0  ;;  %v1866_v31 = vpop.f32.mrf.mxu1 }
 0x244   : > { %v5850_v48 = vadd.f32 %v2048_v62, %v1914_v2  ;;  %v1919_v60 = vadd.f32 %v1866_v31, %v5741_v13 }
 0x245   : > { %v4220_v47 = vpop.f32.mrf.mxu0  ;;  %v4193_v30 = vpop.f32.mrf.mxu1  ;;  %4396 = vmatmul.mubr.msk.bf16.gmra.mxu1 %vm346_vm1, %v2961_v37 }
 0x246   : > { %v5854_v33 = vadd.f32 %v4220_v47, %v1917_v25  ;;  %v1924_v12 = vadd.f32 %v4193_v30, %v5746_v58 }
 0x247   : > { %v2051_v19 = vpop.f32.mrf.mxu0  ;;  %v1879_v5 = vpop.f32.mrf.mxu1 }
 0x248   : > { %v5857_v41 = vadd.f32 %v2051_v19, %v1915_v11  ;;  %v1922_v22 = vadd.f32 %v1879_v5, %v5750_v28 }
 0x249   : > { %v4223_v14 = vpop.f32.mrf.mxu0  ;;  %v4194_v55 = vpop.f32.mrf.mxu1 }
 0x24a   : > { %v5860_v49 = vadd.f32 %v4223_v14, %v1920_v20  ;;  %v1925_v13 = vadd.f32 %v4194_v55, %v5756_v15 }
 0x24b   : > { %v2064_v42 = vpop.f32.mrf.mxu0  ;;  %v1882_v3 = vpop.f32.mrf.mxu1 }
 0x24c   : > { %v5863_v23 = vadd.f32 %v2064_v42, %v1918_v8  ;;  %v1923_v1 = vadd.f32 %v1882_v3, %v5761_v63 }
 0x24d   : > { %v4224_v2 = vpop.f32.mrf.mxu0  ;;  %v4233_v58 = vpop.f32.mrf.mxu1 }
 0x24e   : > { %v5866_v51 = vadd.f32 %v4224_v2, %v1921_v34  ;;  %v5869_v54 = vadd.f32 %v4233_v58, %v5764_v24 }
 0x24f   : > { %v2067_v28 = vpop.f32.mrf.mxu0  ;;  %v2180_v25 = vpop.f32.mrf.mxu1 }
 0x250   : > { %v5871_v27 = vadd.f32 %v2067_v28, %v1919_v60  ;;  %v5874_v10 = vadd.f32 %v2180_v25, %v5767_v16 }
 0x251   : > { %v4227_v15 = vpop.f32.mrf.mxu0  ;;  %v4234_v11 = vpop.f32.mrf.mxu1 }
 0x252   : > { %v5876_v36 = vadd.f32 %v4227_v15, %v1924_v12  ;;  %v5879_v63 = vadd.f32 %v4234_v11, %v5772_v61 }
 0x253   : > { %v2080_v26 = vpop.f32.mrf.mxu0  ;;  %v2183_v20 = vpop.f32.mrf.mxu1 }
 0x254   : > { %v5881_v45 = vadd.f32 %v2080_v26, %v1922_v22  ;;  %v5884_v24 = vadd.f32 %v2183_v20, %v5777_v7 }
 0x255   : > { %v4228_v4 = vpop.f32.mrf.mxu0  ;;  %v4237_v29 = vpop.f32.mrf.mxu1 }
 0x256   : > { %v5886_v17 = vadd.f32 %v4228_v4, %v1925_v13  ;;  %v5889_v16 = vadd.f32 %v4237_v29, %v5780_v57 }
 0x257   : > { %v2083_v8 = vpop.f32.mrf.mxu0  ;;  %v2196_v53 = vpop.f32.mrf.mxu1 }
 0x258   : > { %v5891_v0 = vadd.f32 %v2083_v8, %v1923_v1  ;;  %v5894_v61 = vadd.f32 %v2196_v53, %v5783_v6 }
 0x259   : > { %v5896_v34 = vpop.f32.mrf.mxu0  ;;  %v4238_v37 = vpop.f32.mrf.mxu1 }
 0x25a   : > { %v5899_v7 = vadd.f32 %v4238_v37, %v5788_v46 }
 0x25b   : > { %v5901_v62 = vpop.f32.mrf.mxu0  ;;  %v2199_v31 = vpop.f32.mrf.mxu1 }
 0x25c   : > { %v5904_v60 = vadd.f32 %v2199_v31, %v5793_v43 }
 0x25d   : > { %v5906_v57 = vpop.f32.mrf.mxu0  ;;  %v4241_v47 = vpop.f32.mrf.mxu1 }
 0x25e   : > { %v5909_v30 = vadd.f32 %v4241_v47, %v5796_v35 }
 0x25f   : > { %v5911_v6 = vpop.f32.mrf.mxu0  ;;  %v2212_v12 = vpop.f32.mrf.mxu1 }
 0x260   : > { %v5914_v19 = vadd.f32 %v2212_v12, %v5799_v18 }
 0x261   : > { %v5916_v46 = vpop.f32.mrf.mxu0  ;;  %v4242_v5 = vpop.f32.mrf.mxu1 }
 0x262   : > { %v5919_v22 = vadd.f32 %v4242_v5, %v5804_v59 }
 0x263   : > { %v5921_v43 = vpop.f32.mrf.mxu0  ;;  %v2215_v14 = vpop.f32.mrf.mxu1 }
 0x264   : > { %v5924_v55 = vadd.f32 %v2215_v14, %v5809_v32 }
 0x265   : > { %v5926_v35 = vpop.f32.mrf.mxu0  ;;  %v4245_v13 = vpop.f32.mrf.mxu1 }
 0x266   : > { %v5929_v42 = vadd.f32 %v4245_v13, %v5812_v38 }
 0x267   : > { %v5931_v18 = vpop.f32.mrf.mxu0  ;;  %v2228_v3 = vpop.f32.mrf.mxu1 }
 0x268   : > { %v5934_v1 = vadd.f32 %v2228_v3, %v5815_v50 }
 0x269   : > { %v5936_v59 = vpop.f32.mrf.mxu0  ;;  %v4246_v2 = vpop.f32.mrf.mxu1 }
 0x26a   : > { %v5939_v58 = vadd.f32 %v4246_v2, %v5820_v39 }
 0x26b   : > { %v5941_v32 = vpop.f32.mrf.mxu0  ;;  %v2231_v28 = vpop.f32.mrf.mxu1 }
 0x26c   : > { %v5944_v25 = vadd.f32 %v2231_v28, %v5825_v56 }
 0x26d   : > { %v5946_v38 = vpop.f32.mrf.mxu0  ;;  %v4249_v15 = vpop.f32.mrf.mxu1 }
 0x26e   : > { %v5949_v11 = vadd.f32 %v4249_v15, %v5828_v52 }
 0x26f   : > { %v5951_v50 = vpop.f32.mrf.mxu0  ;;  %v2244_v26 = vpop.f32.mrf.mxu1 }
 0x270   : > { %v5954_v20 = vadd.f32 %v2244_v26, %v5831_v21 }
 0x271   : > { %v5956_v39 = vpop.f32.mrf.mxu0  ;;  %v4250_v4 = vpop.f32.mrf.mxu1 }
 0x272   : > { %v5959_v29 = vadd.f32 %v4250_v4, %v5836_v9 }
 0x273   : > { %v5961_v56 = vpop.f32.mrf.mxu0  ;;  %v2247_v8 = vpop.f32.mrf.mxu1 }
 0x274   : > { %v5964_v53 = vadd.f32 %v2247_v8, %v5843_v40 }
 0x275   : > { %v5966_v52 = vpop.f32.mrf.mxu0  ;;  %v4253_v37 = vpop.f32.mrf.mxu1 }
 0x276   : > { %6633 = vst [vmem:[#allocation3_spill] sm:$0xff] %v5964_v53  ;;  %v5969_v31 = vadd.f32 %v4253_v37, %v5846_v44 }
 0x277   : > { %v5971_v21 = vpop.f32.mrf.mxu0  ;;  %v2260_v47 = vpop.f32.mrf.mxu1 }
 0x278   : > { %6634 = vst [vmem:[#allocation4_spill] sm:$0xff] %v5969_v31  ;;  %v2327_v12 = vadd.f32 %v2260_v47, %v5850_v48 }
 0x279   : > { %v5974_v5 = vpop.f32.mrf.mxu0  ;;  %v4254_v9 = vpop.f32.mrf.mxu1 }
 0x27a   : > { %v2330_v14 = vadd.f32 %v4254_v9, %v5854_v33 }
 0x27b   : > { %v5977_v13 = vpop.f32.mrf.mxu0  ;;  %v2263_v40 = vpop.f32.mrf.mxu1 }
 0x27c   : > { %v2328_v3 = vadd.f32 %v2263_v40, %v5857_v41 }
 0x27d   : > { %v5980_v2 = vpop.f32.mrf.mxu0  ;;  %v4257_v28 = vpop.f32.mrf.mxu1 }
 0x27e   : > { %6635 = vst [vmem:[#allocation5_spill] sm:$0xff] %v5980_v2  ;;  %v2333_v44 = vadd.f32 %v4257_v28, %v5860_v49 }
 0x27f   : > { %v5983_v15 = vpop.f32.mrf.mxu0  ;;  %v2276_v26 = vpop.f32.mrf.mxu1 }
 0x280   : > { %6636 = vst [vmem:[#allocation6_spill] sm:$0xff] %v5983_v15  ;;  %v2331_v48 = vadd.f32 %v2276_v26, %v5863_v23 }
 0x281   : > { %v5986_v4 = vpop.f32.mrf.mxu0  ;;  %v4258_v8 = vpop.f32.mrf.mxu1 }
 0x282   : > { %6637 = vst [vmem:[#allocation7_spill] sm:$0xff] %v5986_v4  ;;  %v2334_v33 = vadd.f32 %v4258_v8, %v5866_v51 }
 0x283   : > { %v2465_v37 = vpop.f32.mrf.mxu0  ;;  %v2279_v47 = vpop.f32.mrf.mxu1 }
 0x284   : > { %v5989_v9 = vadd.f32 %v2465_v37, %v2327_v12  ;;  %v2332_v41 = vadd.f32 %v2279_v47, %v5871_v27 }
 0x285   : > { %v4288_v40 = vpop.f32.mrf.mxu0  ;;  %v4261_v31 = vpop.f32.mrf.mxu1 }
 0x286   : > { %v5992_v53 = vadd.f32 %v4288_v40, %v2330_v14  ;;  %v2337_v49 = vadd.f32 %v4261_v31, %v5876_v36 }
 0x287   : > { %v2468_v28 = vpop.f32.mrf.mxu0  ;;  %v2292_v15 = vpop.f32.mrf.mxu1 }
 0x288   : > { %v5995_v23 = vadd.f32 %v2468_v28, %v2328_v3  ;;  %v2335_v26 = vadd.f32 %v2292_v15, %v5881_v45 }
 0x289   : > { %v4291_v4 = vpop.f32.mrf.mxu0  ;;  %v4262_v51 = vpop.f32.mrf.mxu1 }
 0x28a   : > { %v5998_v8 = vadd.f32 %v4291_v4, %v2333_v44  ;;  %v2338_v12 = vadd.f32 %v4262_v51, %v5886_v17 }
 0x28b   : > { %v2481_v37 = vpop.f32.mrf.mxu0  ;;  %v2295_v27 = vpop.f32.mrf.mxu1 }
 0x28c   : > { %v6001_v47 = vadd.f32 %v2481_v37, %v2331_v48  ;;  %v2336_v14 = vadd.f32 %v2295_v27, %v5891_v0 }
 0x28d   : > { %v4292_v40 = vpop.f32.mrf.mxu0  ;;  %v6004_v36 = vpop.f32.mrf.mxu1 }
 0x28e   : > { %v2539_v31 = vadd.f32 %v4292_v40, %v2334_v33 }
 0x28f   : > { %v2484_v3 = vpop.f32.mrf.mxu0  ;;  %v6006_v28 = vpop.f32.mrf.mxu1 }
 0x290   : > { %v2537_v45 = vadd.f32 %v2484_v3, %v2332_v41 }
 0x291   : > { %v4295_v15 = vpop.f32.mrf.mxu0  ;;  %v6008_v2 = vpop.f32.mrf.mxu1 }
 0x292   : > { %v6010_v44 = vadd.f32 %v4295_v15, %v2337_v49 }
 0x293   : > { %v2497_v17 = vpop.f32.mrf.mxu0  ;;  %v6012_v4 = vpop.f32.mrf.mxu1 }
 0x294   : > { %6638 = vst [vmem:[#allocation8_spill] sm:$0xff] %v6012_v4  ;;  %v6014_v48 = vadd.f32 %v2497_v17, %v2335_v26 }
 0x295   : > { %v4296_v51 = vpop.f32.mrf.mxu0  ;;  %v6016_v0 = vpop.f32.mrf.mxu1 }
 0x296   : > { %6639 = vst [vmem:[#allocation9_spill] sm:$0xff] %v6016_v0  ;;  %v6018_v37 = vadd.f32 %v4296_v51, %v2338_v12 }
 0x297   : > { %v2500_v33 = vpop.f32.mrf.mxu0  ;;  %v6020_v27 = vpop.f32.mrf.mxu1 }
 0x298   : > { %6640 = vst [vmem:[#allocation10_spill] sm:$0xff] %v6020_v27  ;;  %v6022_v40 = vadd.f32 %v2500_v33, %v2336_v14 }
 0x299   : > { %v6024_v41 = vpop.f32.mrf.mxu0  ;;  %v6026_v3 = vpop.f32.mrf.mxu1 }
 0x29a   : > { %6641 = vst [vmem:[#allocation11_spill] sm:$0xff] %v6026_v3 }
 0x29b   : > { %v6028_v49 = vpop.f32.mrf.mxu0  ;;  %v6030_v15 = vpop.f32.mrf.mxu1 }
 0x29c   : > { %6642 = vst [vmem:[#allocation12_spill] sm:$0xff] %v6030_v15 }
 0x29d   : > { %v6032_v26 = vpop.f32.mrf.mxu0  ;;  %v6034_v17 = vpop.f32.mrf.mxu1 }
 0x29e   : > { %6643 = vst [vmem:[#allocation13_spill] sm:$0xff] %v6032_v26  ;;  %6644 = vst [vmem:[#allocation14_spill] sm:$0xff] %v6034_v17 }
 0x29f   : > { %v6036_v0 = vpop.f32.mrf.mxu0  ;;  %v6038_v12 = vpop.f32.mrf.mxu1 }
 0x2a0   : > { %6645 = vst [vmem:[#allocation15_spill] sm:$0xff] %v6036_v0  ;;  %6646 = vst [vmem:[#allocation16_spill] sm:$0xff] %v6038_v12 }
 0x2a1   : > { %v6040_v51 = vpop.f32.mrf.mxu0  ;;  %v6042_v14 = vpop.f32.mrf.mxu1 }
 0x2a2   : > { %6647 = vst [vmem:[#allocation17_spill] sm:$0xff] %v6040_v51  ;;  %6648 = vst [vmem:[#allocation18_spill] sm:$0xff] %v6042_v14 }
 0x2a3   : > { %v6044_v33 = vpop.f32.mrf.mxu0  ;;  %v6046_v27 = vpop.f32.mrf.mxu1 }
 0x2a4   : > { %6649 = vst [vmem:[#allocation19_spill] sm:$0xff] %v6044_v33  ;;  %6650 = vst [vmem:[#allocation20_spill] sm:$0xff] %v6046_v27 }
 0x2a5   : > { %v6048_v3 = vpop.f32.mrf.mxu0  ;;  %v6050_v4 = vpop.f32.mrf.mxu1 }
 0x2a6   : > { %6651 = vst [vmem:[#allocation21_spill] sm:$0xff] %v6048_v3  ;;  %6652 = vst [vmem:[#allocation22_spill] sm:$0xff] %v6050_v4 }
 0x2a7   : > { %v6052_v15 = vpop.f32.mrf.mxu0  ;;  %v6054_v26 = vpop.f32.mrf.mxu1 }
 0x2a8   : > { %6653 = vst [vmem:[#allocation23_spill] sm:$0xff] %v6052_v15  ;;  %6654 = vst [vmem:[#allocation24_spill] sm:$0xff] %v6054_v26 }
 0x2a9   : > { %v6056_v17 = vpop.f32.mrf.mxu0  ;;  %v6058_v0 = vpop.f32.mrf.mxu1 }
 0x2aa   : > { %6655 = vst [vmem:[#allocation25_spill] sm:$0xff] %v6056_v17  ;;  %6656 = vst [vmem:[#allocation26_spill] sm:$0xff] %v6058_v0 }
 0x2ab   : > { %v6060_v12 = vpop.f32.mrf.mxu0  ;;  %v6062_v51 = vpop.f32.mrf.mxu1 }
 0x2ac   : > { %6657 = vst [vmem:[#allocation27_spill] sm:$0xff] %v6060_v12  ;;  %6658 = vst [vmem:[#allocation28_spill] sm:$0xff] %v6062_v51 }
 0x2ad   : > { %v6064_v14 = vpop.f32.mrf.mxu0  ;;  %v6066_v33 = vpop.f32.mrf.mxu1 }
 0x2ae   : > { %6659 = vst [vmem:[#allocation29_spill] sm:$0xff] %v6064_v14  ;;  %6660 = vst [vmem:[#allocation30_spill] sm:$0xff] %v6066_v33 }
 0x2af   : > { %v6068_v27 = vpop.f32.mrf.mxu0  ;;  %v6070_v3 = vpop.f32.mrf.mxu1 }
 0x2b0   : > { %6661 = vst [vmem:[#allocation31_spill] sm:$0xff] %v6068_v27  ;;  %6662 = vst [vmem:[#allocation32_spill] sm:$0xff] %v6070_v3 }
 0x2b1   : > { %v6072_v4 = vpop.f32.mrf.mxu0  ;;  %v6074_v15 = vpop.f32.mrf.mxu1 }
 0x2b2   : > { %6663 = vst [vmem:[#allocation33_spill] sm:$0xff] %v6072_v4  ;;  %6664 = vst [vmem:[#allocation34_spill] sm:$0xff] %v6074_v15 }
 0x2b3   : > { %v6076_v26 = vpop.f32.mrf.mxu0  ;;  %v6078_v17 = vpop.f32.mrf.mxu1 }
 0x2b4   : > { %6665 = vst [vmem:[#allocation35_spill] sm:$0xff] %v6076_v26  ;;  %6666 = vst [vmem:[#allocation36_spill] sm:$0xff] %v6078_v17 }
 0x2b5   : > { %v6080_v0 = vpop.f32.mrf.mxu0  ;;  %v6082_v12 = vpop.f32.mrf.mxu1 }
 0x2b6   : > { %6667 = vst [vmem:[#allocation37_spill] sm:$0xff] %v6080_v0  ;;  %6668 = vst [vmem:[#allocation38_spill] sm:$0xff] %v6082_v12 }
 0x2b7   : > { %v6084_v51 = vpop.f32.mrf.mxu0  ;;  %v2666_v14 = vpop.f32.mrf.mxu1 }
 0x2b8   : > { %6669 = vst [vmem:[#allocation39_spill] sm:$0xff] %v6084_v51  ;;  %v6087_v33 = vadd.f32 %v2666_v14, %v5989_v9 }
 0x2b9   : > { %v6089_v27 = vpop.f32.mrf.mxu0  ;;  %v4322_v3 = vpop.f32.mrf.mxu1 }
 0x2ba   : > { %6670 = vst [vmem:[#allocation40_spill] sm:$0xff] %v6087_v33  ;;  %v6092_v4 = vadd.f32 %v4322_v3, %v5992_v53 }
 0x2bb   : > { %v6094_v15 = vpop.f32.mrf.mxu0  ;;  %v2669_v17 = vpop.f32.mrf.mxu1 }
 0x2bc   : > { %6671 = vst [vmem:[#allocation41_spill] sm:$0xff] %v6092_v4  ;;  %6672 = vst [vmem:[#allocation42_spill] sm:$0xff] %v6094_v15  ;;  %v6097_v0 = vadd.f32 %v2669_v17, %v5995_v23 }
 0x2bd   : > { %v6099_v12 = vpop.f32.mrf.mxu0  ;;  %v4325_v51 = vpop.f32.mrf.mxu1 }
 0x2be   : > { %6673 = vst [vmem:[#allocation43_spill] sm:$0xff] %v6097_v0  ;;  %v6102_v26 = vadd.f32 %v4325_v51, %v5998_v8  ;;  %v6116_v0 = vld [vmem:[%s4782_s25] sm:$0xff]  }
 0x2bf   : > { %v2682_v9 = vpop.f32.mrf.mxu1  ;;  %v6104_v14 = vpop.f32.mrf.mxu0 }
 0x2c0   : > { %6674 = vst [vmem:[#allocation44_spill] sm:$0xff] %v6102_v26  ;;  %v6107_v33 = vadd.f32 %v2682_v9, %v6001_v47  ;;  %v2514_v47 = vadd.f32 %v5896_v34, %v5869_v54 }
 0x2c1   : > { %v4326_v53 = vpop.f32.mrf.mxu1  ;;  %v6111_v15 = vpop.f32.mrf.mxu0 }
 0x2c2   : > { %v6109_v3 = vadd.f32 %v4326_v53, %v2539_v31  ;;  %v2512_v31 = vadd.f32 %v5901_v62, %v5874_v10  ;;  %v2518_v53 = vadd.f32 %v5916_v46, %v5889_v16  ;;  %v6154_v16 = vadd.f32 %v5941_v32, %v5914_v19 }
 0x2c3   : > { %v2685_v4 = vpop.f32.mrf.mxu1  ;;  %v6139_v54 = vpop.f32.mrf.mxu0  ;;  %v6166_v62 = vadd.f32 %v5956_v39, %v5929_v42  ;;  %v6182_v19 = vadd.f32 %v5971_v21, %v5944_v25  ;;  %v6676_v39 = vld [vmem:[#allocation3_spill] sm:$0xff] }
 0x2c4   : > { %v6113_v23 = vadd.f32 %v2685_v4, %v2537_v45  ;;  %v2515_v45 = vadd.f32 %v5906_v57, %v5879_v63  ;;  %v2513_v4 = vadd.f32 %v5911_v6, %v5884_v24  ;;  %v6146_v63 = vadd.f32 %v5931_v18, %v5904_v60 }
 0x2c5   : > { %v4329_v17 = vpop.f32.mrf.mxu1  ;;  %v6150_v24 = vadd.f32 %v5936_v59, %v5909_v30  ;;  %v2715_v60 = vadd.f32 %v6004_v36, %v2514_v47  ;;  %v6174_v30 = vadd.f32 %v5961_v56, %v5934_v1  ;;  %v6178_v6 = vadd.f32 %v5966_v52, %v5939_v58  ;;  %v6194_v18 = vpop.f32.mrf.mxu0  ;;  %v6675_v58 = vld [vmem:[#allocation5_spill] sm:$0xff]  ;;  %v6677_v56 = vld [vmem:[#allocation6_spill] sm:$0xff] }
 0x2c6   : > { %v6121_v26 = vadd.f32 %v4329_v17, %v6010_v44  ;;  %v2516_v44 = vadd.f32 %v5921_v43, %v5894_v61  ;;  %v6137_v17 = vadd.f32 %v5926_v35, %v5899_v7  ;;  %v6158_v61 = vadd.f32 %v5946_v38, %v5919_v22  ;;  %v6185_v22 = vld [vmem:[%s4782_s25 + $0x8] sm:$0xff]   ;;  %v6680_v47 = vld [vmem:[#allocation13_spill] sm:$0xff]  ;;  %v6697_v38 = vld [vmem:[#allocation23_spill] sm:$0xff] }
 0x2c7   : > { %v2698_v9 = vpop.f32.mrf.mxu1  ;;  %v6162_v7 = vadd.f32 %v5951_v50, %v5924_v55  ;;  %v6190_v55 = vadd.f32 %v5974_v5, %v5949_v11  ;;  %v2713_v35 = vadd.f32 %v6006_v28, %v2512_v31  ;;  %v2927_v42 = vadd.f32 %v6024_v41, %v2715_v60  ;;  %v6209_v11 = vld [vmem:[%s4782_s25 + $0x18] sm:$0xff]   ;;  %v6231_v31 = vpop.f32.mrf.mxu0  ;;  %v6691_v50 = vld [vmem:[#allocation14_spill] sm:$0xff] }
 0x2c8   : > { %v6142_v10 = vadd.f32 %v2698_v9, %v6014_v48  ;;  %v6201_v59 = vadd.f32 %v5977_v13, %v5954_v20  ;;  %v6205_v32 = vadd.f32 %v6675_v58, %v5959_v29  ;;  %v6214_v52 = vadd.f32 %v6677_v56, %v6676_v39  ;;  %v6678_v29 = vld [vmem:[#allocation4_spill] sm:$0xff]  ;;  %v6679_v13 = vld [vmem:[#allocation7_spill] sm:$0xff]  ;;  %v6237_v9 = vld [vmem:[%s4782_s25 + $0x28] sm:$0xff]  }
 0x2c9   : > { %v4330_v34 = vpop.f32.mrf.mxu1  ;;  %v2716_v21 = vadd.f32 %v6008_v2, %v2515_v45  ;;  %v2925_v20 = vadd.f32 %v6028_v49, %v2713_v35  ;;  %v6222_v36 = vadd.f32 %v6679_v13, %v6678_v29  ;;  %v6225_v48 = vld [vmem:[%s4782_s25 + $0x10] sm:$0xff]   ;;  %v6681_v60 = vld [vmem:[#allocation8_spill] sm:$0xff]  ;;  %v6682_v56 = vld [vmem:[#allocation9_spill] sm:$0xff]  ;;  %v2723_v51 = vadd.f32 %v6691_v50, %v6150_v24 }
 0x2ca   : > { %v6170_v57 = vadd.f32 %v4330_v34, %v6018_v37  ;;  %v6684_v34 = vld [vmem:[#allocation15_spill] sm:$0xff]  ;;  %v6254_v41 = vld [vmem:[%s4782_s25 + $0x38] sm:$0xff]   ;;  %v6693_v58 = vld [vmem:[#allocation21_spill] sm:$0xff] }
 0x2cb   : > { %v2701_v46 = vpop.f32.mrf.mxu1  ;;  %v2928_v2 = vadd.f32 %v6680_v47, %v2716_v21  ;;  %v2719_v21 = vadd.f32 %v6682_v56, %v2518_v53  ;;  %6685 = vst [vmem:[#allocation5_spill] sm:$0xff] %v6254_v41  ;;  %v6689_v39 = vld [vmem:[#allocation19_spill] sm:$0xff]  ;;  %v6695_v24 = vld [vmem:[#allocation18_spill] sm:$0xff] }
 0x2cc   : > { %v6197_v1 = vadd.f32 %v2701_v46, %v6022_v40  ;;  %v2714_v46 = vadd.f32 %v6681_v60, %v2513_v4  ;;  %v6258_v40 = vld [vmem:[%s4782_s25 + $0x30] sm:$0xff]   ;;  %v2724_v50 = vadd.f32 %v6695_v24, %v6158_v61  ;;  %v6699_v43 = vld [vmem:[#allocation22_spill] sm:$0xff] }
 0x2cd   : > { %v4369_v25 = vpop.f32.mrf.mxu1  ;;  %6686 = vst [vmem:[#allocation3_spill] sm:$0xff] %v6258_v40 }
 0x2ce   : > { %v6218_v5 = vadd.f32 %v4369_v25, %v2927_v42  ;;  %v6242_v42 = vld [vmem:[%s4782_s25 + $0x20] sm:$0xff]   ;;  %v2926_v4 = vadd.f32 %v6684_v34, %v2714_v46  ;;  %v6688_v34 = vld [vmem:[#allocation11_spill] sm:$0xff] }
 0x2cf   : > { %v3003_v28 = vpop.f32.mrf.mxu1  ;;  %v6687_v25 = vld [vmem:[#allocation17_spill] sm:$0xff]  ;;  %v2720_v46 = vadd.f32 %v6688_v34, %v6137_v17 }
 0x2d0   : > { %v3164_v49 = vsub.f32 0.0, %v6218_v5  ;;  %v6234_v45 = vadd.f32 %v3003_v28, %v2925_v20  ;;  %v6683_v28 = vld [vmem:[#allocation10_spill] sm:$0xff]  ;;  %v2931_v53 = vadd.f32 %v6687_v25, %v2719_v21 }
 0x2d1   : > { %v4370_v35 = vpop.f32.mrf.mxu1  ;;  %v2717_v47 = vadd.f32 %v6683_v28, %v2516_v44  ;;  %v2932_v28 = vadd.f32 %v6693_v58, %v2720_v46 }
 0x2d2   : > { %v3198_v20 = vmul.f32 1.442695, %v3164_v49  ;;  %v3162_v29 = vsub.f32 0.0, %v6234_v45  ;;  %v6249_v13 = vadd.f32 %v4370_v35, %v2928_v2  ;;  %v6262_v49 = vpop.f32.mrf.mxu0 }
 0x2d3   : > { %v3006_v60 = vpop.f32.mrf.mxu1  ;;  %v2929_v37 = vadd.f32 %v6689_v39, %v2717_v47 }
 0x2d4   : > { %4578 = vpow2.f32 %v3198_v20  ;;  %v3194_v2 = vmul.f32 1.442695, %v3162_v29  ;;  %v3165_v44 = vsub.f32 0.0, %v6249_v13  ;;  %v6267_v35 = vadd.f32 %v3006_v60, %v2926_v4  ;;  %v6690_v20 = vld [vmem:[#allocation12_spill] sm:$0xff]  ;;  %v6280_v60 = vld [vmem:[%s4782_s25 + $0x48] sm:$0xff]   ;;  %v6284_v39 = vpop.f32.mrf.mxu0 }
 0x2d5   : > { %v4373_v56 = vpop.f32.mrf.mxu1  ;;  %v2718_v29 = vadd.f32 %v6690_v20, %v6146_v63  ;;  %6692 = vst [vmem:[#allocation6_spill] sm:$0xff] %v6280_v60  ;;  %v6694_v63 = vld [vmem:[#allocation16_spill] sm:$0xff] }
 0x2d6   : > { %4580 = vpow2.f32 %v3194_v2  ;;  %v3200_v25 = vmul.f32 1.442695, %v3165_v44  ;;  %v6272_v21 = vadd.f32 %v4373_v56, %v2931_v53  ;;  %v3163_v17 = vsub.f32 0.0, %v6267_v35  ;;  %v6696_v44 = vld [vmem:[#allocation20_spill] sm:$0xff] }
 0x2d7   : > { %v3019_v4 = vpop.f32.mrf.mxu1  ;;  %v2721_v2 = vadd.f32 %v6694_v63, %v6154_v16  ;;  %v2722_v56 = vadd.f32 %v6696_v44, %v6162_v7  ;;  %v2930_v58 = vadd.f32 %v6697_v38, %v2718_v29  ;;  %v2727_v16 = vadd.f32 %v6699_v43, %v6166_v62  ;;  %v6700_v63 = vld [vmem:[#allocation24_spill] sm:$0xff]  ;;  %v6304_v7 = vpop.f32.mrf.mxu0  ;;  %v6703_v44 = vld [vmem:[#allocation26_spill] sm:$0xff] }
 0x2d8   : > { %4582 = vpow2.f32 %v3200_v25  ;;  %v3168_v47 = vsub.f32 0.0, %v6272_v21  ;;  %v6287_v53 = vadd.f32 %v3019_v4, %v2929_v37  ;;  %v3196_v20 = vmul.f32 1.442695, %v3163_v17  ;;  %v6698_v37 = vld [vmem:[#allocation25_spill] sm:$0xff]  ;;  %v6704_v43 = vld [vmem:[#allocation28_spill] sm:$0xff] }
 0x2d9   : > { %v4374_v34 = vpop.f32.mrf.mxu1  ;;  %v2935_v4 = vadd.f32 %v6698_v37, %v2723_v51  ;;  %v2725_v61 = vadd.f32 %v6700_v63, %v6174_v30  ;;  %v2728_v62 = vadd.f32 %v6703_v44, %v6178_v6  ;;  %v2726_v30 = vadd.f32 %v6704_v43, %v6182_v19  ;;  %v6705_v63 = vld [vmem:[#allocation31_spill] sm:$0xff]  ;;  %v6324_v44 = vpop.f32.mrf.mxu0 }
 0x2da   : > { %v3206_v46 = vmul.f32 1.442695, %v3168_v47  ;;  %v3166_v25 = vsub.f32 0.0, %v6287_v53  ;;  %v6297_v8 = vadd.f32 %v4374_v34, %v2932_v28  ;;  %4584 = vpow2.f32 %v3196_v20  ;;  %v6701_v28 = vld [vmem:[#allocation27_spill] sm:$0xff]  ;;  %v6702_v47 = vld [vmem:[#allocation29_spill] sm:$0xff] }
 0x2db   : > { %v3022_v24 = vpop.f32.mrf.mxu1  ;;  %v2933_v34 = vadd.f32 %v6701_v28, %v2721_v2  ;;  %v2936_v51 = vadd.f32 %v6702_v47, %v2724_v50  ;;  %v6707_v2 = vld [vmem:[#allocation30_spill] sm:$0xff]  ;;  %v6708_v28 = vld [vmem:[#allocation32_spill] sm:$0xff]  ;;  %v6709_v43 = vld [vmem:[#allocation35_spill] sm:$0xff] }
 0x2dc   : > { %4586 = vpow2.f32 %v3206_v46  ;;  %v3202_v17 = vmul.f32 1.442695, %v3166_v25  ;;  %v3169_v38 = vsub.f32 0.0, %v6297_v8  ;;  %v6307_v29 = vadd.f32 %v3022_v24, %v2930_v58  ;;  %v6706_v24 = vld [vmem:[#allocation33_spill] sm:$0xff] }
 0x2dd   : > { %v4377_v20 = vpop.f32.mrf.mxu1  ;;  %v2934_v58 = vadd.f32 %v6705_v63, %v2722_v56  ;;  %v2939_v60 = vadd.f32 %v6706_v24, %v2727_v16  ;;  %v2731_v50 = vadd.f32 %v6707_v2, %v6190_v55  ;;  %v2729_v6 = vadd.f32 %v6708_v28, %v6201_v59  ;;  %v6711_v63 = vld [vmem:[#allocation34_spill] sm:$0xff]  ;;  %v6712_v24 = vld [vmem:[#allocation36_spill] sm:$0xff] }
 0x2de   : > { %4588 = vpow2.f32 %v3202_v17  ;;  %v3208_v37 = vmul.f32 1.442695, %v3169_v38  ;;  %v3167_v46 = vsub.f32 0.0, %v6307_v29  ;;  %v6316_v25 = vadd.f32 %v4377_v20, %v2935_v4  ;;  %v6710_v20 = vld [vmem:[#allocation37_spill] sm:$0xff] }
 0x2df   : > { %v3035_v47 = vpop.f32.mrf.mxu1  ;;  %v2937_v56 = vadd.f32 %v6709_v43, %v2725_v61  ;;  %v2940_v16 = vadd.f32 %v6710_v20, %v2728_v62  ;;  %v2732_v55 = vadd.f32 %v6711_v63, %v6205_v32  ;;  %v2730_v59 = vadd.f32 %v6712_v24, %v6214_v52  ;;  %v6714_v61 = vld [vmem:[#allocation38_spill] sm:$0xff]  ;;  %v4363_v20 = vpop.f32.mrf.mxu0 }
 0x2e0   : > { %4590 = vpow2.f32 %v3208_v37  ;;  %v3204_v19 = vmul.f32 1.442695, %v3167_v46  ;;  %v3172_v17 = vsub.f32 0.0, %v6316_v25  ;;  %v6327_v38 = vadd.f32 %v3035_v47, %v2933_v34  ;;  %v6713_v34 = vld [vmem:[#allocation39_spill] sm:$0xff] }
 0x2e1   : > { %v4579_v4 = vpop.eup %4578  ;;  %v4378_v2 = vpop.f32.mrf.mxu1  ;;  %v2938_v47 = vadd.f32 %v6713_v34, %v2726_v30  ;;  %v2943_v41 = vadd.f32 %v6089_v27, %v2731_v50  ;;  %v2735_v62 = vadd.f32 %v6714_v61, %v6222_v36  ;;  %v6348_v30 = vadd.f32 %v6099_v12, %v2732_v55 }
 0x2e2   : > { %v3260_v28 = vadd.f32 1.0, %v4579_v4  ;;  %4592 = vpow2.f32 %v3204_v19  ;;  %v3214_v37 = vmul.f32 1.442695, %v3172_v17  ;;  %v3170_v46 = vsub.f32 0.0, %v6327_v38  ;;  %v6715_v17 = vld [vmem:[#allocation42_spill] sm:$0xff] }
 0x2e3   : > { %v4581_v40 = vpop.eup %4580  ;;  %v6340_v43 = vadd.f32 %v4378_v2, %v2936_v51  ;;  %v3038_v32 = vpop.f32.mrf.mxu1  ;;  %v6345_v24 = vadd.f32 %v6715_v17, %v2729_v6 }
 0x2e4   : > { %4594 = vrcp.f32 %v3260_v28  ;;  %v3258_v52 = vadd.f32 1.0, %v4581_v40  ;;  %v3210_v63 = vmul.f32 1.442695, %v3170_v46  ;;  %v6342_v4 = vadd.f32 %v3038_v32, %v2934_v58  ;;  %v2910_v28 = vpop.f32.mrf.mxu0 }
 0x2e5   : > { %v4583_v19 = vpop.eup %4582  ;;  %4596 = vpow2.f32 %v3214_v37  ;;  %v3173_v27 = vsub.f32 0.0, %v6340_v43  ;;  %v4381_v36 = vpop.f32.mrf.mxu1  ;;  %v6355_v40 = vadd.f32 %v6104_v14, %v2730_v59  ;;  %v6358_v58 = vadd.f32 %v6111_v15, %v2735_v62  ;;  %v6717_v14 = vld [vmem:[#allocation41_spill] sm:$0xff] }
 0x2e6   : > { %4598 = vrcp.f32 %v3258_v52  ;;  %v3261_v51 = vadd.f32 1.0, %v4583_v19  ;;  %v3171_v50 = vsub.f32 0.0, %v6342_v4  ;;  %v6352_v2 = vadd.f32 %v4381_v36, %v2939_v60  ;;  %v6716_v60 = vld [vmem:[#allocation40_spill] sm:$0xff] }
 0x2e7   : > { %4600 = vpow2.f32 %v3210_v63  ;;  %v3216_v6 = vmul.f32 1.442695, %v3173_v27  ;;  %v3051_v12 = vpop.f32.mrf.mxu1  ;;  %v4585_v55 = vpop.eup %4584  ;;  %v6365_v32 = vadd.f32 %v6139_v54, %v6716_v60  ;;  %v6369_v15 = vadd.f32 %v6194_v18, %v6717_v14  ;;  %v6719_v36 = vld [vmem:[#allocation44_spill] sm:$0xff] }
 0x2e8   : > { %4602 = vrcp.f32 %v3261_v51  ;;  %v3212_v37 = vmul.f32 1.442695, %v3171_v50  ;;  %v3176_v46 = vsub.f32 0.0, %v6352_v2  ;;  %v6361_v34 = vadd.f32 %v3051_v12, %v2937_v56  ;;  %v6718_v56 = vld [vmem:[#allocation43_spill] sm:$0xff]  ;;  %v4364_v50 = vpop.f32.mrf.mxu0 }
 0x2e9   : > { %v4587_v61 = vpop.eup %4586  ;;  %v3259_v59 = vadd.f32 1.0, %v4585_v55  ;;  %4604 = vpow2.f32 %v3216_v6  ;;  %v4382_v62 = vpop.f32.mrf.mxu1  ;;  %v6374_v27 = vadd.f32 %v6231_v31, %v6718_v56  ;;  %v6378_v54 = vadd.f32 %v6262_v49, %v6719_v36 }
 0x2ea   : > { %v3264_v52 = vadd.f32 1.0, %v4587_v61  ;;  %4606 = vpow2.f32 %v3212_v37  ;;  %v3222_v63 = vmul.f32 1.442695, %v3176_v46  ;;  %v3174_v19 = vsub.f32 0.0, %v6361_v34 }
 0x2eb   : > { %v4589_v17 = vpop.eup %4588  ;;  %4608 = vrcp.f32 %v3259_v59  ;;  %v6380_v18 = vadd.f32 %v4382_v62, %v2940_v16  ;;  %v3054_v51 = vpop.f32.mrf.mxu1  ;;  %v6386_v46 = vadd.f32 %v6284_v39, %v6107_v33  ;;  %v6390_v31 = vadd.f32 %v6304_v7, %v6109_v3 }
 0x2ec   : > { %4610 = vrcp.f32 %v3264_v52  ;;  %v3262_v6 = vadd.f32 1.0, %v4589_v17  ;;  %v3218_v12 = vmul.f32 1.442695, %v3174_v19  ;;  %v6382_v55 = vadd.f32 %v3054_v51, %v2938_v47  ;;  %v2913_v59 = vpop.f32.mrf.mxu0 }
 0x2ed   : > { %v4591_v37 = vpop.eup %4590  ;;  %4612 = vpow2.f32 %v3222_v63  ;;  %v3177_v49 = vsub.f32 0.0, %v6380_v18  ;;  %v4385_v16 = vpop.f32.mrf.mxu1  ;;  %v6398_v33 = vadd.f32 %v6324_v44, %v6113_v23  ;;  %v6401_v39 = vadd.f32 %v4363_v20, %v6121_v26 }
 0x2ee   : > { %4614 = vrcp.f32 %v3262_v6  ;;  %v3265_v61 = vadd.f32 1.0, %v4591_v37  ;;  %v3175_v60 = vsub.f32 0.0, %v6382_v55  ;;  %v6394_v47 = vadd.f32 %v4385_v16, %v2943_v41 }
 0x2ef   : > { %v4593_v14 = vpop.eup %4592  ;;  %4616 = vpow2.f32 %v3218_v12  ;;  %v3224_v3 = vmul.f32 1.442695, %v3177_v49  ;;  %v3067_v7 = vpop.f32.mrf.mxu1  ;;  %v6405_v41 = vadd.f32 %v2910_v28, %v6142_v10  ;;  %v6408_v17 = vadd.f32 %v4364_v50, %v6170_v57 }
 0x2f0   : > { %4618 = vrcp.f32 %v3265_v61  ;;  %v3263_v62 = vadd.f32 1.0, %v4593_v14  ;;  %v3220_v52 = vmul.f32 1.442695, %v3175_v60  ;;  %v3180_v63 = vsub.f32 0.0, %v6394_v47 }
 0x2f1   : > { %v4595_v19 = vpop.eup %4594  ;;  %4620 = vpow2.f32 %v3224_v3  ;;  %v6411_v26 = vadd.f32 %v3067_v7, %v6345_v24  ;;  %v4386_v23 = vpop.f32.mrf.mxu1  ;;  %v6418_v10 = vadd.f32 %v2913_v59, %v6197_v1  ;;  %v6720_v6 = vunpack.c.l.bf16 %v6185_v22 }
 0x2f2   : > { %v4597_v44 = vpop.eup %4596  ;;  %v3324_v20 = vmul.f32 %v4595_v19, %v6218_v5  ;;  %4622 = vrcp.f32 %v3263_v62  ;;  %v3230_v56 = vmul.f32 1.442695, %v3180_v63  ;;  %v6415_v36 = vadd.f32 %v4386_v23, %v6348_v30 }
 0x2f3   : > { %v4599_v51 = vpop.eup %4598  ;;  %v3268_v57 = vadd.f32 1.0, %v4597_v44  ;;  %4624 = vpow2.f32 %v3220_v52  ;;  %v3178_v28 = vsub.f32 0.0, %v6411_v26  ;;  %v3070_v24 = vpop.f32.mrf.mxu1  ;;  %v6721_v14 = vunpack.c.l.bf16 %v6116_v0 }
 0x2f4   : > { %v4601_v50 = vpop.eup %4600  ;;  %v3388_v12 = vadd.f32 %v6720_v6, %v3324_v20  ;;  %v3322_v5 = vmul.f32 %v4599_v51, %v6234_v45  ;;  %4626 = vpow2.f32 %v3230_v56  ;;  %v3181_v37 = vsub.f32 0.0, %v6415_v36 }
 0x2f5   : > { %v4603_v30 = vpop.eup %4602  ;;  %4628 = vrcp.f32 %v3268_v57  ;;  %v3266_v1 = vadd.f32 1.0, %v4601_v50  ;;  %v3226_v49 = vmul.f32 1.442695, %v3178_v28  ;;  %v6433_v16 = vadd.f32 %v3070_v24, %v6355_v40  ;;  %v4389_v61 = vpop.f32.mrf.mxu1 }
 0x2f6   : > { %v4605_v60 = vpop.eup %4604  ;;  %v3859_v45 = vpack.c.bf16 %v3388_v12, %v3388_v12  ;;  %v3386_v3 = vadd.f32 %v6721_v14, %v3322_v5  ;;  %v3325_v7 = vmul.f32 %v4603_v30, %v6249_v13  ;;  %v3232_v59 = vmul.f32 1.442695, %v3181_v37 }
 0x2f7   : > { %v4607_v62 = vpop.eup %4606  ;;  %4630 = vrcp.f32 %v3266_v1  ;;  %v3269_v52 = vadd.f32 1.0, %v4605_v60  ;;  %v3179_v63 = vsub.f32 0.0, %v6433_v16  ;;  %v6440_v19 = vadd.f32 %v4389_v61, %v6358_v58  ;;  %v3083_v40 = vpop.f32.mrf.mxu1 }
 0x2f8   : > { %v4609_v23 = vpop.eup %4608  ;;  %3549 = vst.msk [vmem:[%s6430_s29 + $0x8] sm:$0xf] %vm3546_vm5, %v3859_v45  ;;  %v3857_v44 = vpack.c.bf16 %v3386_v3, %v3386_v3  ;;  %v6722_v20 = vunpack.c.h.bf16 %v6185_v22  ;;  %v3267_v51 = vadd.f32 1.0, %v4607_v62  ;;  %4632 = vpow2.f32 %v3226_v49 }
 0x2f9   : > { %v4611_v13 = vpop.eup %4610  ;;  %v3323_v57 = vmul.f32 %v4609_v23, %v6267_v35  ;;  %4634 = vrcp.f32 %v3269_v52  ;;  %v3228_v28 = vmul.f32 1.442695, %v3179_v63  ;;  %v3184_v24 = vsub.f32 0.0, %v6440_v19  ;;  %v4390_v58 = vpop.f32.mrf.mxu1 }
 0x2fa   : > { %v3389_v56 = vadd.f32 %v6722_v20, %v3325_v7  ;;  %v4613_v50 = vpop.eup %4612  ;;  %3547 = vst.msk [vmem:[%s6430_s29] sm:$0xf] %vm3546_vm5, %v3857_v44  ;;  %v3328_v12 = vmul.f32 %v4611_v13, %v6272_v21  ;;  %4636 = vrcp.f32 %v3267_v51  ;;  %v6452_v22 = vadd.f32 %v3083_v40, %v6365_v32 }
 0x2fb   : > { %v4615_v5 = vpop.eup %4614  ;;  %v6723_v37 = vunpack.c.h.bf16 %v6116_v0  ;;  %v3272_v30 = vadd.f32 1.0, %v4613_v50  ;;  %4638 = vpow2.f32 %v3232_v59  ;;  %v3238_v1 = vmul.f32 1.442695, %v3184_v24  ;;  %v3086_v49 = vpop.f32.mrf.mxu1 }
 0x2fc   : > { %v3860_v6 = vpack.c.bf16 %v3389_v56, %v3389_v56  ;;  %v4617_v61 = vpop.eup %4616  ;;  %v6724_v60 = vunpack.c.l.bf16 %v6209_v11  ;;  %v3326_v21 = vmul.f32 %v4615_v5, %v6287_v53  ;;  %4640 = vpow2.f32 %v3228_v28 }
 0x2fd   : > { %v3387_v35 = vadd.f32 %v6723_v37, %v3323_v57  ;;  %v3182_v32 = vsub.f32 0.0, %v6452_v22  ;;  %v4619_v14 = vpop.eup %4618  ;;  %4642 = vrcp.f32 %v3272_v30  ;;  %v3270_v0 = vadd.f32 1.0, %v4617_v61  ;;  %v4393_v59 = vpop.f32.mrf.mxu1 }
 0x2fe   : > { %3550 = vst.msk [vmem:[%s6430_s29 + $0xc] sm:$0xf] %vm3546_vm5, %v3860_v6  ;;  %v3392_v45 = vadd.f32 %v6724_v60, %v3328_v12  ;;  %v6463_v7 = vadd.f32 %v4390_v58, %v6369_v15  ;;  %v4621_v62 = vpop.eup %4620  ;;  %v6725_v63 = vunpack.c.l.bf16 %v6225_v48  ;;  %v3329_v23 = vmul.f32 %v4619_v14, %v6297_v8 }
 0x2ff   : > { %v3858_v3 = vpack.c.bf16 %v3387_v35, %v3387_v35  ;;  %4644 = vpow2.f32 %v3238_v1  ;;  %v4623_v53 = vpop.eup %4622  ;;  %v3273_v44 = vadd.f32 1.0, %v4621_v62  ;;  %v3234_v20 = vmul.f32 1.442695, %v3182_v32  ;;  %v3099_v15 = vpop.f32.mrf.mxu1 }
 0x300   : > { %v3863_v52 = vpack.c.bf16 %v3392_v45, %v3392_v45  ;;  %v3390_v40 = vadd.f32 %v6725_v63, %v3326_v21  ;;  %4646 = vrcp.f32 %v3270_v0  ;;  %v3185_v56 = vsub.f32 0.0, %v6463_v7  ;;  %v4625_v51 = vpop.eup %4624 }
 0x301   : > { %3548 = vst.msk [vmem:[%s6430_s29 + $0x4] sm:$0xf] %vm3546_vm5, %v3858_v3  ;;  %v6726_v57 = vunpack.c.h.bf16 %v6209_v11  ;;  %v3327_v8 = vmul.f32 %v4623_v53, %v6307_v29  ;;  %v6477_v24 = vadd.f32 %v3086_v49, %v6374_v27  ;;  %v4627_v58 = vpop.eup %4626  ;;  %4648 = vrcp.f32 %v3273_v44  ;;  %v4394_v5 = vpop.f32.mrf.mxu1 }
 0x302   : > { %3553 = vst.msk [vmem:[%s6430_s29 + $0x18] sm:$0xf] %vm3546_vm5, %v3863_v52  ;;  %v3861_v13 = vpack.c.bf16 %v3390_v40, %v3390_v40  ;;  %v3271_v50 = vadd.f32 1.0, %v4625_v51  ;;  %v3240_v6 = vmul.f32 1.442695, %v3185_v56  ;;  %v6480_v12 = vadd.f32 %v4393_v59, %v6378_v54  ;;  %v4629_v37 = vpop.eup %4628 }
 0x303   : > { %v3393_v28 = vadd.f32 %v6726_v57, %v3329_v23  ;;  %v6727_v11 = vunpack.c.h.bf16 %v6225_v48  ;;  %v3276_v29 = vadd.f32 1.0, %v4627_v58  ;;  %4650 = vpow2.f32 %v3234_v20  ;;  %v3102_v54 = vpop.f32.mrf.mxu1 }
 0x304   : > { %3551 = vst.msk [vmem:[%s6430_s29 + $0x10] sm:$0xf] %vm3546_vm5, %v3861_v13  ;;  %v3332_v27 = vmul.f32 %v4629_v37, %v6316_v25  ;;  %4652 = vrcp.f32 %v3271_v50  ;;  %v3183_v1 = vsub.f32 0.0, %v6477_v24  ;;  %v3188_v49 = vsub.f32 0.0, %v6480_v12  ;;  %v4631_v61 = vpop.eup %4630 }
 0x305   : > { %v3864_v35 = vpack.c.bf16 %v3393_v28, %v3393_v28  ;;  %v3391_v30 = vadd.f32 %v6727_v11, %v3327_v8  ;;  %4654 = vrcp.f32 %v3276_v29  ;;  %v6492_v45 = vadd.f32 %v3099_v15, %v6386_v46  ;;  %v4633_v21 = vpop.eup %4632  ;;  %v4397_v0 = vpop.f32.mrf.mxu1 }
 0x306   : > { %v6495_v48 = vadd.f32 %v4394_v5, %v6390_v31  ;;  %v6728_v25 = vunpack.c.l.bf16 %v6237_v9  ;;  %v3330_v14 = vmul.f32 %v4631_v61, %v6327_v38  ;;  %4656 = vpow2.f32 %v3240_v6  ;;  %v4635_v59 = vpop.eup %4634 }
 0x307   : > { %3554 = vst.msk [vmem:[%s6430_s29 + $0x1c] sm:$0xf] %vm3546_vm5, %v3864_v35  ;;  %v3862_v60 = vpack.c.bf16 %v3391_v30, %v3391_v30  ;;  %v3236_v3 = vmul.f32 1.442695, %v3183_v1  ;;  %v3274_v62 = vadd.f32 1.0, %v4633_v21  ;;  %v3186_v46 = vsub.f32 0.0, %v6492_v45  ;;  %v4637_v63 = vpop.eup %4636  ;;  %v3115_v44 = vpop.f32.mrf.mxu1 }
 0x308   : > { %v3396_v32 = vadd.f32 %v6728_v25, %v3332_v27  ;;  %v3246_v52 = vmul.f32 1.442695, %v3188_v49  ;;  %v3189_v31 = vsub.f32 0.0, %v6495_v48  ;;  %v6729_v23 = vunpack.c.l.bf16 %v6242_v42  ;;  %v4639_v20 = vpop.eup %4638 }
 0x309   : > { %3552 = vst.msk [vmem:[%s6430_s29 + $0x14] sm:$0xf] %vm3546_vm5, %v3862_v60  ;;  %v3333_v38 = vmul.f32 %v4635_v59, %v6340_v43  ;;  %4658 = vpow2.f32 %v3236_v3  ;;  %v3331_v56 = vmul.f32 %v4637_v63, %v6342_v4  ;;  %v3242_v15 = vmul.f32 1.442695, %v3186_v46  ;;  %v4641_v13 = vpop.eup %4640  ;;  %v4398_v30 = vpop.f32.mrf.mxu1  ;;  %v6734_v3 = vld [vmem:[#allocation3_spill] sm:$0xff] }
 0x30a   : > { %v3867_v40 = vpack.c.bf16 %v3396_v32, %v3396_v32  ;;  %v3394_v53 = vadd.f32 %v6729_v23, %v3330_v14  ;;  %4660 = vrcp.f32 %v3274_v62  ;;  %v3248_v51 = vmul.f32 1.442695, %v3189_v31  ;;  %v4643_v50 = vpop.eup %4642 }
 0x30b   : > { %v6730_v28 = vunpack.c.h.bf16 %v6237_v9  ;;  %v3277_v58 = vadd.f32 1.0, %v4639_v20  ;;  %4662 = vpow2.f32 %v3246_v52  ;;  %v6731_v43 = vunpack.c.h.bf16 %v6242_v42  ;;  %v3118_v63 = vpop.f32.mrf.mxu1 }
 0x30c   : > { %3557 = vst.msk [vmem:[%s6430_s29 + $0x28] sm:$0xf] %vm3546_vm5, %v3867_v40  ;;  %v3865_v57 = vpack.c.bf16 %v3394_v53, %v3394_v53  ;;  %v3275_v5 = vadd.f32 1.0, %v4641_v13  ;;  %4664 = vpow2.f32 %v3242_v15  ;;  %v6515_v4 = vadd.f32 %v3102_v54, %v6398_v33  ;;  %v4645_v37 = vpop.eup %4644  ;;  %v6732_v33 = vld [vmem:[#allocation5_spill] sm:$0xff] }
 0x30d   : > { %v3397_v8 = vadd.f32 %v6730_v28, %v3333_v38  ;;  %v3395_v6 = vadd.f32 %v6731_v43, %v3331_v56  ;;  %v3336_v9 = vmul.f32 %v4643_v50, %v6352_v2  ;;  %4666 = vrcp.f32 %v3277_v58  ;;  %v4647_v42 = vpop.eup %4646  ;;  %v4715_v43 = vld [vmem:[%s4782_s25 + $0x40] sm:$0xff]  }
 0x30e   : > { %3555 = vst.msk [vmem:[%s6430_s29 + $0x20] sm:$0xf] %vm3546_vm5, %v3865_v57  ;;  %v6521_v11 = vadd.f32 %v4397_v0, %v6401_v39  ;;  %4668 = vrcp.f32 %v3275_v5  ;;  %v3280_v27 = vadd.f32 1.0, %v4645_v37  ;;  %v3187_v1 = vsub.f32 0.0, %v6515_v4  ;;  %v4649_v60 = vpop.eup %4648 }
 0x30f   : > { %v3868_v35 = vpack.c.bf16 %v3397_v8, %v3397_v8  ;;  %v3866_v29 = vpack.c.bf16 %v3395_v6, %v3395_v6  ;;  %v6733_v49 = vunpack.c.l.bf16 %v6732_v33  ;;  %v3334_v61 = vmul.f32 %v4647_v42, %v6361_v34 }
 0x310   : > { %4670 = vpow2.f32 %v3248_v51  ;;  %v3192_v2 = vsub.f32 0.0, %v6521_v11  ;;  %v3244_v39 = vmul.f32 1.442695, %v3187_v1  ;;  %v6533_v21 = vadd.f32 %v3115_v44, %v6405_v41  ;;  %v4651_v32 = vpop.eup %4650 }
 0x311   : > { %3558 = vst.msk [vmem:[%s6430_s29 + $0x2c] sm:$0xf] %vm3546_vm5, %v3868_v35  ;;  %v3400_v54 = vadd.f32 %v6733_v49, %v3336_v9  ;;  %3556 = vst.msk [vmem:[%s6430_s29 + $0x24] sm:$0xf] %vm3546_vm5, %v3866_v29  ;;  %4672 = vrcp.f32 %v3280_v27  ;;  %v6536_v25 = vadd.f32 %v4398_v30, %v6408_v17  ;;  %v6735_v0 = vunpack.c.l.bf16 %v6734_v3  ;;  %v4653_v52 = vpop.eup %4652 }
 0x312   : > { %v3337_v59 = vmul.f32 %v4649_v60, %v6380_v18  ;;  %v3254_v62 = vmul.f32 1.442695, %v3192_v2  ;;  %v3278_v46 = vadd.f32 1.0, %v4651_v32  ;;  %4674 = vpow2.f32 %v3244_v39  ;;  %v4655_v40 = vpop.eup %4654 }
 0x313   : > { %v3871_v14 = vpack.c.bf16 %v3400_v54, %v3400_v54  ;;  %v3398_v34 = vadd.f32 %v6735_v0, %v3334_v61  ;;  %v3190_v31 = vsub.f32 0.0, %v6533_v21  ;;  %v3193_v41 = vsub.f32 0.0, %v6536_v25  ;;  %v4657_v38 = vpop.eup %4656 }
 0x314   : > { %v6736_v23 = vunpack.c.h.bf16 %v6732_v33  ;;  %v3335_v18 = vmul.f32 %v4653_v52, %v6382_v55  ;;  %4676 = vpow2.f32 %v3254_v62  ;;  %v3340_v44 = vmul.f32 %v4655_v40, %v6394_v47  ;;  %v6738_v55 = vld [vmem:[#allocation6_spill] sm:$0xff] }
 0x315   : > { %3561 = vst.msk [vmem:[%s6430_s29 + $0x38] sm:$0xf] %vm3546_vm5, %v3871_v14  ;;  %v3869_v17 = vpack.c.bf16 %v3398_v34, %v3398_v34  ;;  %4678 = vrcp.f32 %v3278_v46  ;;  %v3250_v20 = vmul.f32 1.442695, %v3190_v31  ;;  %v3256_v56 = vmul.f32 1.442695, %v3193_v41 }
 0x316   : > { %v3401_v53 = vadd.f32 %v6736_v23, %v3337_v59  ;;  %v6737_v51 = vunpack.c.h.bf16 %v6734_v3  ;;  %v3281_v57 = vadd.f32 1.0, %v4657_v38  ;;  %v6554_v28 = vadd.f32 %v3118_v63, %v6418_v10  ;;  %v4659_v8 = vpop.eup %4658  ;;  %v4716_v14 = vld [vmem:[%s4782_s25 + $0x58] sm:$0xff]   ;;  %v4717_v63 = vld [vmem:[%s4782_s25 + $0x50] sm:$0xff]  }
 0x317   : > { %3559 = vst.msk [vmem:[%s6430_s29 + $0x30] sm:$0xf] %vm3546_vm5, %v3869_v17  ;;  %v6739_v58 = vunpack.c.l.bf16 %v6738_v55  ;;  %v3370_v47 = vunpack.c.l.bf16 %v4715_v43  ;;  %4680 = vpow2.f32 %v3250_v20  ;;  %v4661_v6 = vpop.eup %4660  ;;  %v3279_v37 = vadd.f32 1.0, %v4659_v8 }
 0x318   : > { %v3872_v15 = vpack.c.bf16 %v3401_v53, %v3401_v53  ;;  %v3399_v13 = vadd.f32 %v6737_v51, %v3335_v18  ;;  %4682 = vrcp.f32 %v3281_v57  ;;  %v3191_v35 = vsub.f32 0.0, %v6554_v28  ;;  %v4663_v9 = vpop.eup %4662 }
 0x319   : > { %v3404_v50 = vadd.f32 %v6739_v58, %v3340_v44  ;;  %v3338_v30 = vmul.f32 %v4661_v6, %v6411_v26  ;;  %4684 = vpow2.f32 %v3256_v56  ;;  %v4665_v42 = vpop.eup %4664  ;;  %v3373_v29 = vunpack.c.h.bf16 %v6738_v55 }
 0x31a   : > { %3562 = vst.msk [vmem:[%s6430_s29 + $0x3c] sm:$0xf] %vm3546_vm5, %v3872_v15  ;;  %v3870_v5 = vpack.c.bf16 %v3399_v13, %v3399_v13  ;;  %4686 = vrcp.f32 %v3279_v37  ;;  %v3284_v27 = vadd.f32 1.0, %v4663_v9  ;;  %v3252_v1 = vmul.f32 1.442695, %v3191_v35  ;;  %v4667_v33 = vpop.eup %4666 }
 0x31b   : > { %v3875_v10 = vpack.c.bf16 %v3404_v50, %v3404_v50  ;;  %v3402_v49 = vadd.f32 %v3370_v47, %v3338_v30  ;;  %v3371_v54 = vunpack.c.h.bf16 %v4715_v43  ;;  %v3282_v61 = vadd.f32 1.0, %v4665_v42  ;;  %v4669_v2 = vpop.eup %4668  ;;  %v4718_v43 = vld [vmem:[%s4782_s25 + $0x68] sm:$0xff]  }
 0x31c   : > { %3560 = vst.msk [vmem:[%s6430_s29 + $0x34] sm:$0xf] %vm3546_vm5, %v3870_v5  ;;  %v3341_v26 = vmul.f32 %v4667_v33, %v6415_v36  ;;  %4688 = vrcp.f32 %v3284_v27  ;;  %v3339_v32 = vmul.f32 %v4669_v2, %v6433_v16  ;;  %v3376_v3 = vunpack.c.l.bf16 %v4716_v14  ;;  %v4719_v5 = vld [vmem:[%s4782_s25 + $0x60] sm:$0xff]  }
 0x31d   : > { %3565 = vst.msk [vmem:[%s6430_s29 + $0x48] sm:$0xf] %vm3546_vm5, %v3875_v10  ;;  %v4671_v60 = vpop.eup %4670  ;;  %v3873_v39 = vpack.c.bf16 %v3402_v49, %v3402_v49  ;;  %4690 = vrcp.f32 %v3282_v61  ;;  %v3374_v40 = vunpack.c.l.bf16 %v4717_v63  ;;  %v3377_v44 = vunpack.c.h.bf16 %v4716_v14 }
 0x31e   : > { %v4673_v0 = vpop.eup %4672  ;;  %v3405_v34 = vadd.f32 %v3373_v29, %v3341_v26  ;;  %v3285_v59 = vadd.f32 1.0, %v4671_v60  ;;  %4692 = vpow2.f32 %v3252_v1  ;;  %v3403_v62 = vadd.f32 %v3371_v54, %v3339_v32  ;;  %v4720_v60 = vld [vmem:[%s4782_s25 + $0x78] sm:$0xff]  }
 0x31f   : > { %3563 = vst.msk [vmem:[%s6430_s29 + $0x40] sm:$0xf] %vm3546_vm5, %v3873_v39  ;;  %v3344_v36 = vmul.f32 %v4673_v0, %v6440_v19  ;;  %v4675_v52 = vpop.eup %4674  ;;  %v3375_v57 = vunpack.c.h.bf16 %v4717_v63  ;;  %v3380_v47 = vunpack.c.l.bf16 %v4718_v43  ;;  %v3378_v37 = vunpack.c.l.bf16 %v4719_v5 }
 0x320   : > { %v3876_v46 = vpack.c.bf16 %v3405_v34, %v3405_v34  ;;  %4694 = vrcp.f32 %v3285_v59  ;;  %v3874_v16 = vpack.c.bf16 %v3403_v62, %v3403_v62  ;;  %v3283_v17 = vadd.f32 1.0, %v4675_v52  ;;  %v4721_v34 = vld [vmem:[%s4782_s25 + $0x70] sm:$0xff]  }
 0x321   : > { %v4677_v31 = vpop.eup %4676  ;;  %v3408_v41 = vadd.f32 %v3376_v3, %v3344_v36  ;;  %v3381_v27 = vunpack.c.h.bf16 %v4718_v43  ;;  %v3384_v39 = vunpack.c.l.bf16 %v4720_v60  ;;  %v3382_v59 = vunpack.c.l.bf16 %v4721_v34 }
 0x322   : > { %v4679_v23 = vpop.eup %4678  ;;  %3566 = vst.msk [vmem:[%s6430_s29 + $0x4c] sm:$0xf] %vm3546_vm5, %v3876_v46  ;;  %v3288_v53 = vadd.f32 1.0, %v4677_v31  ;;  %3564 = vst.msk [vmem:[%s6430_s29 + $0x44] sm:$0xf] %vm3546_vm5, %v3874_v16  ;;  %4696 = vrcp.f32 %v3283_v17  ;;  %v3385_v31 = vunpack.c.h.bf16 %v4720_v60  ;;  %v3383_v17 = vunpack.c.h.bf16 %v4721_v34 }
 0x323   : > { %v3879_v18 = vpack.c.bf16 %v3408_v41, %v3408_v41  ;;  %v3342_v38 = vmul.f32 %v4679_v23, %v6452_v22 }
 0x324   : > { %v4681_v19 = vpop.eup %4680  ;;  %4698 = vrcp.f32 %v3288_v53 }
 0x325   : > { %v4683_v20 = vpop.eup %4682  ;;  %3569 = vst.msk [vmem:[%s6430_s29 + $0x58] sm:$0xf] %vm3546_vm5, %v3879_v18  ;;  %v3406_v56 = vadd.f32 %v3374_v40, %v3342_v38  ;;  %v3286_v15 = vadd.f32 1.0, %v4681_v19 }
 0x326   : > { %v4685_v51 = vpop.eup %4684  ;;  %v3345_v13 = vmul.f32 %v4683_v20, %v6463_v7 }
 0x327   : > { %v4687_v8 = vpop.eup %4686  ;;  %v3877_v55 = vpack.c.bf16 %v3406_v56, %v3406_v56  ;;  %4700 = vrcp.f32 %v3286_v15  ;;  %v3289_v22 = vadd.f32 1.0, %v4685_v51 }
 0x328   : > { %v3409_v58 = vadd.f32 %v3377_v44, %v3345_v13  ;;  %v3343_v50 = vmul.f32 %v4687_v8, %v6477_v24 }
 0x329   : > { %v4689_v6 = vpop.eup %4688  ;;  %3567 = vst.msk [vmem:[%s6430_s29 + $0x50] sm:$0xf] %vm3546_vm5, %v3877_v55  ;;  %4702 = vrcp.f32 %v3289_v22 }
 0x32a   : > { %v4691_v35 = vpop.eup %4690  ;;  %v3880_v7 = vpack.c.bf16 %v3409_v58, %v3409_v58  ;;  %v3407_v9 = vadd.f32 %v3375_v57, %v3343_v50  ;;  %v3348_v10 = vmul.f32 %v4689_v6, %v6480_v12 }
 0x32b   : > { %v4693_v30 = vpop.eup %4692  ;;  %v3346_v42 = vmul.f32 %v4691_v35, %v6492_v45  ;;  %v3379_v45 = vunpack.c.h.bf16 %v4719_v5 }
 0x32c   : > { %3570 = vst.msk [vmem:[%s6430_s29 + $0x5c] sm:$0xf] %vm3546_vm5, %v3880_v7  ;;  %v3878_v24 = vpack.c.bf16 %v3407_v9, %v3407_v9  ;;  %v3412_v29 = vadd.f32 %v3380_v47, %v3348_v10  ;;  %v3287_v1 = vadd.f32 1.0, %v4693_v30 }
 0x32d   : > { %v4695_v33 = vpop.eup %4694  ;;  %v3410_v49 = vadd.f32 %v3378_v37, %v3346_v42 }
 0x32e   : > { %3568 = vst.msk [vmem:[%s6430_s29 + $0x54] sm:$0xf] %vm3546_vm5, %v3878_v24  ;;  %v3883_v54 = vpack.c.bf16 %v3412_v29, %v3412_v29  ;;  %v3349_v12 = vmul.f32 %v4695_v33, %v6495_v48  ;;  %4704 = vrcp.f32 %v3287_v1 }
 0x32f   : > { %v3881_v61 = vpack.c.bf16 %v3410_v49, %v3410_v49  ;;  %v4697_v2 = vpop.eup %4696 }
 0x330   : > { %3573 = vst.msk [vmem:[%s6430_s29 + $0x68] sm:$0xf] %vm3546_vm5, %v3883_v54  ;;  %v3413_v26 = vadd.f32 %v3381_v27, %v3349_v12  ;;  %v3347_v14 = vmul.f32 %v4697_v2, %v6515_v4 }
 0x331   : > { %v4699_v32 = vpop.eup %4698  ;;  %3571 = vst.msk [vmem:[%s6430_s29 + $0x60] sm:$0xf] %vm3546_vm5, %v3881_v61 }
 0x332   : > { %v3884_v3 = vpack.c.bf16 %v3413_v26, %v3413_v26  ;;  %v3352_v48 = vmul.f32 %v4699_v32, %v6521_v11  ;;  %v3411_v0 = vadd.f32 %v3379_v45, %v3347_v14 }
 0x334   : > { %v4701_v62 = vpop.eup %4700  ;;  %3574 = vst.msk [vmem:[%s6430_s29 + $0x6c] sm:$0xf] %vm3546_vm5, %v3884_v3  ;;  %v3416_v36 = vadd.f32 %v3384_v39, %v3352_v48  ;;  %v3882_v52 = vpack.c.bf16 %v3411_v0, %v3411_v0 }
 0x335   : > { %v3350_v46 = vmul.f32 %v4701_v62, %v6533_v21 }
 0x336   : > { %v4703_v16 = vpop.eup %4702  ;;  %v3887_v4 = vpack.c.bf16 %v3416_v36, %v3416_v36  ;;  %3572 = vst.msk [vmem:[%s6430_s29 + $0x64] sm:$0xf] %vm3546_vm5, %v3882_v52 }
 0x337   : > { %v3414_v41 = vadd.f32 %v3382_v59, %v3350_v46  ;;  %v3353_v11 = vmul.f32 %v4703_v16, %v6536_v25 }
 0x338   : > { %3577 = vst.msk [vmem:[%s6430_s29 + $0x78] sm:$0xf] %vm3546_vm5, %v3887_v4 }
 0x339   : > { %v3885_v63 = vpack.c.bf16 %v3414_v41, %v3414_v41  ;;  %v3417_v40 = vadd.f32 %v3385_v31, %v3353_v11 }
 0x33b   : > { %v4705_v23 = vpop.eup %4704  ;;  %3575 = vst.msk [vmem:[%s6430_s29 + $0x70] sm:$0xf] %vm3546_vm5, %v3885_v63  ;;  %v3888_v53 = vpack.c.bf16 %v3417_v40, %v3417_v40 }
 0x33c   : > { %v3351_v21 = vmul.f32 %v4705_v23, %v6554_v28 }
 0x33d   : > { %3578 = vst.msk [vmem:[%s6430_s29 + $0x7c] sm:$0xf] %vm3546_vm5, %v3888_v53 }
 0x33e   : > { %v3415_v18 = vadd.f32 %v3383_v17, %v3351_v21 }
 0x340   : > { %v3886_v38 = vpack.c.bf16 %v3415_v18, %v3415_v18 }
 0x342   : > { %3576 = vst.msk [vmem:[%s6430_s29 + $0x74] sm:$0xf] %vm3546_vm5, %v3886_v38 }
 0x343 PF: > { %s15_s18 = sadd.s32 1, %s4728_s18  }
 0x344   : > { %p12_p4 = scmp.ge.s32.totalorder %s15_s18, 4  }
 0x346   :  { %14 = sbr.rel (!%p12_p4) target bundleno = 1 (0x1), region = 71 }

</bundles_post_ra>
